<compile_context>
chip_gen: v5e
topology: v5e:2x2
jax: 0.10.0
libtpu: 0.0.40
codegen_flags: <defaults>
</compile_context>

<pallas_src>
import math
import numpy as np
import jax
import jax.numpy as jnp
from jax.experimental import pallas as pl
from jax.experimental.pallas import tpu as pltpu

HIDDEN = 32          # encoder.d_model (logical hidden size)
H_PAD = 128          # lane-dense physical hidden size (zero-padded; exact same numerics)
NQ = 5               # num_queries
NUM_T = 1000         # num_timesteps
SAMPLING_T = 5       # sampling_timesteps
SCALE = 2.0
ETA = 1.0
TXT_DIM = 768
VID_DIM = 1024


def _round_up(a, b):
    return (a + b - 1) // b * b


# ----------------------------------------------------------------------------
# diffusion buffers (cosine_beta_schedule) — numpy float64, used only to bake the
# per-step DDIM scalar schedule into the fused sampling kernel as constants.
# ----------------------------------------------------------------------------
def make_diffusion_buffers(T=NUM_T, s=0.008):
    steps = T + 1
    x = np.linspace(0, T, steps, dtype=np.float64)
    ac = np.cos((x / T + s) / (1 + s) * math.pi * 0.5) ** 2
    ac = ac / ac[0]
    betas = np.clip(1.0 - ac[1:] / ac[:-1], 0.0, 0.999)
    alphas = 1.0 - betas
    alphas_cumprod = np.cumprod(alphas)
    return {
        "alphas_cumprod": alphas_cumprod,
        "sqrt_recip_alphas_cumprod": np.sqrt(1.0 / alphas_cumprod),
        "sqrt_recipm1_alphas_cumprod": np.sqrt(1.0 / alphas_cumprod - 1.0),
    }


def make_ddim_schedule(buf, T=NUM_T, S=SAMPLING_T, eta=ETA):
    times = np.linspace(-1, T - 1, S + 1).astype(np.int64)
    times = list(reversed(times.tolist()))
    pairs = list(zip(times[:-1], times[1:]))
    ac = buf["alphas_cumprod"]
    sr = buf["sqrt_recip_alphas_cumprod"]
    srm1 = buf["sqrt_recipm1_alphas_cumprod"]
    sched = []
    for time, time_next in pairs:
        st = {"t_norm": float(time) / float(T), "last": time_next < 0}
        if time_next >= 0:
            alpha = float(ac[time])
            alpha_next = float(ac[time_next])
            sigma = eta * math.sqrt((1 - alpha / alpha_next) * (1 - alpha_next) / (1 - alpha))
            c = math.sqrt(max(0.0, 1.0 - alpha_next - sigma ** 2))
            st.update(sr=float(sr[time]),
                      inv_srm1=float(1.0 / srm1[time]),
                      sqrt_an=float(math.sqrt(alpha_next)),
                      c=float(c),
                      sigma=float(sigma))
        sched.append(st)
    return sched


_BUFFERS = make_diffusion_buffers()
_SCHED = make_ddim_schedule(_BUFFERS)


# ----------------------------------------------------------------------------
# span helpers (match the torch reference; used only for the initial random targets)
# ----------------------------------------------------------------------------
def span_cxw_to_xx(s):
    x1 = s[..., 0] - 0.5 * s[..., 1]
    x2 = s[..., 0] + 0.5 * s[..., 1]
    return jnp.stack([x1, x2], axis=-1)


def sine_pos_embed(L, H):
    pos = np.arange(L, dtype=np.float64)[:, None]
    dim = np.arange(H, dtype=np.float64)[None, :]
    div = 10000.0 ** (2.0 * (dim // 2) / H)
    pe = np.where(dim % 2 == 0, np.sin(pos / div), np.cos(pos / div))
    return jnp.asarray(pe, jnp.float32)  # (L, H)


# ----------------------------------------------------------------------------
# Kernel 1: fused LayerNorm + projection + ReLU + (+pos) + encoder linear + ReLU
# ----------------------------------------------------------------------------
def fused_proj_enc_kernel(x_ref, pos_ref, g_ref, beta_ref, wp_ref, bp_ref,
                          we_ref, be_ref, o_ref):
    x = x_ref[...]                                            # (TM, Din) f32
    mu = jnp.mean(x, axis=-1, keepdims=True)
    var = jnp.mean((x - mu) ** 2, axis=-1, keepdims=True)
    xn = (x - mu) * jax.lax.rsqrt(var + 1e-5)
    xn = xn * g_ref[...] + beta_ref[...]
    # bf16 operands on the big K=1024/768 matmul, f32 accumulate (LN math stays f32)
    h = jnp.dot(xn.astype(jnp.bfloat16), wp_ref[...],
                preferred_element_type=jnp.float32) + bp_ref[...]
    h = jnp.maximum(h, 0.0) + pos_ref[...]                    # encoder input (src + pos)
    y = jnp.dot(h, we_ref[...], preferred_element_type=jnp.float32) + be_ref[...]
    o_ref[...] = jnp.maximum(y, 0.0)


def fused_proj_encoder(x, pos, g, beta, wp_bf16, bp, we, be):
    N, Din = x.shape
    HP = wp_bf16.shape[1]
    TM = min(256, _round_up(N, 8))          # <= ~1 MiB input block; safe for v7x/v5e VMEM
    Npad = _round_up(N, TM)
    if Npad != N:
        x = jnp.pad(x, ((0, Npad - N), (0, 0)))
        pos = jnp.pad(pos, ((0, Npad - N), (0, 0)))
    out = pl.pallas_call(
        fused_proj_enc_kernel,
        out_shape=jax.ShapeDtypeStruct((Npad, HP), jnp.float32),
        grid=(Npad // TM,),
        in_specs=[
            pl.BlockSpec((TM, Din), lambda i: (i, 0)),   # x (row-tiled, double-buffered)
            pl.BlockSpec((TM, HP), lambda i: (i, 0)),    # pos
            pl.BlockSpec((1, Din), lambda i: (0, 0)),    # ln gamma
            pl.BlockSpec((1, Din), lambda i: (0, 0)),    # ln beta
            pl.BlockSpec((Din, HP), lambda i: (0, 0)),   # proj weight (bf16)
            pl.BlockSpec((1, HP), lambda i: (0, 0)),     # proj bias
            pl.BlockSpec((HP, HP), lambda i: (0, 0)),    # encoder weight
            pl.BlockSpec((1, HP), lambda i: (0, 0)),     # encoder bias
        ],
        out_specs=pl.BlockSpec((TM, HP), lambda i: (i, 0)),
        compiler_params=pltpu.CompilerParams(dimension_semantics=("parallel",)),
    )(x, pos, g, beta, wp_bf16, bp, we, be)
    return out[:N]


# ----------------------------------------------------------------------------
# Kernel 2: entire DDIM sampling loop (decoder stand-in + span_embed MLP + update)
# ----------------------------------------------------------------------------
def build_ddim_kernel(sched):
    def kernel(pooled_ref, tinit_ref, noise_ref,
               ws_ref, bs_ref, wt_ref,
               w1_ref, b1_ref, w2_ref, b2_ref, w3_ref, b3_ref,
               o_ref):
        pooled = pooled_ref[...]                 # (R, HP), R = B*NQ
        t_c = tinit_ref[:, 0:1]                  # (R, 1)
        t_w = tinit_ref[:, 1:2]
        oc = ow = None
        for si, st in enumerate(sched):          # static 5-step unroll
            # x_spans = cxw->xx( (clamp(x)/scale + 1)/2 )
            cc = (jnp.clip(t_c, -SCALE, SCALE) / SCALE + 1.0) * 0.5
            ww = (jnp.clip(t_w, -SCALE, SCALE) / SCALE + 1.0) * 0.5
            s1 = cc - 0.5 * ww
            s2 = cc + 0.5 * ww
            # decoder stand-in: span embedding + pooled memory + time embedding
            q = (s1 * ws_ref[0:1, :] + s2 * ws_ref[1:2, :] + bs_ref[...]
                 + pooled + st["t_norm"] * wt_ref[...])                       # (R, HP)
            h1 = jnp.maximum(jnp.dot(q, w1_ref[...],
                                     preferred_element_type=jnp.float32) + b1_ref[...], 0.0)
            h2 = jnp.maximum(jnp.dot(h1, w2_ref[...],
                                     preferred_element_type=jnp.float32) + b2_ref[...], 0.0)
            out = jax.nn.sigmoid(jnp.dot(h2, w3_ref[...],
                                         preferred_element_type=jnp.float32) + b3_ref[...])  # (R, 2)
            o1 = out[:, 0:1]
            o2 = out[:, 1:2]
            oc = (o1 + o2) * 0.5                 # xx -> cxw (center)
            ow = o2 - o1                         # width
            xs_c = jnp.clip((oc * 2.0 - 1.0) * SCALE, -SCALE, SCALE)   # x_start
            xs_w = jnp.clip((ow * 2.0 - 1.0) * SCALE, -SCALE, SCALE)
            if st["last"]:
                t_c, t_w = xs_c, xs_w
            else:
                pn_c = (st["sr"] * t_c - xs_c) * st["inv_srm1"]        # pred noise
                pn_w = (st["sr"] * t_w - xs_w) * st["inv_srm1"]
                nz = noise_ref[si]                                     # (R, 2)
                t_c = xs_c * st["sqrt_an"] + st["c"] * pn_c + st["sigma"] * nz[:, 0:1]
                t_w = xs_w * st["sqrt_an"] + st["c"] * pn_w + st["sigma"] * nz[:, 1:2]
        # output = span_xx_to_cxw(last decoder output)
        o_ref[...] = jnp.concatenate([oc, ow], axis=1)
    return kernel


def ddim_sample_pallas(pooled_rep, targets0, noise, params):
    R = pooled_rep.shape[0]
    kernel = build_ddim_kernel(_SCHED)
    return pl.pallas_call(
        kernel,
        out_shape=jax.ShapeDtypeStruct((R, 2), jnp.float32),
    )(pooled_rep, targets0, noise,
      params["dec_span_w"], params["dec_span_b"], params["dec_t_w"],
      params["mlp_w1"], params["mlp_b1"],
      params["mlp_w2"], params["mlp_b2"],
      params["mlp_w3"], params["mlp_b3"])


# ----------------------------------------------------------------------------
# parameter init (deterministic, synthetic), zero-padded from H=32 to H_PAD=128
# ----------------------------------------------------------------------------
def _pad_to(a, shape):
    return jnp.pad(a, [(0, s - d) for d, s in zip(a.shape, shape)])


def init_params(key, hidden=HIDDEN, hp=H_PAD):
    ks = jax.random.split(key, 8)

    def lin(k, din, dout):
        kw, kb = jax.random.split(k)
        w = jax.random.normal(kw, (din, dout), jnp.float32) * 0.02
        b = jax.random.normal(kb, (1, dout), jnp.float32) * 0.02
        return w, b

    p = {}
    p["vid_ln_g"] = jnp.ones((1, VID_DIM), jnp.float32)
    p["vid_ln_b"] = jnp.zeros((1, VID_DIM), jnp.float32)
    vw, vb = lin(ks[0], VID_DIM, hidden)
    p["vid_w"] = _pad_to(vw, (VID_DIM, hp)).astype(jnp.bfloat16)
    p["vid_b"] = _pad_to(vb, (1, hp))

    p["txt_ln_g"] = jnp.ones((1, TXT_DIM), jnp.float32)
    p["txt_ln_b"] = jnp.zeros((1, TXT_DIM), jnp.float32)
    tw, tb = lin(ks[1], TXT_DIM, hidden)
    p["txt_w"] = _pad_to(tw, (TXT_DIM, hp)).astype(jnp.bfloat16)
    p["txt_b"] = _pad_to(tb, (1, hp))

    ew, eb = lin(ks[2], hidden, hidden)
    p["enc_w"] = _pad_to(ew, (hp, hp))
    p["enc_b"] = _pad_to(eb, (1, hp))

    sw, sb = lin(ks[3], 2, hidden)
    p["dec_span_w"] = _pad_to(sw, (2, hp))
    p["dec_span_b"] = _pad_to(sb, (1, hp))
    p["dec_t_w"] = _pad_to(jax.random.normal(ks[4], (1, hidden), jnp.float32) * 0.02, (1, hp))

    w1, b1 = lin(ks[5], hidden, hidden)
    w2, b2 = lin(ks[6], hidden, hidden)
    w3, b3 = lin(ks[7], hidden, 2)
    p["mlp_w1"] = _pad_to(w1, (hp, hp)); p["mlp_b1"] = _pad_to(b1, (1, hp))
    p["mlp_w2"] = _pad_to(w2, (hp, hp)); p["mlp_b2"] = _pad_to(b2, (1, hp))
    p["mlp_w3"] = _pad_to(w3, (hp, 2)); p["mlp_b3"] = b3
    return p


# ----------------------------------------------------------------------------
# full forward
# ----------------------------------------------------------------------------
def diffusionvg_forward(params, src_txt, src_txt_mask, src_vid, src_vid_mask, rng):
    B, Lv, Dv = src_vid.shape
    _, Lt, Dt = src_txt.shape
    HP = H_PAD

    # positional embeddings (sinusoidal stand-ins), zero-padded to HP lanes
    pe_vid = _pad_to(sine_pos_embed(Lv, HIDDEN), (Lv, HP))
    pe_txt = _pad_to(sine_pos_embed(Lt, HIDDEN), (Lt, HP))
    pos_vid = pe_vid[None] * src_vid_mask[..., None]                 # (B, Lv, HP)
    pos_txt = jnp.broadcast_to(pe_txt[None], (B, Lt, HP))            # txt pos unmasked (as reference)

    # fused projection + encoder (Pallas, row-tiled, parallel)
    mem_vid = fused_proj_encoder(
        src_vid.reshape(B * Lv, Dv), pos_vid.reshape(B * Lv, HP),
        params["vid_ln_g"], params["vid_ln_b"], params["vid_w"], params["vid_b"],
        params["enc_w"], params["enc_b"]).reshape(B, Lv, HP)
    mem_txt = fused_proj_encoder(
        src_txt.reshape(B * Lt, Dt), pos_txt.reshape(B * Lt, HP),
        params["txt_ln_g"], params["txt_ln_b"], params["txt_w"], params["txt_b"],
        params["enc_w"], params["enc_b"]).reshape(B, Lt, HP)

    memory = jnp.concatenate([mem_vid, mem_txt], axis=1)             # (B, L, HP)
    pos = jnp.concatenate([pos_vid, pos_txt], axis=1)                # (B, L, HP)
    mask = jnp.concatenate([src_vid_mask, src_txt_mask], axis=1).astype(jnp.float32)  # (B, L)

    # loop-invariant masked mean-pool of (memory + pos): computed ONCE, outside the DDIM loop
    m3 = mask[:, :, None]
    pooled = jnp.sum((memory + pos) * m3, axis=1) / (jnp.sum(m3, axis=1) + 1e-6)      # (B, HP)
    pooled_rep = jnp.repeat(pooled, NQ, axis=0)                                       # (B*NQ, HP)

    # pre-sample all randomness for the DDIM loop
    rng, k1, k2 = jax.random.split(rng, 3)
    targets = jax.random.normal(k1, (B, NQ, 2), jnp.float32)
    targets = (jnp.clip(targets, -1.0, 1.0) + 1.0) / 2.0
    targets = span_cxw_to_xx(targets).reshape(B * NQ, 2)
    noise = jax.random.normal(k2, (SAMPLING_T, B * NQ, 2), jnp.float32)

    pred = ddim_sample_pallas(pooled_rep, targets, noise, params)    # (B*NQ, 2)
    return {"pred_spans": pred.reshape(B, NQ, 2)}


# ----------------------------------------------------------------------------
if __name__ == "__main__":
    key = jax.random.PRNGKey(0)
    kp, kt, kv, ks = jax.random.split(key, 4)

    B, Lv, Lt = 2, 16, 8
    params = init_params(kp)

    src_txt = jax.random.normal(kt, (B, Lt, TXT_DIM), jnp.float32)
    src_vid = jax.random.normal(kv, (B, Lv, VID_DIM), jnp.float32)
    src_txt_mask = jnp.ones((B, Lt), jnp.float32)
    src_vid_mask = jnp.ones((B, Lv), jnp.float32).at[1, 12:].set(0.0)

    out = jax.jit(diffusionvg_forward)(params, src_txt, src_txt_mask,
                                       src_vid, src_vid_mask, ks)
    jax.block_until_ready(out)

    assert out["pred_spans"].shape == (B, NQ, 2)
    assert bool(jnp.all(jnp.isfinite(out["pred_spans"])))
    print("KERNEL_OK")
</pallas_src>

<mosaic_0001>
module attributes {stable_mosaic.version = 11 : i64} {
  func.func @fused_proj_enc_kernel(%arg0: i32, %arg1: memref<16x768xf32, #tpu.memory_space<vmem>>, %arg2: memref<16x128xf32, #tpu.memory_space<vmem>>, %arg3: memref<1x768xf32, #tpu.memory_space<vmem>>, %arg4: memref<1x768xf32, #tpu.memory_space<vmem>>, %arg5: memref<768x128xbf16, #tpu.memory_space<vmem>>, %arg6: memref<1x128xf32, #tpu.memory_space<vmem>>, %arg7: memref<128x128xf32, #tpu.memory_space<vmem>>, %arg8: memref<1x128xf32, #tpu.memory_space<vmem>>, %arg9: memref<16x128xf32, #tpu.memory_space<vmem>>) attributes {dimension_semantics = [#tpu.dimension_semantics<parallel>], iteration_bounds = array<i64: 1>, scalar_prefetch = 0 : i64, scratch_operands = 0 : i64, tpu.core_type = #tpu.core_type<tc>, window_params = [{transform_indices = @transform_0, window_bounds = array<i64: 16, 768>}, {transform_indices = @transform_1, window_bounds = array<i64: 16, 128>}, {pipeline_mode = #tpu.pipeline_mode<synchronous>, transform_indices = @transform_2, window_bounds = array<i64: 1, 768>}, {pipeline_mode = #tpu.pipeline_mode<synchronous>, transform_indices = @transform_3, window_bounds = array<i64: 1, 768>}, {pipeline_mode = #tpu.pipeline_mode<synchronous>, transform_indices = @transform_4, window_bounds = array<i64: 768, 128>}, {pipeline_mode = #tpu.pipeline_mode<synchronous>, transform_indices = @transform_5, window_bounds = array<i64: 1, 128>}, {pipeline_mode = #tpu.pipeline_mode<synchronous>, transform_indices = @transform_6, window_bounds = array<i64: 128, 128>}, {pipeline_mode = #tpu.pipeline_mode<synchronous>, transform_indices = @transform_7, window_bounds = array<i64: 1, 128>}, {transform_indices = @transform_8, window_bounds = array<i64: 16, 128>}]} {
    %c0 = arith.constant 0 : index
    %c0_0 = arith.constant 0 : index
    %0 = vector.load %arg1[%c0, %c0_0] : memref<16x768xf32, #tpu.memory_space<vmem>>, vector<16x768xf32>
    %cst = arith.constant dense<0.000000e+00> : vector<16xf32>
    %1 = vector.multi_reduction <add>, %0, %cst [1] : vector<16x768xf32> to vector<16xf32>
    %2 = vector.shape_cast %1 : vector<16xf32> to vector<16x1xf32>
    %cst_1 = arith.constant 7.680000e+02 : f32
    %3 = vector.broadcast %cst_1 : f32 to vector<16x1xf32>
    %4 = arith.divf %2, %3 : vector<16x1xf32>
    %5 = vector.broadcast %4 : vector<16x1xf32> to vector<16x768xf32>
    %6 = arith.subf %0, %5 : vector<16x768xf32>
    %7 = arith.mulf %6, %6 : vector<16x768xf32>
    %cst_2 = arith.constant dense<0.000000e+00> : vector<16xf32>
    %8 = vector.multi_reduction <add>, %7, %cst_2 [1] : vector<16x768xf32> to vector<16xf32>
    %9 = vector.shape_cast %8 : vector<16xf32> to vector<16x1xf32>
    %cst_3 = arith.constant 7.680000e+02 : f32
    %10 = vector.broadcast %cst_3 : f32 to vector<16x1xf32>
    %11 = arith.divf %9, %10 : vector<16x1xf32>
    %12 = vector.broadcast %4 : vector<16x1xf32> to vector<16x768xf32>
    %13 = arith.subf %0, %12 : vector<16x768xf32>
    %cst_4 = arith.constant 9.99999974E-6 : f32
    %14 = vector.broadcast %cst_4 : f32 to vector<16x1xf32>
    %15 = arith.addf %11, %14 : vector<16x1xf32>
    %16 = math.rsqrt %15 : vector<16x1xf32>
    %17 = vector.broadcast %16 : vector<16x1xf32> to vector<16x768xf32>
    %18 = arith.mulf %13, %17 : vector<16x768xf32>
    %c0_5 = arith.constant 0 : index
    %c0_6 = arith.constant 0 : index
    %19 = vector.load %arg3[%c0_5, %c0_6] : memref<1x768xf32, #tpu.memory_space<vmem>>, vector<1x768xf32>
    %20 = vector.broadcast %19 : vector<1x768xf32> to vector<16x768xf32>
    %21 = arith.mulf %18, %20 : vector<16x768xf32>
    %c0_7 = arith.constant 0 : index
    %c0_8 = arith.constant 0 : index
    %22 = vector.load %arg4[%c0_7, %c0_8] : memref<1x768xf32, #tpu.memory_space<vmem>>, vector<1x768xf32>
    %23 = vector.broadcast %22 : vector<1x768xf32> to vector<16x768xf32>
    %24 = arith.addf %21, %23 : vector<16x768xf32>
    %25 = arith.truncf %24 : vector<16x768xf32> to vector<16x768xbf16>
    %c0_9 = arith.constant 0 : index
    %c0_10 = arith.constant 0 : index
    %26 = vector.load %arg5[%c0_9, %c0_10] : memref<768x128xbf16, #tpu.memory_space<vmem>>, vector<768x128xbf16>
    %cst_11 = arith.constant dense<0.000000e+00> : vector<16x128xf32>
    %27 = tpu.matmul %25, %26, %cst_11 {dimension_numbers = #tpu.dot_dimension_numbers<[1], [0], [0], [1], [0, 0, 1, 1], [], []>} : vector<16x768xbf16>, vector<768x128xbf16>, vector<16x128xf32> -> vector<16x128xf32>
    %c0_12 = arith.constant 0 : index
    %c0_13 = arith.constant 0 : index
    %28 = vector.load %arg6[%c0_12, %c0_13] : memref<1x128xf32, #tpu.memory_space<vmem>>, vector<1x128xf32>
    %29 = vector.broadcast %28 : vector<1x128xf32> to vector<16x128xf32>
    %30 = arith.addf %27, %29 : vector<16x128xf32>
    %cst_14 = arith.constant 0.000000e+00 : f32
    %31 = vector.broadcast %cst_14 : f32 to vector<16x128xf32>
    %32 = arith.maximumf %30, %31 : vector<16x128xf32>
    %c0_15 = arith.constant 0 : index
    %c0_16 = arith.constant 0 : index
    %33 = vector.load %arg2[%c0_15, %c0_16] : memref<16x128xf32, #tpu.memory_space<vmem>>, vector<16x128xf32>
    %34 = arith.addf %32, %33 : vector<16x128xf32>
    %c0_17 = arith.constant 0 : index
    %c0_18 = arith.constant 0 : index
    %35 = vector.load %arg7[%c0_17, %c0_18] : memref<128x128xf32, #tpu.memory_space<vmem>>, vector<128x128xf32>
    %cst_19 = arith.constant dense<0.000000e+00> : vector<16x128xf32>
    %36 = tpu.matmul %34, %35, %cst_19 {dimension_numbers = #tpu.dot_dimension_numbers<[1], [0], [0], [1], [0, 0, 1, 1], [], []>} : vector<16x128xf32>, vector<128x128xf32>, vector<16x128xf32> -> vector<16x128xf32>
    %c0_20 = arith.constant 0 : index
    %c0_21 = arith.constant 0 : index
    %37 = vector.load %arg8[%c0_20, %c0_21] : memref<1x128xf32, #tpu.memory_space<vmem>>, vector<1x128xf32>
    %38 = vector.broadcast %37 : vector<1x128xf32> to vector<16x128xf32>
    %39 = arith.addf %36, %38 : vector<16x128xf32>
    %cst_22 = arith.constant 0.000000e+00 : f32
    %40 = vector.broadcast %cst_22 : f32 to vector<16x128xf32>
    %41 = arith.maximumf %39, %40 : vector<16x128xf32>
    %c0_23 = arith.constant 0 : index
    %c0_24 = arith.constant 0 : index
    %42 = vector.load %arg9[%c0_23, %c0_24] : memref<16x128xf32, #tpu.memory_space<vmem>>, vector<16x128xf32>
    tpu.vector_store %arg9[%c0_23, %c0_24], %41 {strides = array<i32>} : memref<16x128xf32, #tpu.memory_space<vmem>>, vector<16x128xf32>,
    return
  }
  func.func @transform_0(%arg0: i32) -> (i32, i32) {
    %c0_i32 = arith.constant 0 : i32
    %c0_i32_0 = arith.constant 0 : i32
    return %arg0, %c0_i32 : i32, i32
  }
  func.func @transform_1(%arg0: i32) -> (i32, i32) {
    %c0_i32 = arith.constant 0 : i32
    %c0_i32_0 = arith.constant 0 : i32
    return %arg0, %c0_i32 : i32, i32
  }
  func.func @transform_2(%arg0: i32) -> (i32, i32) {
    %c0_i32 = arith.constant 0 : i32
    %c0_i32_0 = arith.constant 0 : i32
    %c0_i32_1 = arith.constant 0 : i32
    return %c0_i32, %c0_i32_0 : i32, i32
  }
  func.func @transform_3(%arg0: i32) -> (i32, i32) {
    %c0_i32 = arith.constant 0 : i32
    %c0_i32_0 = arith.constant 0 : i32
    %c0_i32_1 = arith.constant 0 : i32
    return %c0_i32, %c0_i32_0 : i32, i32
  }
  func.func @transform_4(%arg0: i32) -> (i32, i32) {
    %c0_i32 = arith.constant 0 : i32
    %c0_i32_0 = arith.constant 0 : i32
    %c0_i32_1 = arith.constant 0 : i32
    return %c0_i32, %c0_i32_0 : i32, i32
  }
  func.func @transform_5(%arg0: i32) -> (i32, i32) {
    %c0_i32 = arith.constant 0 : i32
    %c0_i32_0 = arith.constant 0 : i32
    %c0_i32_1 = arith.constant 0 : i32
    return %c0_i32, %c0_i32_0 : i32, i32
  }
  func.func @transform_6(%arg0: i32) -> (i32, i32) {
    %c0_i32 = arith.constant 0 : i32
    %c0_i32_0 = arith.constant 0 : i32
    %c0_i32_1 = arith.constant 0 : i32
    return %c0_i32, %c0_i32_0 : i32, i32
  }
  func.func @transform_7(%arg0: i32) -> (i32, i32) {
    %c0_i32 = arith.constant 0 : i32
    %c0_i32_0 = arith.constant 0 : i32
    %c0_i32_1 = arith.constant 0 : i32
    return %c0_i32, %c0_i32_0 : i32, i32
  }
  func.func @transform_8(%arg0: i32) -> (i32, i32) {
    %c0_i32 = arith.constant 0 : i32
    %c0_i32_0 = arith.constant 0 : i32
    return %arg0, %c0_i32 : i32, i32
  }
}

module attributes {stable_mosaic.version = 11 : i64} {
  func.func @fused_proj_enc_kernel(%arg0: i32, %arg1: memref<32x1024xf32, #tpu.memory_space<vmem>>, %arg2: memref<32x128xf32, #tpu.memory_space<vmem>>, %arg3: memref<1x1024xf32, #tpu.memory_space<vmem>>, %arg4: memref<1x1024xf32, #tpu.memory_space<vmem>>, %arg5: memref<1024x128xbf16, #tpu.memory_space<vmem>>, %arg6: memref<1x128xf32, #tpu.memory_space<vmem>>, %arg7: memref<128x128xf32, #tpu.memory_space<vmem>>, %arg8: memref<1x128xf32, #tpu.memory_space<vmem>>, %arg9: memref<32x128xf32, #tpu.memory_space<vmem>>) attributes {dimension_semantics = [#tpu.dimension_semantics<parallel>], iteration_bounds = array<i64: 1>, scalar_prefetch = 0 : i64, scratch_operands = 0 : i64, tpu.core_type = #tpu.core_type<tc>, window_params = [{transform_indices = @transform_0, window_bounds = array<i64: 32, 1024>}, {transform_indices = @transform_1, window_bounds = array<i64: 32, 128>}, {pipeline_mode = #tpu.pipeline_mode<synchronous>, transform_indices = @transform_2, window_bounds = array<i64: 1, 1024>}, {pipeline_mode = #tpu.pipeline_mode<synchronous>, transform_indices = @transform_3, window_bounds = array<i64: 1, 1024>}, {pipeline_mode = #tpu.pipeline_mode<synchronous>, transform_indices = @transform_4, window_bounds = array<i64: 1024, 128>}, {pipeline_mode = #tpu.pipeline_mode<synchronous>, transform_indices = @transform_5, window_bounds = array<i64: 1, 128>}, {pipeline_mode = #tpu.pipeline_mode<synchronous>, transform_indices = @transform_6, window_bounds = array<i64: 128, 128>}, {pipeline_mode = #tpu.pipeline_mode<synchronous>, transform_indices = @transform_7, window_bounds = array<i64: 1, 128>}, {transform_indices = @transform_8, window_bounds = array<i64: 32, 128>}]} {
    %c0 = arith.constant 0 : index
    %c0_0 = arith.constant 0 : index
    %0 = vector.load %arg1[%c0, %c0_0] : memref<32x1024xf32, #tpu.memory_space<vmem>>, vector<32x1024xf32>
    %cst = arith.constant dense<0.000000e+00> : vector<32xf32>
    %1 = vector.multi_reduction <add>, %0, %cst [1] : vector<32x1024xf32> to vector<32xf32>
    %2 = vector.shape_cast %1 : vector<32xf32> to vector<32x1xf32>
    %cst_1 = arith.constant 1.024000e+03 : f32
    %3 = vector.broadcast %cst_1 : f32 to vector<32x1xf32>
    %4 = arith.divf %2, %3 : vector<32x1xf32>
    %5 = vector.broadcast %4 : vector<32x1xf32> to vector<32x1024xf32>
    %6 = arith.subf %0, %5 : vector<32x1024xf32>
    %7 = arith.mulf %6, %6 : vector<32x1024xf32>
    %cst_2 = arith.constant dense<0.000000e+00> : vector<32xf32>
    %8 = vector.multi_reduction <add>, %7, %cst_2 [1] : vector<32x1024xf32> to vector<32xf32>
    %9 = vector.shape_cast %8 : vector<32xf32> to vector<32x1xf32>
    %cst_3 = arith.constant 1.024000e+03 : f32
    %10 = vector.broadcast %cst_3 : f32 to vector<32x1xf32>
    %11 = arith.divf %9, %10 : vector<32x1xf32>
    %12 = vector.broadcast %4 : vector<32x1xf32> to vector<32x1024xf32>
    %13 = arith.subf %0, %12 : vector<32x1024xf32>
    %cst_4 = arith.constant 9.99999974E-6 : f32
    %14 = vector.broadcast %cst_4 : f32 to vector<32x1xf32>
    %15 = arith.addf %11, %14 : vector<32x1xf32>
    %16 = math.rsqrt %15 : vector<32x1xf32>
    %17 = vector.broadcast %16 : vector<32x1xf32> to vector<32x1024xf32>
    %18 = arith.mulf %13, %17 : vector<32x1024xf32>
    %c0_5 = arith.constant 0 : index
    %c0_6 = arith.constant 0 : index
    %19 = vector.load %arg3[%c0_5, %c0_6] : memref<1x1024xf32, #tpu.memory_space<vmem>>, vector<1x1024xf32>
    %20 = vector.broadcast %19 : vector<1x1024xf32> to vector<32x1024xf32>
    %21 = arith.mulf %18, %20 : vector<32x1024xf32>
    %c0_7 = arith.constant 0 : index
    %c0_8 = arith.constant 0 : index
    %22 = vector.load %arg4[%c0_7, %c0_8] : memref<1x1024xf32, #tpu.memory_space<vmem>>, vector<1x1024xf32>
    %23 = vector.broadcast %22 : vector<1x1024xf32> to vector<32x1024xf32>
    %24 = arith.addf %21, %23 : vector<32x1024xf32>
    %25 = arith.truncf %24 : vector<32x1024xf32> to vector<32x1024xbf16>
    %c0_9 = arith.constant 0 : index
    %c0_10 = arith.constant 0 : index
    %26 = vector.load %arg5[%c0_9, %c0_10] : memref<1024x128xbf16, #tpu.memory_space<vmem>>, vector<1024x128xbf16>
    %cst_11 = arith.constant dense<0.000000e+00> : vector<32x128xf32>
    %27 = tpu.matmul %25, %26, %cst_11 {dimension_numbers = #tpu.dot_dimension_numbers<[1], [0], [0], [1], [0, 0, 1, 1], [], []>} : vector<32x1024xbf16>, vector<1024x128xbf16>, vector<32x128xf32> -> vector<32x128xf32>
    %c0_12 = arith.constant 0 : index
    %c0_13 = arith.constant 0 : index
    %28 = vector.load %arg6[%c0_12, %c0_13] : memref<1x128xf32, #tpu.memory_space<vmem>>, vector<1x128xf32>
    %29 = vector.broadcast %28 : vector<1x128xf32> to vector<32x128xf32>
    %30 = arith.addf %27, %29 : vector<32x128xf32>
    %cst_14 = arith.constant 0.000000e+00 : f32
    %31 = vector.broadcast %cst_14 : f32 to vector<32x128xf32>
    %32 = arith.maximumf %30, %31 : vector<32x128xf32>
    %c0_15 = arith.constant 0 : index
    %c0_16 = arith.constant 0 : index
    %33 = vector.load %arg2[%c0_15, %c0_16] : memref<32x128xf32, #tpu.memory_space<vmem>>, vector<32x128xf32>
    %34 = arith.addf %32, %33 : vector<32x128xf32>
    %c0_17 = arith.constant 0 : index
    %c0_18 = arith.constant 0 : index
    %35 = vector.load %arg7[%c0_17, %c0_18] : memref<128x128xf32, #tpu.memory_space<vmem>>, vector<128x128xf32>
    %cst_19 = arith.constant dense<0.000000e+00> : vector<32x128xf32>
    %36 = tpu.matmul %34, %35, %cst_19 {dimension_numbers = #tpu.dot_dimension_numbers<[1], [0], [0], [1], [0, 0, 1, 1], [], []>} : vector<32x128xf32>, vector<128x128xf32>, vector<32x128xf32> -> vector<32x128xf32>
    %c0_20 = arith.constant 0 : index
    %c0_21 = arith.constant 0 : index
    %37 = vector.load %arg8[%c0_20, %c0_21] : memref<1x128xf32, #tpu.memory_space<vmem>>, vector<1x128xf32>
    %38 = vector.broadcast %37 : vector<1x128xf32> to vector<32x128xf32>
    %39 = arith.addf %36, %38 : vector<32x128xf32>
    %cst_22 = arith.constant 0.000000e+00 : f32
    %40 = vector.broadcast %cst_22 : f32 to vector<32x128xf32>
    %41 = arith.maximumf %39, %40 : vector<32x128xf32>
    %c0_23 = arith.constant 0 : index
    %c0_24 = arith.constant 0 : index
    %42 = vector.load %arg9[%c0_23, %c0_24] : memref<32x128xf32, #tpu.memory_space<vmem>>, vector<32x128xf32>
    tpu.vector_store %arg9[%c0_23, %c0_24], %41 {strides = array<i32>} : memref<32x128xf32, #tpu.memory_space<vmem>>, vector<32x128xf32>,
    return
  }
  func.func @transform_0(%arg0: i32) -> (i32, i32) {
    %c0_i32 = arith.constant 0 : i32
    %c0_i32_0 = arith.constant 0 : i32
    return %arg0, %c0_i32 : i32, i32
  }
  func.func @transform_1(%arg0: i32) -> (i32, i32) {
    %c0_i32 = arith.constant 0 : i32
    %c0_i32_0 = arith.constant 0 : i32
    return %arg0, %c0_i32 : i32, i32
  }
  func.func @transform_2(%arg0: i32) -> (i32, i32) {
    %c0_i32 = arith.constant 0 : i32
    %c0_i32_0 = arith.constant 0 : i32
    %c0_i32_1 = arith.constant 0 : i32
    return %c0_i32, %c0_i32_0 : i32, i32
  }
  func.func @transform_3(%arg0: i32) -> (i32, i32) {
    %c0_i32 = arith.constant 0 : i32
    %c0_i32_0 = arith.constant 0 : i32
    %c0_i32_1 = arith.constant 0 : i32
    return %c0_i32, %c0_i32_0 : i32, i32
  }
  func.func @transform_4(%arg0: i32) -> (i32, i32) {
    %c0_i32 = arith.constant 0 : i32
    %c0_i32_0 = arith.constant 0 : i32
    %c0_i32_1 = arith.constant 0 : i32
    return %c0_i32, %c0_i32_0 : i32, i32
  }
  func.func @transform_5(%arg0: i32) -> (i32, i32) {
    %c0_i32 = arith.constant 0 : i32
    %c0_i32_0 = arith.constant 0 : i32
    %c0_i32_1 = arith.constant 0 : i32
    return %c0_i32, %c0_i32_0 : i32, i32
  }
  func.func @transform_6(%arg0: i32) -> (i32, i32) {
    %c0_i32 = arith.constant 0 : i32
    %c0_i32_0 = arith.constant 0 : i32
    %c0_i32_1 = arith.constant 0 : i32
    return %c0_i32, %c0_i32_0 : i32, i32
  }
  func.func @transform_7(%arg0: i32) -> (i32, i32) {
    %c0_i32 = arith.constant 0 : i32
    %c0_i32_0 = arith.constant 0 : i32
    %c0_i32_1 = arith.constant 0 : i32
    return %c0_i32, %c0_i32_0 : i32, i32
  }
  func.func @transform_8(%arg0: i32) -> (i32, i32) {
    %c0_i32 = arith.constant 0 : i32
    %c0_i32_0 = arith.constant 0 : i32
    return %arg0, %c0_i32 : i32, i32
  }
}

module attributes {stable_mosaic.version = 11 : i64} {
  func.func @kernel(%arg0: memref<10x128xf32, #tpu.memory_space<vmem>>, %arg1: memref<10x2xf32, #tpu.memory_space<vmem>>, %arg2: memref<5x10x2xf32, #tpu.memory_space<vmem>>, %arg3: memref<2x128xf32, #tpu.memory_space<vmem>>, %arg4: memref<1x128xf32, #tpu.memory_space<vmem>>, %arg5: memref<1x128xf32, #tpu.memory_space<vmem>>, %arg6: memref<128x128xf32, #tpu.memory_space<vmem>>, %arg7: memref<1x128xf32, #tpu.memory_space<vmem>>, %arg8: memref<128x128xf32, #tpu.memory_space<vmem>>, %arg9: memref<1x128xf32, #tpu.memory_space<vmem>>, %arg10: memref<128x2xf32, #tpu.memory_space<vmem>>, %arg11: memref<1x2xf32, #tpu.memory_space<vmem>>, %arg12: memref<10x2xf32, #tpu.memory_space<vmem>>) attributes {dimension_semantics = [], scalar_prefetch = 0 : i64, scratch_operands = 0 : i64, tpu.core_type = #tpu.core_type<tc>} {
    %c0 = arith.constant 0 : index
    %c0_0 = arith.constant 0 : index
    %0 = vector.load %arg0[%c0, %c0_0] : memref<10x128xf32, #tpu.memory_space<vmem>>, vector<10x128xf32>
    %c0_1 = arith.constant 0 : index
    %c0_2 = arith.constant 0 : index
    %1 = vector.load %arg1[%c0_1, %c0_2] : memref<10x2xf32, #tpu.memory_space<vmem>>, vector<10x1xf32>
    %c0_3 = arith.constant 0 : index
    %c1 = arith.constant 1 : index
    %2 = vector.load %arg1[%c0_3, %c1] : memref<10x2xf32, #tpu.memory_space<vmem>>, vector<10x1xf32>
    %cst = arith.constant -2.000000e+00 : f32
    %cst_4 = arith.constant 2.000000e+00 : f32
    %3 = vector.broadcast %cst : f32 to vector<10x1xf32>
    %4 = arith.maximumf %3, %1 : vector<10x1xf32>
    %5 = vector.broadcast %cst_4 : f32 to vector<10x1xf32>
    %6 = arith.minimumf %5, %4 : vector<10x1xf32>
    %cst_5 = arith.constant 2.000000e+00 : f32
    %7 = vector.broadcast %cst_5 : f32 to vector<10x1xf32>
    %8 = arith.divf %6, %7 : vector<10x1xf32>
    %cst_6 = arith.constant 1.000000e+00 : f32
    %9 = vector.broadcast %cst_6 : f32 to vector<10x1xf32>
    %10 = arith.addf %8, %9 : vector<10x1xf32>
    %cst_7 = arith.constant 5.000000e-01 : f32
    %11 = vector.broadcast %cst_7 : f32 to vector<10x1xf32>
    %12 = arith.mulf %10, %11 : vector<10x1xf32>
    %cst_8 = arith.constant -2.000000e+00 : f32
    %cst_9 = arith.constant 2.000000e+00 : f32
    %13 = vector.broadcast %cst_8 : f32 to vector<10x1xf32>
    %14 = arith.maximumf %13, %2 : vector<10x1xf32>
    %15 = vector.broadcast %cst_9 : f32 to vector<10x1xf32>
    %16 = arith.minimumf %15, %14 : vector<10x1xf32>
    %cst_10 = arith.constant 2.000000e+00 : f32
    %17 = vector.broadcast %cst_10 : f32 to vector<10x1xf32>
    %18 = arith.divf %16, %17 : vector<10x1xf32>
    %cst_11 = arith.constant 1.000000e+00 : f32
    %19 = vector.broadcast %cst_11 : f32 to vector<10x1xf32>
    %20 = arith.addf %18, %19 : vector<10x1xf32>
    %cst_12 = arith.constant 5.000000e-01 : f32
    %21 = vector.broadcast %cst_12 : f32 to vector<10x1xf32>
    %22 = arith.mulf %20, %21 : vector<10x1xf32>
    %cst_13 = arith.constant 5.000000e-01 : f32
    %23 = vector.broadcast %cst_13 : f32 to vector<10x1xf32>
    %24 = arith.mulf %23, %22 : vector<10x1xf32>
    %25 = arith.subf %12, %24 : vector<10x1xf32>
    %cst_14 = arith.constant 5.000000e-01 : f32
    %26 = vector.broadcast %cst_14 : f32 to vector<10x1xf32>
    %27 = arith.mulf %26, %22 : vector<10x1xf32>
    %28 = arith.addf %12, %27 : vector<10x1xf32>
    %c0_15 = arith.constant 0 : index
    %c0_16 = arith.constant 0 : index
    %29 = vector.load %arg3[%c0_15, %c0_16] : memref<2x128xf32, #tpu.memory_space<vmem>>, vector<1x128xf32>
    %30 = vector.broadcast %25 : vector<10x1xf32> to vector<10x128xf32>
    %31 = vector.broadcast %29 : vector<1x128xf32> to vector<10x128xf32>
    %32 = arith.mulf %30, %31 : vector<10x128xf32>
    %c1_17 = arith.constant 1 : index
    %c0_18 = arith.constant 0 : index
    %33 = vector.load %arg3[%c1_17, %c0_18] : memref<2x128xf32, #tpu.memory_space<vmem>>, vector<1x128xf32>
    %34 = vector.broadcast %28 : vector<10x1xf32> to vector<10x128xf32>
    %35 = vector.broadcast %33 : vector<1x128xf32> to vector<10x128xf32>
    %36 = arith.mulf %34, %35 : vector<10x128xf32>
    %37 = arith.addf %32, %36 : vector<10x128xf32>
    %c0_19 = arith.constant 0 : index
    %c0_20 = arith.constant 0 : index
    %38 = vector.load %arg4[%c0_19, %c0_20] : memref<1x128xf32, #tpu.memory_space<vmem>>, vector<1x128xf32>
    %39 = vector.broadcast %38 : vector<1x128xf32> to vector<10x128xf32>
    %40 = arith.addf %37, %39 : vector<10x128xf32>
    %41 = arith.addf %40, %0 : vector<10x128xf32>
    %c0_21 = arith.constant 0 : index
    %c0_22 = arith.constant 0 : index
    %42 = vector.load %arg5[%c0_21, %c0_22] : memref<1x128xf32, #tpu.memory_space<vmem>>, vector<1x128xf32>
    %cst_23 = arith.constant 9.990000e-01 : f32
    %43 = vector.broadcast %cst_23 : f32 to vector<1x128xf32>
    %44 = arith.mulf %43, %42 : vector<1x128xf32>
    %45 = vector.broadcast %44 : vector<1x128xf32> to vector<10x128xf32>
    %46 = arith.addf %41, %45 : vector<10x128xf32>
    %c0_24 = arith.constant 0 : index
    %c0_25 = arith.constant 0 : index
    %47 = vector.load %arg6[%c0_24, %c0_25] : memref<128x128xf32, #tpu.memory_space<vmem>>, vector<128x128xf32>
    %cst_26 = arith.constant dense<0.000000e+00> : vector<10x128xf32>
    %48 = tpu.matmul %46, %47, %cst_26 {dimension_numbers = #tpu.dot_dimension_numbers<[1], [0], [0], [1], [0, 0, 1, 1], [], []>} : vector<10x128xf32>, vector<128x128xf32>, vector<10x128xf32> -> vector<10x128xf32>
    %c0_27 = arith.constant 0 : index
    %c0_28 = arith.constant 0 : index
    %49 = vector.load %arg7[%c0_27, %c0_28] : memref<1x128xf32, #tpu.memory_space<vmem>>, vector<1x128xf32>
    %50 = vector.broadcast %49 : vector<1x128xf32> to vector<10x128xf32>
    %51 = arith.addf %48, %50 : vector<10x128xf32>
    %cst_29 = arith.constant 0.000000e+00 : f32
    %52 = vector.broadcast %cst_29 : f32 to vector<10x128xf32>
    %53 = arith.maximumf %51, %52 : vector<10x128xf32>
    %c0_30 = arith.constant 0 : index
    %c0_31 = arith.constant 0 : index
    %54 = vector.load %arg8[%c0_30, %c0_31] : memref<128x128xf32, #tpu.memory_space<vmem>>, vector<128x128xf32>
    %cst_32 = arith.constant dense<0.000000e+00> : vector<10x128xf32>
    %55 = tpu.matmul %53, %54, %cst_32 {dimension_numbers = #tpu.dot_dimension_numbers<[1], [0], [0], [1], [0, 0, 1, 1], [], []>} : vector<10x128xf32>, vector<128x128xf32>, vector<10x128xf32> -> vector<10x128xf32>
    %c0_33 = arith.constant 0 : index
    %c0_34 = arith.constant 0 : index
    %56 = vector.load %arg9[%c0_33, %c0_34] : memref<1x128xf32, #tpu.memory_space<vmem>>, vector<1x128xf32>
    %57 = vector.broadcast %56 : vector<1x128xf32> to vector<10x128xf32>
    %58 = arith.addf %55, %57 : vector<10x128xf32>
    %cst_35 = arith.constant 0.000000e+00 : f32
    %59 = vector.broadcast %cst_35 : f32 to vector<10x128xf32>
    %60 = arith.maximumf %58, %59 : vector<10x128xf32>
    %c0_36 = arith.constant 0 : index
    %c0_37 = arith.constant 0 : index
    %61 = vector.load %arg10[%c0_36, %c0_37] : memref<128x2xf32, #tpu.memory_space<vmem>>, vector<128x2xf32>
    %cst_38 = arith.constant dense<0.000000e+00> : vector<10x2xf32>
    %62 = tpu.matmul %60, %61, %cst_38 {dimension_numbers = #tpu.dot_dimension_numbers<[1], [0], [0], [1], [0, 0, 1, 1], [], []>} : vector<10x128xf32>, vector<128x2xf32>, vector<10x2xf32> -> vector<10x2xf32>
    %c0_39 = arith.constant 0 : index
    %c0_40 = arith.constant 0 : index
    %63 = vector.load %arg11[%c0_39, %c0_40] : memref<1x2xf32, #tpu.memory_space<vmem>>, vector<1x2xf32>
    %64 = vector.broadcast %63 : vector<1x2xf32> to vector<10x2xf32>
    %65 = arith.addf %62, %64 : vector<10x2xf32>
    %66 = arith.negf %65 : vector<10x2xf32>
    %67 = math.exp %66 : vector<10x2xf32>
    %cst_41 = arith.constant 1.000000e+00 : f32
    %68 = vector.broadcast %cst_41 : f32 to vector<10x2xf32>
    %69 = arith.addf %68, %67 : vector<10x2xf32>
    %70 = arith.divf %68, %69 : vector<10x2xf32>
    %71 = vector.extract_strided_slice %70 {offsets = [0, 0], sizes = [10, 1], strides = [1, 1]} : vector<10x2xf32> to vector<10x1xf32>
    %72 = vector.extract_strided_slice %70 {offsets = [0, 1], sizes = [10, 1], strides = [1, 1]} : vector<10x2xf32> to vector<10x1xf32>
    %73 = arith.addf %71, %72 : vector<10x1xf32>
    %cst_42 = arith.constant 5.000000e-01 : f32
    %74 = vector.broadcast %cst_42 : f32 to vector<10x1xf32>
    %75 = arith.mulf %73, %74 : vector<10x1xf32>
    %76 = arith.subf %72, %71 : vector<10x1xf32>
    %cst_43 = arith.constant 2.000000e+00 : f32
    %77 = vector.broadcast %cst_43 : f32 to vector<10x1xf32>
    %78 = arith.mulf %75, %77 : vector<10x1xf32>
    %cst_44 = arith.constant 1.000000e+00 : f32
    %79 = vector.broadcast %cst_44 : f32 to vector<10x1xf32>
    %80 = arith.subf %78, %79 : vector<10x1xf32>
    %cst_45 = arith.constant 2.000000e+00 : f32
    %81 = vector.broadcast %cst_45 : f32 to vector<10x1xf32>
    %82 = arith.mulf %80, %81 : vector<10x1xf32>
    %cst_46 = arith.constant -2.000000e+00 : f32
    %cst_47 = arith.constant 2.000000e+00 : f32
    %83 = vector.broadcast %cst_46 : f32 to vector<10x1xf32>
    %84 = arith.maximumf %83, %82 : vector<10x1xf32>
    %85 = vector.broadcast %cst_47 : f32 to vector<10x1xf32>
    %86 = arith.minimumf %85, %84 : vector<10x1xf32>
    %cst_48 = arith.constant 2.000000e+00 : f32
    %87 = vector.broadcast %cst_48 : f32 to vector<10x1xf32>
    %88 = arith.mulf %76, %87 : vector<10x1xf32>
    %cst_49 = arith.constant 1.000000e+00 : f32
    %89 = vector.broadcast %cst_49 : f32 to vector<10x1xf32>
    %90 = arith.subf %88, %89 : vector<10x1xf32>
    %cst_50 = arith.constant 2.000000e+00 : f32
    %91 = vector.broadcast %cst_50 : f32 to vector<10x1xf32>
    %92 = arith.mulf %90, %91 : vector<10x1xf32>
    %cst_51 = arith.constant -2.000000e+00 : f32
    %cst_52 = arith.constant 2.000000e+00 : f32
    %93 = vector.broadcast %cst_51 : f32 to vector<10x1xf32>
    %94 = arith.maximumf %93, %92 : vector<10x1xf32>
    %95 = vector.broadcast %cst_52 : f32 to vector<10x1xf32>
    %96 = arith.minimumf %95, %94 : vector<10x1xf32>
    %cst_53 = arith.constant 20291.1699 : f32
    %97 = vector.broadcast %cst_53 : f32 to vector<10x1xf32>
    %98 = arith.mulf %97, %1 : vector<10x1xf32>
    %99 = arith.subf %98, %86 : vector<10x1xf32>
    %cst_54 = arith.constant 4.92825202E-5 : f32
    %100 = vector.broadcast %cst_54 : f32 to vector<10x1xf32>
    %101 = arith.mulf %99, %100 : vector<10x1xf32>
    %cst_55 = arith.constant 20291.1699 : f32
    %102 = vector.broadcast %cst_55 : f32 to vector<10x1xf32>
    %103 = arith.mulf %102, %2 : vector<10x1xf32>
    %104 = arith.subf %103, %96 : vector<10x1xf32>
    %cst_56 = arith.constant 4.92825202E-5 : f32
    %105 = vector.broadcast %cst_56 : f32 to vector<10x1xf32>
    %106 = arith.mulf %104, %105 : vector<10x1xf32>
    %c0_57 = arith.constant 0 : index
    %c0_58 = arith.constant 0 : index
    %c0_59 = arith.constant 0 : index
    %107 = vector.load %arg2[%c0_57, %c0_58, %c0_59] : memref<5x10x2xf32, #tpu.memory_space<vmem>>, vector<1x10x2xf32>
    %108 = vector.shape_cast %107 : vector<1x10x2xf32> to vector<10x2xf32>
    %cst_60 = arith.constant 0.30666858 : f32
    %109 = vector.broadcast %cst_60 : f32 to vector<10x1xf32>
    %110 = arith.mulf %86, %109 : vector<10x1xf32>
    %cst_61 = arith.constant 1.45589482E-4 : f32
    %111 = vector.broadcast %cst_61 : f32 to vector<10x1xf32>
    %112 = arith.mulf %111, %101 : vector<10x1xf32>
    %113 = arith.addf %110, %112 : vector<10x1xf32>
    %114 = vector.extract_strided_slice %108 {offsets = [0, 0], sizes = [10, 1], strides = [1, 1]} : vector<10x2xf32> to vector<10x1xf32>
    %cst_62 = arith.constant 0.95181638 : f32
    %115 = vector.broadcast %cst_62 : f32 to vector<10x1xf32>
    %116 = arith.mulf %115, %114 : vector<10x1xf32>
    %117 = arith.addf %113, %116 : vector<10x1xf32>
    %cst_63 = arith.constant 0.30666858 : f32
    %118 = vector.broadcast %cst_63 : f32 to vector<10x1xf32>
    %119 = arith.mulf %96, %118 : vector<10x1xf32>
    %cst_64 = arith.constant 1.45589482E-4 : f32
    %120 = vector.broadcast %cst_64 : f32 to vector<10x1xf32>
    %121 = arith.mulf %120, %106 : vector<10x1xf32>
    %122 = arith.addf %119, %121 : vector<10x1xf32>
    %123 = vector.extract_strided_slice %108 {offsets = [0, 1], sizes = [10, 1], strides = [1, 1]} : vector<10x2xf32> to vector<10x1xf32>
    %cst_65 = arith.constant 0.95181638 : f32
    %124 = vector.broadcast %cst_65 : f32 to vector<10x1xf32>
    %125 = arith.mulf %124, %123 : vector<10x1xf32>
    %126 = arith.addf %122, %125 : vector<10x1xf32>
    %cst_66 = arith.constant -2.000000e+00 : f32
    %cst_67 = arith.constant 2.000000e+00 : f32
    %127 = vector.broadcast %cst_66 : f32 to vector<10x1xf32>
    %128 = arith.maximumf %127, %117 : vector<10x1xf32>
    %129 = vector.broadcast %cst_67 : f32 to vector<10x1xf32>
    %130 = arith.minimumf %129, %128 : vector<10x1xf32>
    %cst_68 = arith.constant 2.000000e+00 : f32
    %131 = vector.broadcast %cst_68 : f32 to vector<10x1xf32>
    %132 = arith.divf %130, %131 : vector<10x1xf32>
    %cst_69 = arith.constant 1.000000e+00 : f32
    %133 = vector.broadcast %cst_69 : f32 to vector<10x1xf32>
    %134 = arith.addf %132, %133 : vector<10x1xf32>
    %cst_70 = arith.constant 5.000000e-01 : f32
    %135 = vector.broadcast %cst_70 : f32 to vector<10x1xf32>
    %136 = arith.mulf %134, %135 : vector<10x1xf32>
    %cst_71 = arith.constant -2.000000e+00 : f32
    %cst_72 = arith.constant 2.000000e+00 : f32
    %137 = vector.broadcast %cst_71 : f32 to vector<10x1xf32>
    %138 = arith.maximumf %137, %126 : vector<10x1xf32>
    %139 = vector.broadcast %cst_72 : f32 to vector<10x1xf32>
    %140 = arith.minimumf %139, %138 : vector<10x1xf32>
    %cst_73 = arith.constant 2.000000e+00 : f32
    %141 = vector.broadcast %cst_73 : f32 to vector<10x1xf32>
    %142 = arith.divf %140, %141 : vector<10x1xf32>
    %cst_74 = arith.constant 1.000000e+00 : f32
    %143 = vector.broadcast %cst_74 : f32 to vector<10x1xf32>
    %144 = arith.addf %142, %143 : vector<10x1xf32>
    %cst_75 = arith.constant 5.000000e-01 : f32
    %145 = vector.broadcast %cst_75 : f32 to vector<10x1xf32>
    %146 = arith.mulf %144, %145 : vector<10x1xf32>
    %cst_76 = arith.constant 5.000000e-01 : f32
    %147 = vector.broadcast %cst_76 : f32 to vector<10x1xf32>
    %148 = arith.mulf %147, %146 : vector<10x1xf32>
    %149 = arith.subf %136, %148 : vector<10x1xf32>
    %cst_77 = arith.constant 5.000000e-01 : f32
    %150 = vector.broadcast %cst_77 : f32 to vector<10x1xf32>
    %151 = arith.mulf %150, %146 : vector<10x1xf32>
    %152 = arith.addf %136, %151 : vector<10x1xf32>
    %c0_78 = arith.constant 0 : index
    %c0_79 = arith.constant 0 : index
    %153 = vector.load %arg3[%c0_78, %c0_79] : memref<2x128xf32, #tpu.memory_space<vmem>>, vector<1x128xf32>
    %154 = vector.broadcast %149 : vector<10x1xf32> to vector<10x128xf32>
    %155 = vector.broadcast %153 : vector<1x128xf32> to vector<10x128xf32>
    %156 = arith.mulf %154, %155 : vector<10x128xf32>
    %c1_80 = arith.constant 1 : index
    %c0_81 = arith.constant 0 : index
    %157 = vector.load %arg3[%c1_80, %c0_81] : memref<2x128xf32, #tpu.memory_space<vmem>>, vector<1x128xf32>
    %158 = vector.broadcast %152 : vector<10x1xf32> to vector<10x128xf32>
    %159 = vector.broadcast %157 : vector<1x128xf32> to vector<10x128xf32>
    %160 = arith.mulf %158, %159 : vector<10x128xf32>
    %161 = arith.addf %156, %160 : vector<10x128xf32>
    %c0_82 = arith.constant 0 : index
    %c0_83 = arith.constant 0 : index
    %162 = vector.load %arg4[%c0_82, %c0_83] : memref<1x128xf32, #tpu.memory_space<vmem>>, vector<1x128xf32>
    %163 = vector.broadcast %162 : vector<1x128xf32> to vector<10x128xf32>
    %164 = arith.addf %161, %163 : vector<10x128xf32>
    %165 = arith.addf %164, %0 : vector<10x128xf32>
    %c0_84 = arith.constant 0 : index
    %c0_85 = arith.constant 0 : index
    %166 = vector.load %arg5[%c0_84, %c0_85] : memref<1x128xf32, #tpu.memory_space<vmem>>, vector<1x128xf32>
    %cst_86 = arith.constant 7.990000e-01 : f32
    %167 = vector.broadcast %cst_86 : f32 to vector<1x128xf32>
    %168 = arith.mulf %167, %166 : vector<1x128xf32>
    %169 = vector.broadcast %168 : vector<1x128xf32> to vector<10x128xf32>
    %170 = arith.addf %165, %169 : vector<10x128xf32>
    %c0_87 = arith.constant 0 : index
    %c0_88 = arith.constant 0 : index
    %171 = vector.load %arg6[%c0_87, %c0_88] : memref<128x128xf32, #tpu.memory_space<vmem>>, vector<128x128xf32>
    %cst_89 = arith.constant dense<0.000000e+00> : vector<10x128xf32>
    %172 = tpu.matmul %170, %171, %cst_89 {dimension_numbers = #tpu.dot_dimension_numbers<[1], [0], [0], [1], [0, 0, 1, 1], [], []>} : vector<10x128xf32>, vector<128x128xf32>, vector<10x128xf32> -> vector<10x128xf32>
    %c0_90 = arith.constant 0 : index
    %c0_91 = arith.constant 0 : index
    %173 = vector.load %arg7[%c0_90, %c0_91] : memref<1x128xf32, #tpu.memory_space<vmem>>, vector<1x128xf32>
    %174 = vector.broadcast %173 : vector<1x128xf32> to vector<10x128xf32>
    %175 = arith.addf %172, %174 : vector<10x128xf32>
    %cst_92 = arith.constant 0.000000e+00 : f32
    %176 = vector.broadcast %cst_92 : f32 to vector<10x128xf32>
    %177 = arith.maximumf %175, %176 : vector<10x128xf32>
    %c0_93 = arith.constant 0 : index
    %c0_94 = arith.constant 0 : index
    %178 = vector.load %arg8[%c0_93, %c0_94] : memref<128x128xf32, #tpu.memory_space<vmem>>, vector<128x128xf32>
    %cst_95 = arith.constant dense<0.000000e+00> : vector<10x128xf32>
    %179 = tpu.matmul %177, %178, %cst_95 {dimension_numbers = #tpu.dot_dimension_numbers<[1], [0], [0], [1], [0, 0, 1, 1], [], []>} : vector<10x128xf32>, vector<128x128xf32>, vector<10x128xf32> -> vector<10x128xf32>
    %c0_96 = arith.constant 0 : index
    %c0_97 = arith.constant 0 : index
    %180 = vector.load %arg9[%c0_96, %c0_97] : memref<1x128xf32, #tpu.memory_space<vmem>>, vector<1x128xf32>
    %181 = vector.broadcast %180 : vector<1x128xf32> to vector<10x128xf32>
    %182 = arith.addf %179, %181 : vector<10x128xf32>
    %cst_98 = arith.constant 0.000000e+00 : f32
    %183 = vector.broadcast %cst_98 : f32 to vector<10x128xf32>
    %184 = arith.maximumf %182, %183 : vector<10x128xf32>
    %c0_99 = arith.constant 0 : index
    %c0_100 = arith.constant 0 : index
    %185 = vector.load %arg10[%c0_99, %c0_100] : memref<128x2xf32, #tpu.memory_space<vmem>>, vector<128x2xf32>
    %cst_101 = arith.constant dense<0.000000e+00> : vector<10x2xf32>
    %186 = tpu.matmul %184, %185, %cst_101 {dimension_numbers = #tpu.dot_dimension_numbers<[1], [0], [0], [1], [0, 0, 1, 1], [], []>} : vector<10x128xf32>, vector<128x2xf32>, vector<10x2xf32> -> vector<10x2xf32>
    %c0_102 = arith.constant 0 : index
    %c0_103 = arith.constant 0 : index
    %187 = vector.load %arg11[%c0_102, %c0_103] : memref<1x2xf32, #tpu.memory_space<vmem>>, vector<1x2xf32>
    %188 = vector.broadcast %187 : vector<1x2xf32> to vector<10x2xf32>
    %189 = arith.addf %186, %188 : vector<10x2xf32>
    %190 = arith.negf %189 : vector<10x2xf32>
    %191 = math.exp %190 : vector<10x2xf32>
    %cst_104 = arith.constant 1.000000e+00 : f32
    %192 = vector.broadcast %cst_104 : f32 to vector<10x2xf32>
    %193 = arith.addf %192, %191 : vector<10x2xf32>
    %194 = arith.divf %192, %193 : vector<10x2xf32>
    %195 = vector.extract_strided_slice %194 {offsets = [0, 0], sizes = [10, 1], strides = [1, 1]} : vector<10x2xf32> to vector<10x1xf32>
    %196 = vector.extract_strided_slice %194 {offsets = [0, 1], sizes = [10, 1], strides = [1, 1]} : vector<10x2xf32> to vector<10x1xf32>
    %197 = arith.addf %195, %196 : vector<10x1xf32>
    %cst_105 = arith.constant 5.000000e-01 : f32
    %198 = vector.broadcast %cst_105 : f32 to vector<10x1xf32>
    %199 = arith.mulf %197, %198 : vector<10x1xf32>
    %200 = arith.subf %196, %195 : vector<10x1xf32>
    %cst_106 = arith.constant 2.000000e+00 : f32
    %201 = vector.broadcast %cst_106 : f32 to vector<10x1xf32>
    %202 = arith.mulf %199, %201 : vector<10x1xf32>
    %cst_107 = arith.constant 1.000000e+00 : f32
    %203 = vector.broadcast %cst_107 : f32 to vector<10x1xf32>
    %204 = arith.subf %202, %203 : vector<10x1xf32>
    %cst_108 = arith.constant 2.000000e+00 : f32
    %205 = vector.broadcast %cst_108 : f32 to vector<10x1xf32>
    %206 = arith.mulf %204, %205 : vector<10x1xf32>
    %cst_109 = arith.constant -2.000000e+00 : f32
    %cst_110 = arith.constant 2.000000e+00 : f32
    %207 = vector.broadcast %cst_109 : f32 to vector<10x1xf32>
    %208 = arith.maximumf %207, %206 : vector<10x1xf32>
    %209 = vector.broadcast %cst_110 : f32 to vector<10x1xf32>
    %210 = arith.minimumf %209, %208 : vector<10x1xf32>
    %cst_111 = arith.constant 2.000000e+00 : f32
    %211 = vector.broadcast %cst_111 : f32 to vector<10x1xf32>
    %212 = arith.mulf %200, %211 : vector<10x1xf32>
    %cst_112 = arith.constant 1.000000e+00 : f32
    %213 = vector.broadcast %cst_112 : f32 to vector<10x1xf32>
    %214 = arith.subf %212, %213 : vector<10x1xf32>
    %cst_113 = arith.constant 2.000000e+00 : f32
    %215 = vector.broadcast %cst_113 : f32 to vector<10x1xf32>
    %216 = arith.mulf %214, %215 : vector<10x1xf32>
    %cst_114 = arith.constant -2.000000e+00 : f32
    %cst_115 = arith.constant 2.000000e+00 : f32
    %217 = vector.broadcast %cst_114 : f32 to vector<10x1xf32>
    %218 = arith.maximumf %217, %216 : vector<10x1xf32>
    %219 = vector.broadcast %cst_115 : f32 to vector<10x1xf32>
    %220 = arith.minimumf %219, %218 : vector<10x1xf32>
    %cst_116 = arith.constant 3.26084924 : f32
    %221 = vector.broadcast %cst_116 : f32 to vector<10x1xf32>
    %222 = arith.mulf %221, %117 : vector<10x1xf32>
    %223 = arith.subf %222, %210 : vector<10x1xf32>
    %cst_117 = arith.constant 3.221930e-01 : f32
    %224 = vector.broadcast %cst_117 : f32 to vector<10x1xf32>
    %225 = arith.mulf %223, %224 : vector<10x1xf32>
    %cst_118 = arith.constant 3.26084924 : f32
    %226 = vector.broadcast %cst_118 : f32 to vector<10x1xf32>
    %227 = arith.mulf %226, %126 : vector<10x1xf32>
    %228 = arith.subf %227, %220 : vector<10x1xf32>
    %cst_119 = arith.constant 3.221930e-01 : f32
    %229 = vector.broadcast %cst_119 : f32 to vector<10x1xf32>
    %230 = arith.mulf %228, %229 : vector<10x1xf32>
    %c1_120 = arith.constant 1 : index
    %c0_121 = arith.constant 0 : index
    %c0_122 = arith.constant 0 : index
    %231 = vector.load %arg2[%c1_120, %c0_121, %c0_122] : memref<5x10x2xf32, #tpu.memory_space<vmem>>, vector<1x10x2xf32>
    %232 = vector.shape_cast %231 : vector<1x10x2xf32> to vector<10x2xf32>
    %cst_123 = arith.constant 0.583789051 : f32
    %233 = vector.broadcast %cst_123 : f32 to vector<10x1xf32>
    %234 = arith.mulf %210, %233 : vector<10x1xf32>
    %cst_124 = arith.constant 0.363806963 : f32
    %235 = vector.broadcast %cst_124 : f32 to vector<10x1xf32>
    %236 = arith.mulf %235, %225 : vector<10x1xf32>
    %237 = arith.addf %234, %236 : vector<10x1xf32>
    %238 = vector.extract_strided_slice %232 {offsets = [0, 0], sizes = [10, 1], strides = [1, 1]} : vector<10x2xf32> to vector<10x1xf32>
    %cst_125 = arith.constant 0.725833892 : f32
    %239 = vector.broadcast %cst_125 : f32 to vector<10x1xf32>
    %240 = arith.mulf %239, %238 : vector<10x1xf32>
    %241 = arith.addf %237, %240 : vector<10x1xf32>
    %cst_126 = arith.constant 0.583789051 : f32
    %242 = vector.broadcast %cst_126 : f32 to vector<10x1xf32>
    %243 = arith.mulf %220, %242 : vector<10x1xf32>
    %cst_127 = arith.constant 0.363806963 : f32
    %244 = vector.broadcast %cst_127 : f32 to vector<10x1xf32>
    %245 = arith.mulf %244, %230 : vector<10x1xf32>
    %246 = arith.addf %243, %245 : vector<10x1xf32>
    %247 = vector.extract_strided_slice %232 {offsets = [0, 1], sizes = [10, 1], strides = [1, 1]} : vector<10x2xf32> to vector<10x1xf32>
    %cst_128 = arith.constant 0.725833892 : f32
    %248 = vector.broadcast %cst_128 : f32 to vector<10x1xf32>
    %249 = arith.mulf %248, %247 : vector<10x1xf32>
    %250 = arith.addf %246, %249 : vector<10x1xf32>
    %cst_129 = arith.constant -2.000000e+00 : f32
    %cst_130 = arith.constant 2.000000e+00 : f32
    %251 = vector.broadcast %cst_129 : f32 to vector<10x1xf32>
    %252 = arith.maximumf %251, %241 : vector<10x1xf32>
    %253 = vector.broadcast %cst_130 : f32 to vector<10x1xf32>
    %254 = arith.minimumf %253, %252 : vector<10x1xf32>
    %cst_131 = arith.constant 2.000000e+00 : f32
    %255 = vector.broadcast %cst_131 : f32 to vector<10x1xf32>
    %256 = arith.divf %254, %255 : vector<10x1xf32>
    %cst_132 = arith.constant 1.000000e+00 : f32
    %257 = vector.broadcast %cst_132 : f32 to vector<10x1xf32>
    %258 = arith.addf %256, %257 : vector<10x1xf32>
    %cst_133 = arith.constant 5.000000e-01 : f32
    %259 = vector.broadcast %cst_133 : f32 to vector<10x1xf32>
    %260 = arith.mulf %258, %259 : vector<10x1xf32>
    %cst_134 = arith.constant -2.000000e+00 : f32
    %cst_135 = arith.constant 2.000000e+00 : f32
    %261 = vector.broadcast %cst_134 : f32 to vector<10x1xf32>
    %262 = arith.maximumf %261, %250 : vector<10x1xf32>
    %263 = vector.broadcast %cst_135 : f32 to vector<10x1xf32>
    %264 = arith.minimumf %263, %262 : vector<10x1xf32>
    %cst_136 = arith.constant 2.000000e+00 : f32
    %265 = vector.broadcast %cst_136 : f32 to vector<10x1xf32>
    %266 = arith.divf %264, %265 : vector<10x1xf32>
    %cst_137 = arith.constant 1.000000e+00 : f32
    %267 = vector.broadcast %cst_137 : f32 to vector<10x1xf32>
    %268 = arith.addf %266, %267 : vector<10x1xf32>
    %cst_138 = arith.constant 5.000000e-01 : f32
    %269 = vector.broadcast %cst_138 : f32 to vector<10x1xf32>
    %270 = arith.mulf %268, %269 : vector<10x1xf32>
    %cst_139 = arith.constant 5.000000e-01 : f32
    %271 = vector.broadcast %cst_139 : f32 to vector<10x1xf32>
    %272 = arith.mulf %271, %270 : vector<10x1xf32>
    %273 = arith.subf %260, %272 : vector<10x1xf32>
    %cst_140 = arith.constant 5.000000e-01 : f32
    %274 = vector.broadcast %cst_140 : f32 to vector<10x1xf32>
    %275 = arith.mulf %274, %270 : vector<10x1xf32>
    %276 = arith.addf %260, %275 : vector<10x1xf32>
    %c0_141 = arith.constant 0 : index
    %c0_142 = arith.constant 0 : index
    %277 = vector.load %arg3[%c0_141, %c0_142] : memref<2x128xf32, #tpu.memory_space<vmem>>, vector<1x128xf32>
    %278 = vector.broadcast %273 : vector<10x1xf32> to vector<10x128xf32>
    %279 = vector.broadcast %277 : vector<1x128xf32> to vector<10x128xf32>
    %280 = arith.mulf %278, %279 : vector<10x128xf32>
    %c1_143 = arith.constant 1 : index
    %c0_144 = arith.constant 0 : index
    %281 = vector.load %arg3[%c1_143, %c0_144] : memref<2x128xf32, #tpu.memory_space<vmem>>, vector<1x128xf32>
    %282 = vector.broadcast %276 : vector<10x1xf32> to vector<10x128xf32>
    %283 = vector.broadcast %281 : vector<1x128xf32> to vector<10x128xf32>
    %284 = arith.mulf %282, %283 : vector<10x128xf32>
    %285 = arith.addf %280, %284 : vector<10x128xf32>
    %c0_145 = arith.constant 0 : index
    %c0_146 = arith.constant 0 : index
    %286 = vector.load %arg4[%c0_145, %c0_146] : memref<1x128xf32, #tpu.memory_space<vmem>>, vector<1x128xf32>
    %287 = vector.broadcast %286 : vector<1x128xf32> to vector<10x128xf32>
    %288 = arith.addf %285, %287 : vector<10x128xf32>
    %289 = arith.addf %288, %0 : vector<10x128xf32>
    %c0_147 = arith.constant 0 : index
    %c0_148 = arith.constant 0 : index
    %290 = vector.load %arg5[%c0_147, %c0_148] : memref<1x128xf32, #tpu.memory_space<vmem>>, vector<1x128xf32>
    %cst_149 = arith.constant 5.990000e-01 : f32
    %291 = vector.broadcast %cst_149 : f32 to vector<1x128xf32>
    %292 = arith.mulf %291, %290 : vector<1x128xf32>
    %293 = vector.broadcast %292 : vector<1x128xf32> to vector<10x128xf32>
    %294 = arith.addf %289, %293 : vector<10x128xf32>
    %c0_150 = arith.constant 0 : index
    %c0_151 = arith.constant 0 : index
    %295 = vector.load %arg6[%c0_150, %c0_151] : memref<128x128xf32, #tpu.memory_space<vmem>>, vector<128x128xf32>
    %cst_152 = arith.constant dense<0.000000e+00> : vector<10x128xf32>
    %296 = tpu.matmul %294, %295, %cst_152 {dimension_numbers = #tpu.dot_dimension_numbers<[1], [0], [0], [1], [0, 0, 1, 1], [], []>} : vector<10x128xf32>, vector<128x128xf32>, vector<10x128xf32> -> vector<10x128xf32>
    %c0_153 = arith.constant 0 : index
    %c0_154 = arith.constant 0 : index
    %297 = vector.load %arg7[%c0_153, %c0_154] : memref<1x128xf32, #tpu.memory_space<vmem>>, vector<1x128xf32>
    %298 = vector.broadcast %297 : vector<1x128xf32> to vector<10x128xf32>
    %299 = arith.addf %296, %298 : vector<10x128xf32>
    %cst_155 = arith.constant 0.000000e+00 : f32
    %300 = vector.broadcast %cst_155 : f32 to vector<10x128xf32>
    %301 = arith.maximumf %299, %300 : vector<10x128xf32>
    %c0_156 = arith.constant 0 : index
    %c0_157 = arith.constant 0 : index
    %302 = vector.load %arg8[%c0_156, %c0_157] : memref<128x128xf32, #tpu.memory_space<vmem>>, vector<128x128xf32>
    %cst_158 = arith.constant dense<0.000000e+00> : vector<10x128xf32>
    %303 = tpu.matmul %301, %302, %cst_158 {dimension_numbers = #tpu.dot_dimension_numbers<[1], [0], [0], [1], [0, 0, 1, 1], [], []>} : vector<10x128xf32>, vector<128x128xf32>, vector<10x128xf32> -> vector<10x128xf32>
    %c0_159 = arith.constant 0 : index
    %c0_160 = arith.constant 0 : index
    %304 = vector.load %arg9[%c0_159, %c0_160] : memref<1x128xf32, #tpu.memory_space<vmem>>, vector<1x128xf32>
    %305 = vector.broadcast %304 : vector<1x128xf32> to vector<10x128xf32>
    %306 = arith.addf %303, %305 : vector<10x128xf32>
    %cst_161 = arith.constant 0.000000e+00 : f32
    %307 = vector.broadcast %cst_161 : f32 to vector<10x128xf32>
    %308 = arith.maximumf %306, %307 : vector<10x128xf32>
    %c0_162 = arith.constant 0 : index
    %c0_163 = arith.constant 0 : index
    %309 = vector.load %arg10[%c0_162, %c0_163] : memref<128x2xf32, #tpu.memory_space<vmem>>, vector<128x2xf32>
    %cst_164 = arith.constant dense<0.000000e+00> : vector<10x2xf32>
    %310 = tpu.matmul %308, %309, %cst_164 {dimension_numbers = #tpu.dot_dimension_numbers<[1], [0], [0], [1], [0, 0, 1, 1], [], []>} : vector<10x128xf32>, vector<128x2xf32>, vector<10x2xf32> -> vector<10x2xf32>
    %c0_165 = arith.constant 0 : index
    %c0_166 = arith.constant 0 : index
    %311 = vector.load %arg11[%c0_165, %c0_166] : memref<1x2xf32, #tpu.memory_space<vmem>>, vector<1x2xf32>
    %312 = vector.broadcast %311 : vector<1x2xf32> to vector<10x2xf32>
    %313 = arith.addf %310, %312 : vector<10x2xf32>
    %314 = arith.negf %313 : vector<10x2xf32>
    %315 = math.exp %314 : vector<10x2xf32>
    %cst_167 = arith.constant 1.000000e+00 : f32
    %316 = vector.broadcast %cst_167 : f32 to vector<10x2xf32>
    %317 = arith.addf %316, %315 : vector<10x2xf32>
    %318 = arith.divf %316, %317 : vector<10x2xf32>
    %319 = vector.extract_strided_slice %318 {offsets = [0, 0], sizes = [10, 1], strides = [1, 1]} : vector<10x2xf32> to vector<10x1xf32>
    %320 = vector.extract_strided_slice %318 {offsets = [0, 1], sizes = [10, 1], strides = [1, 1]} : vector<10x2xf32> to vector<10x1xf32>
    %321 = arith.addf %319, %320 : vector<10x1xf32>
    %cst_168 = arith.constant 5.000000e-01 : f32
    %322 = vector.broadcast %cst_168 : f32 to vector<10x1xf32>
    %323 = arith.mulf %321, %322 : vector<10x1xf32>
    %324 = arith.subf %320, %319 : vector<10x1xf32>
    %cst_169 = arith.constant 2.000000e+00 : f32
    %325 = vector.broadcast %cst_169 : f32 to vector<10x1xf32>
    %326 = arith.mulf %323, %325 : vector<10x1xf32>
    %cst_170 = arith.constant 1.000000e+00 : f32
    %327 = vector.broadcast %cst_170 : f32 to vector<10x1xf32>
    %328 = arith.subf %326, %327 : vector<10x1xf32>
    %cst_171 = arith.constant 2.000000e+00 : f32
    %329 = vector.broadcast %cst_171 : f32 to vector<10x1xf32>
    %330 = arith.mulf %328, %329 : vector<10x1xf32>
    %cst_172 = arith.constant -2.000000e+00 : f32
    %cst_173 = arith.constant 2.000000e+00 : f32
    %331 = vector.broadcast %cst_172 : f32 to vector<10x1xf32>
    %332 = arith.maximumf %331, %330 : vector<10x1xf32>
    %333 = vector.broadcast %cst_173 : f32 to vector<10x1xf32>
    %334 = arith.minimumf %333, %332 : vector<10x1xf32>
    %cst_174 = arith.constant 2.000000e+00 : f32
    %335 = vector.broadcast %cst_174 : f32 to vector<10x1xf32>
    %336 = arith.mulf %324, %335 : vector<10x1xf32>
    %cst_175 = arith.constant 1.000000e+00 : f32
    %337 = vector.broadcast %cst_175 : f32 to vector<10x1xf32>
    %338 = arith.subf %336, %337 : vector<10x1xf32>
    %cst_176 = arith.constant 2.000000e+00 : f32
    %339 = vector.broadcast %cst_176 : f32 to vector<10x1xf32>
    %340 = arith.mulf %338, %339 : vector<10x1xf32>
    %cst_177 = arith.constant -2.000000e+00 : f32
    %cst_178 = arith.constant 2.000000e+00 : f32
    %341 = vector.broadcast %cst_177 : f32 to vector<10x1xf32>
    %342 = arith.maximumf %341, %340 : vector<10x1xf32>
    %343 = vector.broadcast %cst_178 : f32 to vector<10x1xf32>
    %344 = arith.minimumf %343, %342 : vector<10x1xf32>
    %cst_179 = arith.constant 1.71294761 : f32
    %345 = vector.broadcast %cst_179 : f32 to vector<10x1xf32>
    %346 = arith.mulf %345, %241 : vector<10x1xf32>
    %347 = arith.subf %346, %334 : vector<10x1xf32>
    %cst_180 = arith.constant 0.719035804 : f32
    %348 = vector.broadcast %cst_180 : f32 to vector<10x1xf32>
    %349 = arith.mulf %347, %348 : vector<10x1xf32>
    %cst_181 = arith.constant 1.71294761 : f32
    %350 = vector.broadcast %cst_181 : f32 to vector<10x1xf32>
    %351 = arith.mulf %350, %250 : vector<10x1xf32>
    %352 = arith.subf %351, %344 : vector<10x1xf32>
    %cst_182 = arith.constant 0.719035804 : f32
    %353 = vector.broadcast %cst_182 : f32 to vector<10x1xf32>
    %354 = arith.mulf %352, %353 : vector<10x1xf32>
    %c2 = arith.constant 2 : index
    %c0_183 = arith.constant 0 : index
    %c0_184 = arith.constant 0 : index
    %355 = vector.load %arg2[%c2, %c0_183, %c0_184] : memref<5x10x2xf32, #tpu.memory_space<vmem>>, vector<1x10x2xf32>
    %356 = vector.shape_cast %355 : vector<1x10x2xf32> to vector<10x2xf32>
    %cst_185 = arith.constant 0.80466032 : f32
    %357 = vector.broadcast %cst_185 : f32 to vector<10x1xf32>
    %358 = arith.mulf %334, %357 : vector<10x1xf32>
    %cst_186 = arith.constant 0.315009683 : f32
    %359 = vector.broadcast %cst_186 : f32 to vector<10x1xf32>
    %360 = arith.mulf %359, %349 : vector<10x1xf32>
    %361 = arith.addf %358, %360 : vector<10x1xf32>
    %362 = vector.extract_strided_slice %356 {offsets = [0, 0], sizes = [10, 1], strides = [1, 1]} : vector<10x2xf32> to vector<10x1xf32>
    %cst_187 = arith.constant 0.503279924 : f32
    %363 = vector.broadcast %cst_187 : f32 to vector<10x1xf32>
    %364 = arith.mulf %363, %362 : vector<10x1xf32>
    %365 = arith.addf %361, %364 : vector<10x1xf32>
    %cst_188 = arith.constant 0.80466032 : f32
    %366 = vector.broadcast %cst_188 : f32 to vector<10x1xf32>
    %367 = arith.mulf %344, %366 : vector<10x1xf32>
    %cst_189 = arith.constant 0.315009683 : f32
    %368 = vector.broadcast %cst_189 : f32 to vector<10x1xf32>
    %369 = arith.mulf %368, %354 : vector<10x1xf32>
    %370 = arith.addf %367, %369 : vector<10x1xf32>
    %371 = vector.extract_strided_slice %356 {offsets = [0, 1], sizes = [10, 1], strides = [1, 1]} : vector<10x2xf32> to vector<10x1xf32>
    %cst_190 = arith.constant 0.503279924 : f32
    %372 = vector.broadcast %cst_190 : f32 to vector<10x1xf32>
    %373 = arith.mulf %372, %371 : vector<10x1xf32>
    %374 = arith.addf %370, %373 : vector<10x1xf32>
    %cst_191 = arith.constant -2.000000e+00 : f32
    %cst_192 = arith.constant 2.000000e+00 : f32
    %375 = vector.broadcast %cst_191 : f32 to vector<10x1xf32>
    %376 = arith.maximumf %375, %365 : vector<10x1xf32>
    %377 = vector.broadcast %cst_192 : f32 to vector<10x1xf32>
    %378 = arith.minimumf %377, %376 : vector<10x1xf32>
    %cst_193 = arith.constant 2.000000e+00 : f32
    %379 = vector.broadcast %cst_193 : f32 to vector<10x1xf32>
    %380 = arith.divf %378, %379 : vector<10x1xf32>
    %cst_194 = arith.constant 1.000000e+00 : f32
    %381 = vector.broadcast %cst_194 : f32 to vector<10x1xf32>
    %382 = arith.addf %380, %381 : vector<10x1xf32>
    %cst_195 = arith.constant 5.000000e-01 : f32
    %383 = vector.broadcast %cst_195 : f32 to vector<10x1xf32>
    %384 = arith.mulf %382, %383 : vector<10x1xf32>
    %cst_196 = arith.constant -2.000000e+00 : f32
    %cst_197 = arith.constant 2.000000e+00 : f32
    %385 = vector.broadcast %cst_196 : f32 to vector<10x1xf32>
    %386 = arith.maximumf %385, %374 : vector<10x1xf32>
    %387 = vector.broadcast %cst_197 : f32 to vector<10x1xf32>
    %388 = arith.minimumf %387, %386 : vector<10x1xf32>
    %cst_198 = arith.constant 2.000000e+00 : f32
    %389 = vector.broadcast %cst_198 : f32 to vector<10x1xf32>
    %390 = arith.divf %388, %389 : vector<10x1xf32>
    %cst_199 = arith.constant 1.000000e+00 : f32
    %391 = vector.broadcast %cst_199 : f32 to vector<10x1xf32>
    %392 = arith.addf %390, %391 : vector<10x1xf32>
    %cst_200 = arith.constant 5.000000e-01 : f32
    %393 = vector.broadcast %cst_200 : f32 to vector<10x1xf32>
    %394 = arith.mulf %392, %393 : vector<10x1xf32>
    %cst_201 = arith.constant 5.000000e-01 : f32
    %395 = vector.broadcast %cst_201 : f32 to vector<10x1xf32>
    %396 = arith.mulf %395, %394 : vector<10x1xf32>
    %397 = arith.subf %384, %396 : vector<10x1xf32>
    %cst_202 = arith.constant 5.000000e-01 : f32
    %398 = vector.broadcast %cst_202 : f32 to vector<10x1xf32>
    %399 = arith.mulf %398, %394 : vector<10x1xf32>
    %400 = arith.addf %384, %399 : vector<10x1xf32>
    %c0_203 = arith.constant 0 : index
    %c0_204 = arith.constant 0 : index
    %401 = vector.load %arg3[%c0_203, %c0_204] : memref<2x128xf32, #tpu.memory_space<vmem>>, vector<1x128xf32>
    %402 = vector.broadcast %397 : vector<10x1xf32> to vector<10x128xf32>
    %403 = vector.broadcast %401 : vector<1x128xf32> to vector<10x128xf32>
    %404 = arith.mulf %402, %403 : vector<10x128xf32>
    %c1_205 = arith.constant 1 : index
    %c0_206 = arith.constant 0 : index
    %405 = vector.load %arg3[%c1_205, %c0_206] : memref<2x128xf32, #tpu.memory_space<vmem>>, vector<1x128xf32>
    %406 = vector.broadcast %400 : vector<10x1xf32> to vector<10x128xf32>
    %407 = vector.broadcast %405 : vector<1x128xf32> to vector<10x128xf32>
    %408 = arith.mulf %406, %407 : vector<10x128xf32>
    %409 = arith.addf %404, %408 : vector<10x128xf32>
    %c0_207 = arith.constant 0 : index
    %c0_208 = arith.constant 0 : index
    %410 = vector.load %arg4[%c0_207, %c0_208] : memref<1x128xf32, #tpu.memory_space<vmem>>, vector<1x128xf32>
    %411 = vector.broadcast %410 : vector<1x128xf32> to vector<10x128xf32>
    %412 = arith.addf %409, %411 : vector<10x128xf32>
    %413 = arith.addf %412, %0 : vector<10x128xf32>
    %c0_209 = arith.constant 0 : index
    %c0_210 = arith.constant 0 : index
    %414 = vector.load %arg5[%c0_209, %c0_210] : memref<1x128xf32, #tpu.memory_space<vmem>>, vector<1x128xf32>
    %cst_211 = arith.constant 3.990000e-01 : f32
    %415 = vector.broadcast %cst_211 : f32 to vector<1x128xf32>
    %416 = arith.mulf %415, %414 : vector<1x128xf32>
    %417 = vector.broadcast %416 : vector<1x128xf32> to vector<10x128xf32>
    %418 = arith.addf %413, %417 : vector<10x128xf32>
    %c0_212 = arith.constant 0 : index
    %c0_213 = arith.constant 0 : index
    %419 = vector.load %arg6[%c0_212, %c0_213] : memref<128x128xf32, #tpu.memory_space<vmem>>, vector<128x128xf32>
    %cst_214 = arith.constant dense<0.000000e+00> : vector<10x128xf32>
    %420 = tpu.matmul %418, %419, %cst_214 {dimension_numbers = #tpu.dot_dimension_numbers<[1], [0], [0], [1], [0, 0, 1, 1], [], []>} : vector<10x128xf32>, vector<128x128xf32>, vector<10x128xf32> -> vector<10x128xf32>
    %c0_215 = arith.constant 0 : index
    %c0_216 = arith.constant 0 : index
    %421 = vector.load %arg7[%c0_215, %c0_216] : memref<1x128xf32, #tpu.memory_space<vmem>>, vector<1x128xf32>
    %422 = vector.broadcast %421 : vector<1x128xf32> to vector<10x128xf32>
    %423 = arith.addf %420, %422 : vector<10x128xf32>
    %cst_217 = arith.constant 0.000000e+00 : f32
    %424 = vector.broadcast %cst_217 : f32 to vector<10x128xf32>
    %425 = arith.maximumf %423, %424 : vector<10x128xf32>
    %c0_218 = arith.constant 0 : index
    %c0_219 = arith.constant 0 : index
    %426 = vector.load %arg8[%c0_218, %c0_219] : memref<128x128xf32, #tpu.memory_space<vmem>>, vector<128x128xf32>
    %cst_220 = arith.constant dense<0.000000e+00> : vector<10x128xf32>
    %427 = tpu.matmul %425, %426, %cst_220 {dimension_numbers = #tpu.dot_dimension_numbers<[1], [0], [0], [1], [0, 0, 1, 1], [], []>} : vector<10x128xf32>, vector<128x128xf32>, vector<10x128xf32> -> vector<10x128xf32>
    %c0_221 = arith.constant 0 : index
    %c0_222 = arith.constant 0 : index
    %428 = vector.load %arg9[%c0_221, %c0_222] : memref<1x128xf32, #tpu.memory_space<vmem>>, vector<1x128xf32>
    %429 = vector.broadcast %428 : vector<1x128xf32> to vector<10x128xf32>
    %430 = arith.addf %427, %429 : vector<10x128xf32>
    %cst_223 = arith.constant 0.000000e+00 : f32
    %431 = vector.broadcast %cst_223 : f32 to vector<10x128xf32>
    %432 = arith.maximumf %430, %431 : vector<10x128xf32>
    %c0_224 = arith.constant 0 : index
    %c0_225 = arith.constant 0 : index
    %433 = vector.load %arg10[%c0_224, %c0_225] : memref<128x2xf32, #tpu.memory_space<vmem>>, vector<128x2xf32>
    %cst_226 = arith.constant dense<0.000000e+00> : vector<10x2xf32>
    %434 = tpu.matmul %432, %433, %cst_226 {dimension_numbers = #tpu.dot_dimension_numbers<[1], [0], [0], [1], [0, 0, 1, 1], [], []>} : vector<10x128xf32>, vector<128x2xf32>, vector<10x2xf32> -> vector<10x2xf32>
    %c0_227 = arith.constant 0 : index
    %c0_228 = arith.constant 0 : index
    %435 = vector.load %arg11[%c0_227, %c0_228] : memref<1x2xf32, #tpu.memory_space<vmem>>, vector<1x2xf32>
    %436 = vector.broadcast %435 : vector<1x2xf32> to vector<10x2xf32>
    %437 = arith.addf %434, %436 : vector<10x2xf32>
    %438 = arith.negf %437 : vector<10x2xf32>
    %439 = math.exp %438 : vector<10x2xf32>
    %cst_229 = arith.constant 1.000000e+00 : f32
    %440 = vector.broadcast %cst_229 : f32 to vector<10x2xf32>
    %441 = arith.addf %440, %439 : vector<10x2xf32>
    %442 = arith.divf %440, %441 : vector<10x2xf32>
    %443 = vector.extract_strided_slice %442 {offsets = [0, 0], sizes = [10, 1], strides = [1, 1]} : vector<10x2xf32> to vector<10x1xf32>
    %444 = vector.extract_strided_slice %442 {offsets = [0, 1], sizes = [10, 1], strides = [1, 1]} : vector<10x2xf32> to vector<10x1xf32>
    %445 = arith.addf %443, %444 : vector<10x1xf32>
    %cst_230 = arith.constant 5.000000e-01 : f32
    %446 = vector.broadcast %cst_230 : f32 to vector<10x1xf32>
    %447 = arith.mulf %445, %446 : vector<10x1xf32>
    %448 = arith.subf %444, %443 : vector<10x1xf32>
    %cst_231 = arith.constant 2.000000e+00 : f32
    %449 = vector.broadcast %cst_231 : f32 to vector<10x1xf32>
    %450 = arith.mulf %447, %449 : vector<10x1xf32>
    %cst_232 = arith.constant 1.000000e+00 : f32
    %451 = vector.broadcast %cst_232 : f32 to vector<10x1xf32>
    %452 = arith.subf %450, %451 : vector<10x1xf32>
    %cst_233 = arith.constant 2.000000e+00 : f32
    %453 = vector.broadcast %cst_233 : f32 to vector<10x1xf32>
    %454 = arith.mulf %452, %453 : vector<10x1xf32>
    %cst_234 = arith.constant -2.000000e+00 : f32
    %cst_235 = arith.constant 2.000000e+00 : f32
    %455 = vector.broadcast %cst_234 : f32 to vector<10x1xf32>
    %456 = arith.maximumf %455, %454 : vector<10x1xf32>
    %457 = vector.broadcast %cst_235 : f32 to vector<10x1xf32>
    %458 = arith.minimumf %457, %456 : vector<10x1xf32>
    %cst_236 = arith.constant 2.000000e+00 : f32
    %459 = vector.broadcast %cst_236 : f32 to vector<10x1xf32>
    %460 = arith.mulf %448, %459 : vector<10x1xf32>
    %cst_237 = arith.constant 1.000000e+00 : f32
    %461 = vector.broadcast %cst_237 : f32 to vector<10x1xf32>
    %462 = arith.subf %460, %461 : vector<10x1xf32>
    %cst_238 = arith.constant 2.000000e+00 : f32
    %463 = vector.broadcast %cst_238 : f32 to vector<10x1xf32>
    %464 = arith.mulf %462, %463 : vector<10x1xf32>
    %cst_239 = arith.constant -2.000000e+00 : f32
    %cst_240 = arith.constant 2.000000e+00 : f32
    %465 = vector.broadcast %cst_239 : f32 to vector<10x1xf32>
    %466 = arith.maximumf %465, %464 : vector<10x1xf32>
    %467 = vector.broadcast %cst_240 : f32 to vector<10x1xf32>
    %468 = arith.minimumf %467, %466 : vector<10x1xf32>
    %cst_241 = arith.constant 1.24276042 : f32
    %469 = vector.broadcast %cst_241 : f32 to vector<10x1xf32>
    %470 = arith.mulf %469, %365 : vector<10x1xf32>
    %471 = arith.subf %470, %458 : vector<10x1xf32>
    %cst_242 = arith.constant 1.3552506 : f32
    %472 = vector.broadcast %cst_242 : f32 to vector<10x1xf32>
    %473 = arith.mulf %471, %472 : vector<10x1xf32>
    %cst_243 = arith.constant 1.24276042 : f32
    %474 = vector.broadcast %cst_243 : f32 to vector<10x1xf32>
    %475 = arith.mulf %474, %374 : vector<10x1xf32>
    %476 = arith.subf %475, %468 : vector<10x1xf32>
    %cst_244 = arith.constant 1.3552506 : f32
    %477 = vector.broadcast %cst_244 : f32 to vector<10x1xf32>
    %478 = arith.mulf %476, %477 : vector<10x1xf32>
    %c3 = arith.constant 3 : index
    %c0_245 = arith.constant 0 : index
    %c0_246 = arith.constant 0 : index
    %479 = vector.load %arg2[%c3, %c0_245, %c0_246] : memref<5x10x2xf32, #tpu.memory_space<vmem>>, vector<1x10x2xf32>
    %480 = vector.shape_cast %479 : vector<1x10x2xf32> to vector<10x2xf32>
    %cst_247 = arith.constant 9.480010e-01 : f32
    %481 = vector.broadcast %cst_247 : f32 to vector<10x1xf32>
    %482 = arith.mulf %458, %481 : vector<10x1xf32>
    %cst_248 = arith.constant 0.144808769 : f32
    %483 = vector.broadcast %cst_248 : f32 to vector<10x1xf32>
    %484 = arith.mulf %483, %473 : vector<10x1xf32>
    %485 = arith.addf %482, %484 : vector<10x1xf32>
    %486 = vector.extract_strided_slice %480 {offsets = [0, 0], sizes = [10, 1], strides = [1, 1]} : vector<10x2xf32> to vector<10x1xf32>
    %cst_249 = arith.constant 0.283415765 : f32
    %487 = vector.broadcast %cst_249 : f32 to vector<10x1xf32>
    %488 = arith.mulf %487, %486 : vector<10x1xf32>
    %489 = arith.addf %485, %488 : vector<10x1xf32>
    %cst_250 = arith.constant 9.480010e-01 : f32
    %490 = vector.broadcast %cst_250 : f32 to vector<10x1xf32>
    %491 = arith.mulf %468, %490 : vector<10x1xf32>
    %cst_251 = arith.constant 0.144808769 : f32
    %492 = vector.broadcast %cst_251 : f32 to vector<10x1xf32>
    %493 = arith.mulf %492, %478 : vector<10x1xf32>
    %494 = arith.addf %491, %493 : vector<10x1xf32>
    %495 = vector.extract_strided_slice %480 {offsets = [0, 1], sizes = [10, 1], strides = [1, 1]} : vector<10x2xf32> to vector<10x1xf32>
    %cst_252 = arith.constant 0.283415765 : f32
    %496 = vector.broadcast %cst_252 : f32 to vector<10x1xf32>
    %497 = arith.mulf %496, %495 : vector<10x1xf32>
    %498 = arith.addf %494, %497 : vector<10x1xf32>
    %cst_253 = arith.constant -2.000000e+00 : f32
    %cst_254 = arith.constant 2.000000e+00 : f32
    %499 = vector.broadcast %cst_253 : f32 to vector<10x1xf32>
    %500 = arith.maximumf %499, %489 : vector<10x1xf32>
    %501 = vector.broadcast %cst_254 : f32 to vector<10x1xf32>
    %502 = arith.minimumf %501, %500 : vector<10x1xf32>
    %cst_255 = arith.constant 2.000000e+00 : f32
    %503 = vector.broadcast %cst_255 : f32 to vector<10x1xf32>
    %504 = arith.divf %502, %503 : vector<10x1xf32>
    %cst_256 = arith.constant 1.000000e+00 : f32
    %505 = vector.broadcast %cst_256 : f32 to vector<10x1xf32>
    %506 = arith.addf %504, %505 : vector<10x1xf32>
    %cst_257 = arith.constant 5.000000e-01 : f32
    %507 = vector.broadcast %cst_257 : f32 to vector<10x1xf32>
    %508 = arith.mulf %506, %507 : vector<10x1xf32>
    %cst_258 = arith.constant -2.000000e+00 : f32
    %cst_259 = arith.constant 2.000000e+00 : f32
    %509 = vector.broadcast %cst_258 : f32 to vector<10x1xf32>
    %510 = arith.maximumf %509, %498 : vector<10x1xf32>
    %511 = vector.broadcast %cst_259 : f32 to vector<10x1xf32>
    %512 = arith.minimumf %511, %510 : vector<10x1xf32>
    %cst_260 = arith.constant 2.000000e+00 : f32
    %513 = vector.broadcast %cst_260 : f32 to vector<10x1xf32>
    %514 = arith.divf %512, %513 : vector<10x1xf32>
    %cst_261 = arith.constant 1.000000e+00 : f32
    %515 = vector.broadcast %cst_261 : f32 to vector<10x1xf32>
    %516 = arith.addf %514, %515 : vector<10x1xf32>
    %cst_262 = arith.constant 5.000000e-01 : f32
    %517 = vector.broadcast %cst_262 : f32 to vector<10x1xf32>
    %518 = arith.mulf %516, %517 : vector<10x1xf32>
    %cst_263 = arith.constant 5.000000e-01 : f32
    %519 = vector.broadcast %cst_263 : f32 to vector<10x1xf32>
    %520 = arith.mulf %519, %518 : vector<10x1xf32>
    %521 = arith.subf %508, %520 : vector<10x1xf32>
    %cst_264 = arith.constant 5.000000e-01 : f32
    %522 = vector.broadcast %cst_264 : f32 to vector<10x1xf32>
    %523 = arith.mulf %522, %518 : vector<10x1xf32>
    %524 = arith.addf %508, %523 : vector<10x1xf32>
    %c0_265 = arith.constant 0 : index
    %c0_266 = arith.constant 0 : index
    %525 = vector.load %arg3[%c0_265, %c0_266] : memref<2x128xf32, #tpu.memory_space<vmem>>, vector<1x128xf32>
    %526 = vector.broadcast %521 : vector<10x1xf32> to vector<10x128xf32>
    %527 = vector.broadcast %525 : vector<1x128xf32> to vector<10x128xf32>
    %528 = arith.mulf %526, %527 : vector<10x128xf32>
    %c1_267 = arith.constant 1 : index
    %c0_268 = arith.constant 0 : index
    %529 = vector.load %arg3[%c1_267, %c0_268] : memref<2x128xf32, #tpu.memory_space<vmem>>, vector<1x128xf32>
    %530 = vector.broadcast %524 : vector<10x1xf32> to vector<10x128xf32>
    %531 = vector.broadcast %529 : vector<1x128xf32> to vector<10x128xf32>
    %532 = arith.mulf %530, %531 : vector<10x128xf32>
    %533 = arith.addf %528, %532 : vector<10x128xf32>
    %c0_269 = arith.constant 0 : index
    %c0_270 = arith.constant 0 : index
    %534 = vector.load %arg4[%c0_269, %c0_270] : memref<1x128xf32, #tpu.memory_space<vmem>>, vector<1x128xf32>
    %535 = vector.broadcast %534 : vector<1x128xf32> to vector<10x128xf32>
    %536 = arith.addf %533, %535 : vector<10x128xf32>
    %537 = arith.addf %536, %0 : vector<10x128xf32>
    %c0_271 = arith.constant 0 : index
    %c0_272 = arith.constant 0 : index
    %538 = vector.load %arg5[%c0_271, %c0_272] : memref<1x128xf32, #tpu.memory_space<vmem>>, vector<1x128xf32>
    %cst_273 = arith.constant 1.990000e-01 : f32
    %539 = vector.broadcast %cst_273 : f32 to vector<1x128xf32>
    %540 = arith.mulf %539, %538 : vector<1x128xf32>
    %541 = vector.broadcast %540 : vector<1x128xf32> to vector<10x128xf32>
    %542 = arith.addf %537, %541 : vector<10x128xf32>
    %c0_274 = arith.constant 0 : index
    %c0_275 = arith.constant 0 : index
    %543 = vector.load %arg6[%c0_274, %c0_275] : memref<128x128xf32, #tpu.memory_space<vmem>>, vector<128x128xf32>
    %cst_276 = arith.constant dense<0.000000e+00> : vector<10x128xf32>
    %544 = tpu.matmul %542, %543, %cst_276 {dimension_numbers = #tpu.dot_dimension_numbers<[1], [0], [0], [1], [0, 0, 1, 1], [], []>} : vector<10x128xf32>, vector<128x128xf32>, vector<10x128xf32> -> vector<10x128xf32>
    %c0_277 = arith.constant 0 : index
    %c0_278 = arith.constant 0 : index
    %545 = vector.load %arg7[%c0_277, %c0_278] : memref<1x128xf32, #tpu.memory_space<vmem>>, vector<1x128xf32>
    %546 = vector.broadcast %545 : vector<1x128xf32> to vector<10x128xf32>
    %547 = arith.addf %544, %546 : vector<10x128xf32>
    %cst_279 = arith.constant 0.000000e+00 : f32
    %548 = vector.broadcast %cst_279 : f32 to vector<10x128xf32>
    %549 = arith.maximumf %547, %548 : vector<10x128xf32>
    %c0_280 = arith.constant 0 : index
    %c0_281 = arith.constant 0 : index
    %550 = vector.load %arg8[%c0_280, %c0_281] : memref<128x128xf32, #tpu.memory_space<vmem>>, vector<128x128xf32>
    %cst_282 = arith.constant dense<0.000000e+00> : vector<10x128xf32>
    %551 = tpu.matmul %549, %550, %cst_282 {dimension_numbers = #tpu.dot_dimension_numbers<[1], [0], [0], [1], [0, 0, 1, 1], [], []>} : vector<10x128xf32>, vector<128x128xf32>, vector<10x128xf32> -> vector<10x128xf32>
    %c0_283 = arith.constant 0 : index
    %c0_284 = arith.constant 0 : index
    %552 = vector.load %arg9[%c0_283, %c0_284] : memref<1x128xf32, #tpu.memory_space<vmem>>, vector<1x128xf32>
    %553 = vector.broadcast %552 : vector<1x128xf32> to vector<10x128xf32>
    %554 = arith.addf %551, %553 : vector<10x128xf32>
    %cst_285 = arith.constant 0.000000e+00 : f32
    %555 = vector.broadcast %cst_285 : f32 to vector<10x128xf32>
    %556 = arith.maximumf %554, %555 : vector<10x128xf32>
    %c0_286 = arith.constant 0 : index
    %c0_287 = arith.constant 0 : index
    %557 = vector.load %arg10[%c0_286, %c0_287] : memref<128x2xf32, #tpu.memory_space<vmem>>, vector<128x2xf32>
    %cst_288 = arith.constant dense<0.000000e+00> : vector<10x2xf32>
    %558 = tpu.matmul %556, %557, %cst_288 {dimension_numbers = #tpu.dot_dimension_numbers<[1], [0], [0], [1], [0, 0, 1, 1], [], []>} : vector<10x128xf32>, vector<128x2xf32>, vector<10x2xf32> -> vector<10x2xf32>
    %c0_289 = arith.constant 0 : index
    %c0_290 = arith.constant 0 : index
    %559 = vector.load %arg11[%c0_289, %c0_290] : memref<1x2xf32, #tpu.memory_space<vmem>>, vector<1x2xf32>
    %560 = vector.broadcast %559 : vector<1x2xf32> to vector<10x2xf32>
    %561 = arith.addf %558, %560 : vector<10x2xf32>
    %562 = arith.negf %561 : vector<10x2xf32>
    %563 = math.exp %562 : vector<10x2xf32>
    %cst_291 = arith.constant 1.000000e+00 : f32
    %564 = vector.broadcast %cst_291 : f32 to vector<10x2xf32>
    %565 = arith.addf %564, %563 : vector<10x2xf32>
    %566 = arith.divf %564, %565 : vector<10x2xf32>
    %567 = vector.extract_strided_slice %566 {offsets = [0, 0], sizes = [10, 1], strides = [1, 1]} : vector<10x2xf32> to vector<10x1xf32>
    %568 = vector.extract_strided_slice %566 {offsets = [0, 1], sizes = [10, 1], strides = [1, 1]} : vector<10x2xf32> to vector<10x1xf32>
    %569 = arith.addf %567, %568 : vector<10x1xf32>
    %cst_292 = arith.constant 5.000000e-01 : f32
    %570 = vector.broadcast %cst_292 : f32 to vector<10x1xf32>
    %571 = arith.mulf %569, %570 : vector<10x1xf32>
    %572 = arith.subf %568, %567 : vector<10x1xf32>
    %573 = tpu.concatenate %571, %572 in 1 : vector<10x1xf32>, vector<10x1xf32> -> vector<10x2xf32>
    %c0_293 = arith.constant 0 : index
    %c0_294 = arith.constant 0 : index
    %574 = vector.load %arg12[%c0_293, %c0_294] : memref<10x2xf32, #tpu.memory_space<vmem>>, vector<10x2xf32>
    tpu.vector_store %arg12[%c0_293, %c0_294], %573 {strides = array<i32>} : memref<10x2xf32, #tpu.memory_space<vmem>>, vector<10x2xf32>,
    return
  }
}

</mosaic_0001>

<bundles_post_ra>
// kernel: diffusionvg_forward.6
= control target key start
LH: loop header
LB: loop body
LE: loop exit
PB: predicated region body
PF: predicated region fallthrough
CT: control target
= control target key end

     0   :  { %13 = vsyncpa [#allocation3], 0  ;;  %s1259_s0 = inlined_call_operand.vmem [shape: f32[16,768], index: 0, kind: input, shape index: {}]   ;;  %s1260_s1 = inlined_call_operand.vmem [shape: f32[16,128], index: 1, kind: input, shape index: {}]   ;;  %s1261_s2 = inlined_call_operand.vmem [shape: f32[1,768], index: 2, kind: input, shape index: {}]   ;;  %s1262_s3 = inlined_call_operand.vmem [shape: f32[1,768], index: 3, kind: input, shape index: {}]   ;;  %s1263_s4 = inlined_call_operand.hbm [shape: bf16[768,128], index: 4, kind: input, shape index: {}]   ;;  %s1264_s5 = inlined_call_operand.vmem [shape: f32[1,128], index: 5, kind: input, shape index: {}]   ;;  %s1265_s6 = inlined_call_operand.hbm [shape: f32[128,128], index: 6, kind: input, shape index: {}]   ;;  %s1266_s7 = inlined_call_operand.vmem [shape: f32[1,128], index: 7, kind: input, shape index: {}]   ;;  %s1267_s8 = inlined_call_operand.vmem [shape: f32[16,128], index: 8, kind: output, shape index: {}]  }
   0x1   :  { %s27_s29 = sshll.u32 %s1263_s4, 4  ;;  %s28_s29 = int_to_ptr.hbm [resolvable:$true] %s27_s29 }
   0x2   :  { %14 = vsyncpa [#allocation5], 0  ;;  %s1066_s30 = smov [#allocation2]   ;;  %s42_s12 = sshll.u32 %s1265_s6, 4  ;;  %s43_s12 = int_to_ptr.hbm [resolvable:$true] %s42_s12 }
   0x3   :  { %s29_s9 = sshll.u32 %s1066_s30, 4  ;;  %s1067_s13 = smov 64   ;;  %s30_s9 = int_to_ptr.vmem [resolvable:$true] %s29_s9 }
   0x4   :  { %s1068_s14 = smov 4   ;;  %s1069_s15 = smov [#allocation4]  }
   0x5   :  { %35 = dma.hbm_to_vmem [thread:$0]  %s28_s29, 6144, %s30_s9, [#allocation3], %s1067_s13, %s1067_s13, %s1068_s14  }
   0x6   :  { %s44_s16 = sshll.u32 %s1069_s15, 4  ;;  %s1070_s17 = smov 128   ;;  %s45_s16 = int_to_ptr.vmem [resolvable:$true] %s44_s16 }
   0x7   :  { %s1071_s18 = smov 8  }
   0x8   :  { %50 = dma.hbm_to_vmem [thread:$0]  %s43_s12, 2048, %s45_s16, [#allocation5], %s1070_s17, %s1070_s17, %s1071_s18  }
   0x9   :  { %1062 = dma.done.wait [#allocation3], 6144  }
   0xa   :  { %1063 = vsyncadd [#allocation3], 4294961152 }
   0xb   :  { %1064 = dma.done.wait [#allocation5], 2048  }
   0xc   :  { %1065 = vsyncadd [#allocation5], 4294965248  ;;  %v61_v0 = vld [vmem:[%s1259_s0] sm:$0xff]  ;;  %v62_v1 = vld [vmem:[%s1259_s0 + $0x8] sm:$0xff]  ;;  %v1072_v22 = vmov 768.0  }
   0xd   :  { %v63_v2 = vld [vmem:[%s1259_s0 + $0x10] sm:$0xff]  ;;  %v64_v3 = vld [vmem:[%s1259_s0 + $0x18] sm:$0xff]  ;;  %v73_v4 = vadd.f32 %v62_v1, %v61_v0  ;;  %v69_v7 = vld [vmem:[%s1259_s0 + $0x40] sm:$0xff]  ;;  %1008 = vrcp.f32 %v1072_v22 }
   0xe   :  { %v67_v5 = vld [vmem:[%s1259_s0 + $0x30] sm:$0xff]  ;;  %v68_v6 = vld [vmem:[%s1259_s0 + $0x38] sm:$0xff]  ;;  %v65_v8 = vld [vmem:[%s1259_s0 + $0x20] sm:$0xff] }
   0xf   :  { %v74_v9 = vadd.f32 %v73_v4, %v63_v2  ;;  %v80_v10 = vadd.f32 %v68_v6, %v67_v5  ;;  %v70_v11 = vld [vmem:[%s1259_s0 + $0x48] sm:$0xff]  ;;  %v71_v17 = vld [vmem:[%s1259_s0 + $0x50] sm:$0xff]  ;;  %v72_v20 = vld [vmem:[%s1259_s0 + $0x58] sm:$0xff] }
  0x10   :  { %v66_v14 = vld [vmem:[%s1259_s0 + $0x28] sm:$0xff]  ;;  %v958_v27 = vld [vmem:[#allocation2 + $0x38] sm:$0xff]  ;;  %v957_v30 = vld [vmem:[#allocation2 + $0x30] sm:$0xff] }
  0x11   :  { %v75_v12 = vadd.f32 %v74_v9, %v64_v3  ;;  %v81_v13 = vadd.f32 %v80_v10, %v69_v7  ;;  %v966_v28 = vld [vmem:[#allocation2 + $0x78] sm:$0xff]  ;;  %616 = vmatpush.bf16.msra.mxu0 %v958_v27  ;;  %v965_v31 = vld [vmem:[#allocation2 + $0x70] sm:$0xff]  ;;  %v955_v9 = vld [vmem:[#allocation2 + $0x20] sm:$0xff] }
  0x12   :  { %630 = vmatpush.bf16.msra.mxu1 %v966_v28  ;;  %v963_v10 = vld [vmem:[#allocation2 + $0x60] sm:$0xff]  ;;  %v960_v22 = vld [vmem:[#allocation2 + $0x48] sm:$0xff]  ;;  %v970_v27 = vld [vmem:[#allocation2 + $0x98] sm:$0xff] }
  0x13   :  { %v76_v15 = vadd.f32 %v75_v12, %v65_v8  ;;  %v82_v16 = vadd.f32 %v81_v13, %v70_v11  ;;  %v1009_v23 = vpop.eup %1008  ;;  %v982_v12 = vld [vmem:[#allocation2 + $0xf8] sm:$0xff] }
  0x14   :  { %v88_v24 = vmul.f32 768.0, %v1009_v23  ;;  %vm92_vm0 = vweird.f32 %v1009_v23  ;;  %658 = vmatpush.bf16.msra.mxu3 %v982_v12  ;;  %v954_v13 = vld [vmem:[#allocation2 + $0x18] sm:$0xff] }
  0x15   :  { %v77_v18 = vadd.f32 %v76_v15, %v66_v14  ;;  %v83_v19 = vadd.f32 %v82_v16, %v71_v17  ;;  %617 = vmatpush.bf16.msra.mxu0 %v957_v30  ;;  %v973_v15 = vld [vmem:[#allocation2 + $0xb0] sm:$0xff]  ;;  %v978_v28 = vld [vmem:[#allocation2 + $0xd8] sm:$0xff] }
  0x16   :  { %v89_v25 = vsub.f32 1.0, %v88_v24  ;;  %631 = vmatpush.bf16.msra.mxu1 %v965_v31  ;;  %v981_v16 = vld [vmem:[#allocation2 + $0xf0] sm:$0xff]  ;;  %v979_v24 = vld [vmem:[#allocation2 + $0xe0] sm:$0xff]  ;;  %v998_v30 = vld [vmem:[#allocation2 + $0x178] sm:$0xff] }
  0x17   :  { %78 = vadd.xlane.f32.xlu0 %v77_v18  ;;  %v84_v21 = vadd.f32 %v83_v19, %v72_v20  ;;  %v961_v18 = vld [vmem:[#allocation2 + $0x50] sm:$0xff]  ;;  %v972_v19 = vld [vmem:[#allocation2 + $0xa8] sm:$0xff] }
  0x18   :  { %v90_v26 = vmul.f32 %v1009_v23, %v89_v25  ;;  %659 = vmatpush.bf16.msra.mxu3 %v981_v16  ;;  %v951_v25 = vld [vmem:[#allocation2] sm:$0xff]  ;;  %v969_v31 = vld [vmem:[#allocation2 + $0x90] sm:$0xff]  ;;  %v721_v16 = vld [vmem:[#allocation4 + $0x78] sm:$0xff] }
  0x1a   :  { %v91_v29 = vadd.f32 %v1009_v23, %v90_v26  ;;  %v959_v26 = vld [vmem:[#allocation2 + $0x40] sm:$0xff] }
  0x1c   :  { %v1160_v32 = vsel %vm92_vm0, %v1009_v23, %v91_v29  ;;  %v971_v23 = vld [vmem:[#allocation2 + $0xa0] sm:$0xff]  ;;  %v990_v29 = vld [vmem:[#allocation2 + $0x138] sm:$0xff] }
  0x1f   :  { %85 = vadd.xlane.f32.xlu0 %v84_v21  ;;  %v952_v21 = vld [vmem:[#allocation2 + $0x8] sm:$0xff] }
  0x8a   :  { %v79_v33 = vpop.xlane.xlu0 %78 }
  0x8b   :  { %v94_v34 = vmul.f32 %v1160_v32, %v79_v33  ;;  %v977_v33 = vld [vmem:[#allocation2 + $0xd0] sm:$0xff] }
  0x8d   :  { %v1163_v35 = vsub.f32 %v61_v0, %v94_v34  ;;  %v1165_v36 = vsub.f32 %v62_v1, %v94_v34  ;;  %v1167_v37 = vsub.f32 %v63_v2, %v94_v34  ;;  %v1169_v38 = vsub.f32 %v64_v3, %v94_v34 }
  0x8e   :  { %v1175_v41 = vsub.f32 %v65_v8, %v94_v34  ;;  %v1179_v45 = vsub.f32 %v66_v14, %v94_v34  ;;  %v964_v8 = vld [vmem:[#allocation2 + $0x68] sm:$0xff]  ;;  %v962_v14 = vld [vmem:[#allocation2 + $0x58] sm:$0xff]  ;;  %v989_v34 = vld [vmem:[#allocation2 + $0x130] sm:$0xff] }
  0x8f   :  { %v108_v39 = vmul.f32 %v1163_v35, %v1163_v35  ;;  %v109_v40 = vmul.f32 %v1165_v36, %v1165_v36  ;;  %v110_v42 = vmul.f32 %v1167_v37, %v1167_v37  ;;  %v111_v47 = vmul.f32 %v1169_v38, %v1169_v38  ;;  %632 = vmatpush.bf16.msra.mxu1 %v964_v8 }
  0x90   :  { %v112_v49 = vmul.f32 %v1175_v41, %v1175_v41  ;;  %v113_v54 = vmul.f32 %v1179_v45, %v1179_v45 }
  0x91   :  { %v120_v43 = vadd.f32 %v109_v40, %v108_v39  ;;  %v997_v39 = vld [vmem:[#allocation2 + $0x170] sm:$0xff]  ;;  %v968_v40 = vld [vmem:[#allocation2 + $0x88] sm:$0xff] }
  0x92   :  { %v86_v44 = vpop.xlane.xlu0 %85 }
  0x93   :  { %v95_v46 = vmul.f32 %v1160_v32, %v86_v44  ;;  %v121_v48 = vadd.f32 %v120_v43, %v110_v42  ;;  %633 = vmatpush.bf16.msra.mxu1 %v963_v10  ;;  %v976_v42 = vld [vmem:[#allocation2 + $0xc8] sm:$0xff] }
  0x94   :  { %v988_v43 = vld [vmem:[#allocation2 + $0x128] sm:$0xff] }
  0x95   :  { %v122_v50 = vadd.f32 %v121_v48, %v111_v47  ;;  %v1186_v51 = vsub.f32 %v67_v5, %v95_v46  ;;  %v1188_v52 = vsub.f32 %v68_v6, %v95_v46  ;;  %v1190_v53 = vsub.f32 %v69_v7, %v95_v46  ;;  %v956_v7 = vld [vmem:[#allocation2 + $0x28] sm:$0xff]  ;;  %v967_v48 = vld [vmem:[#allocation2 + $0x80] sm:$0xff] }
  0x96   :  { %v1194_v56 = vsub.f32 %v70_v11, %v95_v46  ;;  %v1200_v60 = vsub.f32 %v71_v17, %v95_v46  ;;  %v1204_v63 = vsub.f32 %v72_v20, %v95_v46  ;;  %618 = vmatpush.bf16.msra.mxu0 %v956_v7  ;;  %v974_v11 = vld [vmem:[#allocation2 + $0xb8] sm:$0xff]  ;;  %v953_v17 = vld [vmem:[#allocation2 + $0x10] sm:$0xff]  ;;  %v980_v20 = vld [vmem:[#allocation2 + $0xe8] sm:$0xff] }
  0x97   :  { %v123_v55 = vadd.f32 %v122_v50, %v112_v49  ;;  %v114_v57 = vmul.f32 %v1186_v51, %v1186_v51  ;;  %v115_v58 = vmul.f32 %v1188_v52, %v1188_v52  ;;  %v116_v61 = vmul.f32 %v1190_v53, %v1190_v53  ;;  %644 = vmatpush.bf16.msra.mxu2 %v974_v11  ;;  %v996_v44 = vld [vmem:[#allocation2 + $0x168] sm:$0xff]  ;;  %v975_v49 = vld [vmem:[#allocation2 + $0xc0] sm:$0xff] }
  0x98   :  { %v117_v0 = vmul.f32 %v1194_v56, %v1194_v56  ;;  %v118_v2 = vmul.f32 %v1200_v60, %v1200_v60  ;;  %v119_v4 = vmul.f32 %v1204_v63, %v1204_v63  ;;  %634 = vmatpush.bf16.msra.mxu1 %v962_v14  ;;  %660 = vmatpush.bf16.msra.mxu3 %v980_v20  ;;  %v987_v50 = vld [vmem:[#allocation2 + $0x120] sm:$0xff] }
  0x99   :  { %v124_v59 = vadd.f32 %v123_v55, %v113_v54  ;;  %v127_v62 = vadd.f32 %v115_v58, %v114_v57  ;;  %v995_v54 = vld [vmem:[#allocation2 + $0x160] sm:$0xff]  ;;  %v986_v57 = vld [vmem:[#allocation2 + $0x118] sm:$0xff] }
  0x9a   :  { %619 = vmatpush.bf16.msra.mxu0 %v955_v9  ;;  %v994_v58 = vld [vmem:[#allocation2 + $0x158] sm:$0xff]  ;;  %v983_v9 = vld [vmem:[#allocation2 + $0x100] sm:$0xff] }
  0x9b   :  { %125 = vadd.xlane.f32.xlu1 %v124_v59  ;;  %v128_v1 = vadd.f32 %v127_v62, %v116_v61  ;;  %645 = vmatpush.bf16.msra.mxu2 %v973_v15  ;;  %v985_v62 = vld [vmem:[#allocation2 + $0x110] sm:$0xff] }
  0x9c   :  { %635 = vmatpush.bf16.msra.mxu1 %v961_v18  ;;  %661 = vmatpush.bf16.msra.mxu3 %v979_v24 }
  0x9d   :  { %v129_v3 = vadd.f32 %v128_v1, %v117_v0  ;;  %v993_v0 = vld [vmem:[#allocation2 + $0x150] sm:$0xff] }
  0x9e   :  { %620 = vmatpush.bf16.msra.mxu0 %v954_v13  ;;  %v1217_v13 = vld [vmem:[%s1261_s2] sm:$0x3f] }
  0x9f   :  { %v130_v5 = vadd.f32 %v129_v3, %v118_v2  ;;  %646 = vmatpush.bf16.msra.mxu2 %v972_v19  ;;  %v172_v19 = vperm.slane %v1217_v13, 0  ;;  %v173_v20 = vperm.slane %v1217_v13, 1  ;;  %v175_v24 = vperm.slane %v1217_v13, 3 }
  0xa0   :  { %636 = vmatpush.bf16.msra.mxu1 %v960_v22  ;;  %662 = vmatpush.bf16.msra.mxu3 %v978_v28  ;;  %v196_v22 = vld [vmem:[%s1262_s3] sm:$0x3f] }
  0xa1   :  { %v131_v6 = vadd.f32 %v130_v5, %v119_v4  ;;  %v984_v5 = vld [vmem:[#allocation2 + $0x108] sm:$0xff] }
  0xa2   :  { %621 = vmatpush.bf16.msra.mxu0 %v953_v17  ;;  %v720_v17 = vld [vmem:[#allocation4 + $0x70] sm:$0xff] }
  0xa3   :  { %132 = vadd.xlane.f32.xlu1 %v131_v6  ;;  %647 = vmatpush.bf16.msra.mxu2 %v971_v23  ;;  %v992_v6 = vld [vmem:[#allocation2 + $0x148] sm:$0xff]  ;;  %v174_v23 = vperm.slane %v1217_v13, 2 }
  0xa4   :  { %637 = vmatpush.bf16.msra.mxu1 %v959_v26  ;;  %663 = vmatpush.bf16.msra.mxu3 %v977_v33  ;;  %v199_v33 = vperm.slane %v196_v22, 1 }
  0xa6   :  { %622 = vmatpush.bf16.msra.mxu0 %v952_v21 }
  0xa7   :  { %648 = vmatpush.bf16.msra.mxu2 %v970_v27 }
  0xa8   :  { %686 = vmatpush.bf16.msrb.mxu1 %v998_v30  ;;  %664 = vmatpush.bf16.msra.mxu3 %v976_v42 }
  0xaa   :  { %623 = vmatpush.bf16.msra.mxu0 %v951_v25  ;;  %v719_v25 = vld [vmem:[#allocation4 + $0x68] sm:$0xff] }
  0xab   :  { %649 = vmatpush.bf16.msra.mxu2 %v969_v31 }
  0xac   :  { %687 = vmatpush.bf16.msrb.mxu1 %v997_v39  ;;  %665 = vmatpush.bf16.msra.mxu3 %v975_v49  ;;  %v201_v39 = vperm.slane %v196_v22, 3 }
  0xae   :  { %672 = vmatpush.bf16.msrb.mxu0 %v990_v29 }
  0xaf   :  { %650 = vmatpush.bf16.msra.mxu2 %v968_v40 }
  0xb0   :  { %688 = vmatpush.bf16.msrb.mxu1 %v996_v44 }
  0xb2   :  { %673 = vmatpush.bf16.msrb.mxu0 %v989_v34  ;;  %v200_v34 = vperm.slane %v196_v22, 2 }
  0xb3   :  { %651 = vmatpush.bf16.msra.mxu2 %v967_v48 }
  0xb4   :  { %689 = vmatpush.bf16.msrb.mxu1 %v995_v54 }
  0xb6   :  { %674 = vmatpush.bf16.msrb.mxu0 %v988_v43 }
  0xb7   :  { %726 = vmatpush.msrb.mxu2 %v721_v16 }
  0xb8   :  { %690 = vmatpush.bf16.msrb.mxu1 %v994_v58 }
  0xb9   :  { %727 = vmatpush.msrb.mxu2 %v720_v17 }
  0xba   :  { %675 = vmatpush.bf16.msrb.mxu0 %v987_v50 }
  0xbb   :  { %728 = vmatpush.msrb.mxu2 %v719_v25  ;;  %v707_v25 = vld [vmem:[#allocation4 + $0x8] sm:$0xff] }
  0xbc   :  { %691 = vmatpush.bf16.msrb.mxu1 %v993_v0 }
  0xbe   :  { %676 = vmatpush.bf16.msrb.mxu0 %v986_v57 }
  0xc0   :  { %692 = vmatpush.bf16.msrb.mxu1 %v992_v6  ;;  %v177_v6 = vperm.slane %v1217_v13, 5 }
  0xc2   :  { %677 = vmatpush.bf16.msrb.mxu0 %v985_v62 }
  0xc6   :  { %678 = vmatpush.bf16.msrb.mxu0 %v984_v5 }
  0xca   :  { %679 = vmatpush.bf16.msrb.mxu0 %v983_v9 }
 0x10e   :  { %v126_v46 = vpop.xlane.xlu1 %125 }
 0x10f   :  { %v134_v47 = vmul.f32 %v126_v46, %v1160_v32 }
 0x111   :  { %v136_v55 = vadd.f32 1e-05, %v134_v47 }
 0x113   :  { %1010 = vrsqrt.f32 %v136_v55  ;;  %vm144_vm2 = vweird.f32 %v136_v55 }
 0x116   :  { %v133_v59 = vpop.xlane.xlu1 %132 }
 0x117   :  { %v135_v61 = vmul.f32 %v133_v59, %v1160_v32  ;;  %v991_v32 = vld [vmem:[#allocation2 + $0x140] sm:$0xff] }
 0x118   :  { %693 = vmatpush.bf16.msrb.mxu1 %v991_v32  ;;  %v202_v32 = vperm.slane %v196_v22, 4 }
 0x119   :  { %v1011_v1 = vpop.eup %1010  ;;  %v137_v2 = vadd.f32 1e-05, %v135_v61 }
 0x11a   :  { %v139_v3 = vmul.f32 %v1011_v1, %v136_v55  ;;  %vm145_vm1 = vweird.f32 %v1011_v1 }
 0x11b   :  { %1012 = vrsqrt.f32 %v137_v2  ;;  %vm146_vm3 = vmor %vm144_vm2, %vm145_vm1  ;;  %vm154_vm5 = vweird.f32 %v137_v2 }
 0x11c   :  { %v140_v4 = vmul.f32 %v1011_v1, %v139_v3 }
 0x11e   :  { %v141_v7 = vmul.f32 0.5, %v140_v4  ;;  %v176_v4 = vperm.slane %v1217_v13, 4  ;;  %v715_v13 = vld [vmem:[#allocation4 + $0x48] sm:$0xff] }
 0x120   :  { %v142_v8 = vsub.f32 1.5, %v141_v7 }
 0x121   :  { %v1013_v10 = vpop.eup %1012 }
 0x122   :  { %v143_v11 = vmul.f32 %v1011_v1, %v142_v8  ;;  %v149_v12 = vmul.f32 %v1013_v10, %v137_v2  ;;  %vm155_vm4 = vweird.f32 %v1013_v10 }
 0x123   :  { %vm156_vm6 = vmor %vm154_vm5, %vm155_vm4 }
 0x124   :  { %v147_v14 = vsel %vm146_vm3, %v1011_v1, %v143_v11  ;;  %v150_v15 = vmul.f32 %v1013_v10, %v149_v12  ;;  %v203_v11 = vperm.slane %v196_v22, 5 }
 0x125   :  { %v158_v21 = vmul.f32 %v147_v14, %v1163_v35  ;;  %v159_v27 = vmul.f32 %v147_v14, %v1165_v36  ;;  %v160_v28 = vmul.f32 %v147_v14, %v1167_v37  ;;  %v161_v29 = vmul.f32 %v147_v14, %v1169_v38 }
 0x126   :  { %v151_v18 = vmul.f32 0.5, %v150_v15  ;;  %v198_v35 = vperm.slane %v196_v22, 0  ;;  %v162_v3 = vmul.f32 %v147_v14, %v1175_v41  ;;  %v163_v5 = vmul.f32 %v147_v14, %v1179_v45  ;;  %v718_v41 = vld [vmem:[#allocation4 + $0x60] sm:$0xff]  ;;  %v716_v45 = vld [vmem:[#allocation4 + $0x50] sm:$0xff] }
 0x127   :  { %v184_v31 = vmul.f32 %v172_v19, %v158_v21  ;;  %v185_v42 = vmul.f32 %v173_v20, %v159_v27  ;;  %v186_v43 = vmul.f32 %v174_v23, %v160_v28  ;;  %v187_v44 = vmul.f32 %v175_v24, %v161_v29  ;;  %729 = vmatpush.msrb.mxu2 %v718_v41  ;;  %v714_v14 = vld [vmem:[#allocation4 + $0x40] sm:$0xff]  ;;  %v711_v21 = vld [vmem:[#allocation4 + $0x28] sm:$0xff] }
 0x128   :  { %v152_v26 = vsub.f32 1.5, %v151_v18  ;;  %v188_v9 = vmul.f32 %v176_v4, %v162_v3  ;;  %v717_v18 = vld [vmem:[#allocation4 + $0x58] sm:$0xff]  ;;  %v710_v22 = vld [vmem:[#allocation4 + $0x20] sm:$0xff] }
 0x129   :  { %v210_v54 = vadd.f32 %v198_v35, %v184_v31  ;;  %v211_v55 = vadd.f32 %v199_v33, %v185_v42  ;;  %v212_v57 = vadd.f32 %v200_v34, %v186_v43  ;;  %v213_v58 = vadd.f32 %v201_v39, %v187_v44  ;;  %730 = vmatpush.msrb.mxu2 %v717_v18  ;;  %v1006_v29 = vld [vmem:[%s1264_s5] ss:$0 sm:$0xff] }
 0x12a   :  { %v153_v30 = vmul.f32 %v1013_v10, %v152_v26  ;;  %v214_v16 = vadd.f32 %v202_v32, %v188_v9  ;;  %v706_v26 = vld [vmem:[#allocation4] sm:$0xff] }
 0x12b   :  { %731 = vmatpush.msrb.mxu2 %v716_v45 }
 0x12c   :  { %v157_v40 = vsel %vm156_vm6, %v1013_v10, %v153_v30  ;;  %v189_v10 = vmul.f32 %v177_v6, %v163_v5 }
 0x12d   :  { %v164_v36 = vmul.f32 %v157_v40, %v1186_v51  ;;  %v165_v37 = vmul.f32 %v157_v40, %v1188_v52  ;;  %v166_v38 = vmul.f32 %v157_v40, %v1190_v53  ;;  %v167_v46 = vmul.f32 %v157_v40, %v1194_v56  ;;  %732 = vmatpush.msrb.mxu2 %v715_v13 }
 0x12e   :  { %v168_v53 = vmul.f32 %v157_v40, %v1200_v60  ;;  %v169_v56 = vmul.f32 %v157_v40, %v1204_v63  ;;  %v215_v60 = vadd.f32 %v203_v11, %v189_v10 }
 0x12f   :  { %v190_v47 = vmul.f32 %v172_v19, %v164_v36  ;;  %v191_v48 = vmul.f32 %v173_v20, %v165_v37  ;;  %v192_v49 = vmul.f32 %v174_v23, %v166_v38  ;;  %v193_v50 = vmul.f32 %v175_v24, %v167_v46  ;;  %733 = vmatpush.msrb.mxu2 %v714_v14  ;;  %v713_v19 = vld [vmem:[#allocation4 + $0x38] sm:$0xff]  ;;  %v712_v20 = vld [vmem:[#allocation4 + $0x30] sm:$0xff] }
 0x130   :  { %v194_v7 = vmul.f32 %v176_v4, %v168_v53  ;;  %v195_v8 = vmul.f32 %v177_v6, %v169_v56  ;;  %v709_v23 = vld [vmem:[#allocation4 + $0x18] sm:$0xff]  ;;  %v708_v24 = vld [vmem:[#allocation4 + $0x10] sm:$0xff] }
 0x131   :  { %v216_v59 = vadd.f32 %v198_v35, %v190_v47  ;;  %v217_v61 = vadd.f32 %v199_v33, %v191_v48  ;;  %v218_v62 = vadd.f32 %v200_v34, %v192_v49  ;;  %v219_v0 = vadd.f32 %v201_v39, %v193_v50  ;;  %734 = vmatpush.msrb.mxu2 %v713_v19  ;;  %v702_v49 = vld [vmem:[%s1260_s1] sm:$0xff] }
 0x132   :  { %v220_v12 = vadd.f32 %v202_v32, %v194_v7  ;;  %v221_v15 = vadd.f32 %v203_v11, %v195_v8 }
 0x133   :  { %v222_v1 = vpack.c.bf16 %v216_v59, %v210_v54  ;;  %v223_v51 = vpack.c.bf16 %v217_v61, %v211_v55  ;;  %v224_v2 = vpack.c.bf16 %v218_v62, %v212_v57  ;;  %v225_v52 = vpack.c.bf16 %v219_v0, %v213_v58  ;;  %735 = vmatpush.msrb.mxu2 %v712_v20  ;;  %v703_v0 = vld [vmem:[%s1260_s1 + $0x8] sm:$0xff] }
 0x134   :  { %v226_v17 = vpack.c.bf16 %v220_v12, %v214_v16  ;;  %v227_v63 = vpack.c.bf16 %v221_v15, %v215_v60 }
 0x135   :  { %624 = vmatmul.bf16.vlgmr.msra.gmra.mxu0 %v222_v1  ;;  %638 = vmatmul.bf16.vlgmr.msra.gmra.mxu1 %v223_v51 }
 0x136   :  { %652 = vmatmul.bf16.vlgmr.msra.gmra.mxu2 %v224_v2  ;;  %666 = vmatmul.bf16.vlgmr.msra.gmra.mxu3 %v225_v52  ;;  %v1007_v2 = vld [vmem:[%s1266_s7] ss:$0 sm:$0xff] }
 0x137   :  { %736 = vmatpush.msrb.mxu2 %v711_v21 }
 0x139   :  { %737 = vmatpush.msrb.mxu2 %v710_v22 }
 0x13b   :  { %738 = vmatpush.msrb.mxu2 %v709_v23 }
 0x13d   :  { %739 = vmatpush.msrb.mxu2 %v708_v24 }
 0x13f   :  { %740 = vmatpush.msrb.mxu2 %v707_v25 }
 0x141   :  { %741 = vmatpush.msrb.mxu2 %v706_v26 }
 0x145   :  { %680 = vmatmul.bf16.vlgmr.msrb.gmra.mxu0 %v226_v17  ;;  %694 = vmatmul.bf16.vlgmr.msrb.gmra.mxu1 %v227_v63 }
 0x1b2   :  { %v625_v27 = vpop.f32.mrf.mxu0  ;;  %v639_v28 = vpop.f32.mrf.mxu1 }
 0x1b3   :  { %v626_v30 = vadd.f32 %v1006_v29, %v625_v27 }
 0x1b5   :  { %v640_v34 = vadd.f32 %v639_v28, %v626_v30 }
 0x1b9   :  { %v653_v35 = vpop.f32.mrf.mxu2  ;;  %v667_v40 = vpop.f32.mrf.mxu3 }
 0x1ba   :  { %v627_v31 = vpop.f32.mrf.mxu0  ;;  %v641_v33 = vpop.f32.mrf.mxu1  ;;  %v654_v39 = vadd.f32 %v653_v35, %v640_v34 }
 0x1bb   :  { %v628_v42 = vadd.f32 %v1006_v29, %v627_v31 }
 0x1bc   :  { %v668_v43 = vadd.f32 %v667_v40, %v654_v39 }
 0x1bd   :  { %v642_v38 = vadd.f32 %v641_v33, %v628_v42 }
 0x1c1   :  { %v655_v44 = vpop.f32.mrf.mxu2  ;;  %v669_v54 = vpop.f32.mrf.mxu3 }
 0x1c2   :  { %v681_v36 = vpop.f32.mrf.mxu0  ;;  %v695_v37 = vpop.f32.mrf.mxu1  ;;  %v656_v47 = vadd.f32 %v655_v44, %v642_v38 }
 0x1c3   :  { %v682_v46 = vadd.f32 %v681_v36, %v668_v43 }
 0x1c4   :  { %v670_v55 = vadd.f32 %v669_v54, %v656_v47 }
 0x1c5   :  { %v696_v48 = vadd.f32 %v695_v37, %v682_v46 }
 0x1c7   :  { %v700_v50 = vmax.f32 %v696_v48, 0.0 }
 0x1c9   :  { %v704_v57 = vadd.f32 %v702_v49, %v700_v50 }
 0x1ca   :  { %v683_v58 = vpop.f32.mrf.mxu0  ;;  %v697_v61 = vpop.f32.mrf.mxu1 }
 0x1cb   :  { %v684_v59 = vadd.f32 %v683_v58, %v670_v55  ;;  %742 = vmatmul.f32.vlgmr.msrb.gmra.mxu2 %v704_v57 }
 0x1cd   :  { %v698_v62 = vadd.f32 %v697_v61, %v684_v59 }
 0x1cf   :  { %v701_v1 = vmax.f32 %v698_v62, 0.0 }
 0x1d1   :  { %v705_v51 = vadd.f32 %v703_v0, %v701_v1 }
 0x1d3   :  { %745 = vmatmul.f32.gmra.mxu2 %v705_v51 }
 0x24e   :  { %v743_v52 = vpop.f32.mrf.mxu2 }
 0x24f   :  { %v744_v53 = vadd.f32 %v1007_v2, %v743_v52 }
 0x251   :  { %v749_v56 = vmax.f32 %v744_v53, 0.0 }
 0x253   :  { %751 = vst [vmem:[%s1267_s8] sm:$0xff] %v749_v56 }
 0x256   :  { %v746_v3 = vpop.f32.mrf.mxu2 }
 0x257   :  { %v747_v4 = vadd.f32 %v1007_v2, %v746_v3 }
 0x259   :  { %v750_v5 = vmax.f32 %v747_v4, 0.0 }
 0x25b   :  { %752 = vst [vmem:[%s1267_s8 + $0x8] sm:$0xff] %v750_v5 }
 0x25c   :  { %757 = vsyncpa [#allocation3], 1 }
 0x25d   :  { %758 = vsyncpa [#allocation5], 1 }

// kernel: diffusionvg_forward.7
= control target key start
LH: loop header
LB: loop body
LE: loop exit
PB: predicated region body
PF: predicated region fallthrough
CT: control target
= control target key end

     0   :  { %v1498_v0 = vmov 2.0   ;;  %v1500_v19 = vmov 0   ;;  %s1501_s28 = smov 1   ;;  %s2402_s1 = inlined_call_operand.vmem [shape: f32[10,2], index: 1, kind: input, shape index: {}]   ;;  %s2403_s3 = inlined_call_operand.vmem [shape: f32[2,128], index: 3, kind: input, shape index: {}]   ;;  %s2404_s6 = inlined_call_operand.vmem [shape: f32[128,128], index: 6, kind: input, shape index: {}]   ;;  %s2405_s4 = inlined_call_operand.vmem [shape: f32[1,128], index: 4, kind: input, shape index: {}]   ;;  %s2406_s7 = inlined_call_operand.vmem [shape: f32[1,128], index: 7, kind: input, shape index: {}]   ;;  %s2407_s8 = inlined_call_operand.vmem [shape: f32[128,128], index: 8, kind: input, shape index: {}]   ;;  %s2408_s5 = inlined_call_operand.vmem [shape: f32[1,128], index: 5, kind: input, shape index: {}]   ;;  %s2409_s0 = inlined_call_operand.vmem [shape: f32[10,128], index: 0, kind: input, shape index: {}]   ;;  %s2410_s9 = inlined_call_operand.vmem [shape: f32[1,128], index: 9, kind: input, shape index: {}]   ;;  %s2411_s10 = inlined_call_operand.vmem [shape: f32[128,2], index: 10, kind: input, shape index: {}]   ;;  %s2412_s11 = inlined_call_operand.vmem [shape: f32[1,2], index: 11, kind: input, shape index: {}]   ;;  %s2413_s2 = inlined_call_operand.vmem [shape: f32[5,10,2], index: 2, kind: input, shape index: {}]   ;;  %s2414_s12 = inlined_call_operand.vmem [shape: f32[10,2], index: 12, kind: output, shape index: {}]  }
   0x1   :  { %1431 = vrcp.f32 %v1498_v0  ;;  %v1570_v3 = vld [vmem:[%s2402_s1] sm:$0xff]  ;;  %v1575_v4 = vld [vmem:[%s2402_s1 + $0x8] sm:$0x3]  ;;  %s1499_s1 = smov 127   ;;  %1422 = vset.pattern.permute.xlu1 %v1500_v19  ;;  %1423 = vset.pattern.permute.xlu2 %v1500_v19  ;;  %v1588_v20 = vld [vmem:[%s2404_s6 + $0x78] sm:$0xff] }
   0x2   :  { %v1336_v7 = vclamps-f32 %v1570_v3, 2.0  ;;  %v1337_v8 = vclamps-f32 %v1575_v4, 2.0  ;;  %1424 = vset.pattern.permute.xlu0 %v1500_v19  ;;  %v1593_v21 = vld [vmem:[%s2404_s6 + $0x70] sm:$0xff]  ;;  %141 = vmatpush.msra.mxu0 %v1588_v20  ;;  %v1600_v22 = vld [vmem:[%s2404_s6 + $0x68] sm:$0xff]  ;;  %v1607_v23 = vld [vmem:[%s2404_s6 + $0x60] sm:$0xff] }
   0x3   :  { %432 = vmatpush.msra.mxu3 %v1588_v20  ;;  %v1614_v24 = vld [vmem:[%s2404_s6 + $0x58] sm:$0xff]  ;;  %v1621_v25 = vld [vmem:[%s2404_s6 + $0x50] sm:$0xff]  ;;  %v1628_v26 = vld [vmem:[%s2404_s6 + $0x48] sm:$0xff] }
   0x4   :  { %142 = vmatpush.msra.mxu0 %v1593_v21  ;;  %v1637_v33 = vld [vmem:[%s2404_s6 + $0x40] sm:$0xff]  ;;  %v1642_v34 = vld [vmem:[%s2404_s6 + $0x38] sm:$0xff]  ;;  %v1649_v35 = vld [vmem:[%s2404_s6 + $0x30] sm:$0xff] }
   0x5   :  { %433 = vmatpush.msra.mxu3 %v1593_v21  ;;  %v1656_v36 = vld [vmem:[%s2404_s6 + $0x28] sm:$0xff]  ;;  %v1665_v37 = vld [vmem:[%s2404_s6 + $0x20] sm:$0xff]  ;;  %v1672_v38 = vld [vmem:[%s2404_s6 + $0x18] sm:$0xff] }
   0x6   :  { %143 = vmatpush.msra.mxu0 %v1600_v22  ;;  %v1679_v39 = vld [vmem:[%s2404_s6 + $0x10] sm:$0xff]  ;;  %v1684_v40 = vld [vmem:[%s2404_s6 + $0x8] sm:$0xff]  ;;  %v1691_v41 = vld [vmem:[%s2404_s6] sm:$0xff] }
   0x7   :  { %v1432_v1 = vpop.eup %1431  ;;  %434 = vmatpush.msra.mxu3 %v1600_v22  ;;  %2437 = vst [vmem:[#allocation2_spill] sm:$0xff] %v1684_v40  ;;  %v1700_v43 = vld [vmem:[%s2407_s8 + $0x78] sm:$0xff]  ;;  %v1705_v44 = vld [vmem:[%s2407_s8 + $0x70] sm:$0xff]  ;;  %v1712_v45 = vld [vmem:[%s2407_s8 + $0x68] sm:$0xff] }
   0x8   :  { %v50_v2 = vmul.f32 2.0, %v1432_v1  ;;  %vm54_vm0 = vweird.f32 %v1432_v1  ;;  %144 = vmatpush.msra.mxu0 %v1607_v23  ;;  %2438 = vst [vmem:[#allocation3_spill] sm:$0xff] %v1691_v41  ;;  %186 = vmatpush.msra.mxu1 %v1700_v43  ;;  %v1720_v46 = vld [vmem:[%s2407_s8 + $0x60] sm:$0xff]  ;;  %v1728_v48 = vld [vmem:[%s2407_s8 + $0x58] sm:$0xff]  ;;  %v1736_v49 = vld [vmem:[%s2407_s8 + $0x50] sm:$0xff] }
   0x9   :  { %435 = vmatpush.msra.mxu3 %v1607_v23  ;;  %2439 = vst [vmem:[#allocation4_spill] sm:$0xff] %v1700_v43  ;;  %v1744_v51 = vld [vmem:[%s2403_s3] ss:$0 sm:$0xff]  ;;  %v1749_v52 = vld [vmem:[%s2403_s3 + $0x1] ss:$0 sm:$0xff]  ;;  %v1754_v53 = vld [vmem:[%s2407_s8 + $0x48] sm:$0xff] }
   0xa   :  { %v51_v5 = vsub.f32 1.0, %v50_v2  ;;  %145 = vmatpush.msra.mxu0 %v1614_v24  ;;  %2440 = vst [vmem:[#allocation5_spill] sm:$0xff] %v1705_v44  ;;  %187 = vmatpush.msra.mxu1 %v1705_v44  ;;  %v1760_v54 = vld [vmem:[%s2408_s5] sm:$0x1]  ;;  %v1785_v63 = vld [vmem:[%s2407_s8 + $0x38] sm:$0xff]  ;;  %v1793_v2 = vld [vmem:[%s2407_s8 + $0x30] sm:$0xff] }
   0xb   :  { %436 = vmatpush.msra.mxu3 %v1614_v24  ;;  %2441 = vst [vmem:[#allocation6_spill] sm:$0xff] %v1712_v45  ;;  %v1769_v57 = vld [vmem:[%s2407_s8 + $0x40] sm:$0xff]  ;;  %v115_v62 = vmul.f32 0.999, %v1760_v54  ;;  %v1850_v19 = vld [vmem:[%s2407_s8 + $0x8] sm:$0xff] }
   0xc   :  { %v52_v6 = vmul.f32 %v1432_v1, %v51_v5  ;;  %146 = vmatpush.msra.mxu0 %v1621_v25  ;;  %2442 = vst [vmem:[#allocation7_spill] sm:$0xff] %v1720_v46  ;;  %188 = vmatpush.msra.mxu1 %v1712_v45  ;;  %v1778_v60 = vld [vmem:[%s2405_s4] ss:$0 sm:$0xff] }
   0xd   :  { %437 = vmatpush.msra.mxu3 %v1621_v25  ;;  %2443 = vst [vmem:[#allocation8_spill] sm:$0xff] %v1728_v48  ;;  %v1799_v5 = vld [vmem:[%s2409_s0] sm:$0xff] }
   0xe   :  { %v53_v9 = vadd.f32 %v1432_v1, %v52_v6  ;;  %147 = vmatpush.msra.mxu0 %v1628_v26  ;;  %189 = vmatpush.msra.mxu1 %v1720_v46  ;;  %2444 = vst [vmem:[#allocation9_spill] sm:$0xff] %v1736_v49 }
   0xf   :  { %438 = vmatpush.msra.mxu3 %v1628_v26  ;;  %2445 = vst [vmem:[#allocation10_spill] sm:$0xff] %v1754_v53 }
  0x10   :  { %v1579_v10 = vsel %vm54_vm0, %v1432_v1, %v53_v9  ;;  %148 = vmatpush.msra.mxu0 %v1637_v33  ;;  %190 = vmatpush.msra.mxu1 %v1728_v48  ;;  %2446 = vst [vmem:[#allocation11_spill] sm:$0xff] %v1769_v57 }
  0x11   :  { %v56_v11 = vmul.f32 %v1336_v7, %v1579_v10  ;;  %v57_v12 = vmul.f32 %v1337_v8, %v1579_v10  ;;  %439 = vmatpush.msra.mxu3 %v1637_v33  ;;  %2447 = vst [vmem:[#allocation12_spill] sm:$0xff] %v1785_v63  ;;  %v117_v7 = vperm.slane %v115_v62, 0  ;;  %v1807_v8 = vld [vmem:[%s2407_s8 + $0x28] sm:$0xff] }
  0x12   :  { %149 = vmatpush.msra.mxu0 %v1642_v34  ;;  %191 = vmatpush.msra.mxu1 %v1736_v49  ;;  %2448 = vst [vmem:[#allocation13_spill] sm:$0xff] %v1793_v2 }
  0x13   :  { %v58_v13 = vadd.f32 1.0, %v56_v11  ;;  %v59_v15 = vadd.f32 1.0, %v57_v12  ;;  %440 = vmatpush.msra.mxu3 %v1642_v34  ;;  %2449 = vst [vmem:[#allocation14_spill] sm:$0xff] %v1807_v8  ;;  %v1817_v12 = vld [vmem:[%s2407_s8 + $0x20] sm:$0xff] }
  0x14   :  { %150 = vmatpush.msra.mxu0 %v1649_v35  ;;  %192 = vmatpush.msra.mxu1 %v1754_v53  ;;  %2450 = vst [vmem:[#allocation15_spill] sm:$0xff] %v1817_v12 }
  0x15   :  { %v60_v14 = vmul.f32 0.5, %v58_v13  ;;  %v61_v17 = vmul.f32 0.5, %v59_v15  ;;  %441 = vmatpush.msra.mxu3 %v1649_v35  ;;  %v1823_v13 = vld [vmem:[%s2409_s0 + $0x8] sm:$0x3]  ;;  %v1830_v15 = vld [vmem:[%s2407_s8 + $0x18] sm:$0xff]  ;;  %2453 = vst [vmem:[#allocation18_spill] sm:$0xff] %v1850_v19 }
  0x16   :  { %151 = vmatpush.msra.mxu0 %v1656_v36  ;;  %193 = vmatpush.msra.mxu1 %v1769_v57  ;;  %2451 = vst [vmem:[#allocation16_spill] sm:$0xff] %v1830_v15 }
  0x17   :  { %v62_v16 = vmul.f32 0.5, %v60_v14  ;;  %v63_v18 = vmul.f32 0.5, %v61_v17  ;;  %442 = vmatpush.msra.mxu3 %v1656_v36 }
  0x18   :  { %152 = vmatpush.msra.mxu0 %v1665_v37  ;;  %194 = vmatpush.msra.mxu1 %v1785_v63 }
  0x19   :  { %66 = vrot.lane.b32.xlu0 %v62_v16, %s1499_s1  ;;  %443 = vmatpush.msra.mxu3 %v1665_v37 }
  0x1a   :  { %153 = vmatpush.msra.mxu0 %v1672_v38  ;;  %195 = vmatpush.msra.mxu1 %v1793_v2 }
  0x1b   :  { %444 = vmatpush.msra.mxu3 %v1672_v38 }
  0x1c   :  { %154 = vmatpush.msra.mxu0 %v1679_v39  ;;  %196 = vmatpush.msra.mxu1 %v1807_v8 }
  0x1d   :  { %445 = vmatpush.msra.mxu3 %v1679_v39 }
  0x1e   :  { %155 = vmatpush.msra.mxu0 %v1684_v40  ;;  %197 = vmatpush.msra.mxu1 %v1817_v12 }
  0x1f   :  { %446 = vmatpush.msra.mxu3 %v1684_v40 }
  0x20   :  { %156 = vmatpush.msra.mxu0 %v1691_v41  ;;  %198 = vmatpush.msra.mxu1 %v1830_v15 }
  0x21   :  { %68 = vrot.lane.b32.xlu0 %v63_v18, %s1499_s1  ;;  %447 = vmatpush.msra.mxu3 %v1691_v41  ;;  %v1843_v18 = vld [vmem:[%s2407_s8 + $0x10] sm:$0xff] }
  0x22   :  { %457 = vmatpush.msrb.mxu0 %v1700_v43  ;;  %2452 = vst [vmem:[#allocation17_spill] sm:$0xff] %v1843_v18  ;;  %199 = vmatpush.msra.mxu1 %v1843_v18 }
  0x23   :  { %711 = vmatpush.msrb.mxu3 %v1700_v43 }
  0x24   :  { %458 = vmatpush.msrb.mxu0 %v1705_v44  ;;  %200 = vmatpush.msra.mxu1 %v1850_v19 }
  0x25   :  { %712 = vmatpush.msrb.mxu3 %v1705_v44 }
  0x26   :  { %459 = vmatpush.msrb.mxu0 %v1712_v45 }
  0x27   :  { %713 = vmatpush.msrb.mxu3 %v1712_v45 }
  0x28   :  { %460 = vmatpush.msrb.mxu0 %v1720_v46 }
  0x29   :  { %714 = vmatpush.msrb.mxu3 %v1720_v46 }
  0x2a   :  { %461 = vmatpush.msrb.mxu0 %v1728_v48 }
  0x2b   :  { %715 = vmatpush.msrb.mxu3 %v1728_v48 }
  0x2c   :  { %462 = vmatpush.msrb.mxu0 %v1736_v49 }
  0x2d   :  { %716 = vmatpush.msrb.mxu3 %v1736_v49 }
  0x2e   :  { %463 = vmatpush.msrb.mxu0 %v1754_v53 }
  0x2f   :  { %717 = vmatpush.msrb.mxu3 %v1754_v53 }
  0x30   :  { %464 = vmatpush.msrb.mxu0 %v1769_v57 }
  0x31   :  { %718 = vmatpush.msrb.mxu3 %v1769_v57 }
  0x32   :  { %465 = vmatpush.msrb.mxu0 %v1785_v63 }
  0x33   :  { %719 = vmatpush.msrb.mxu3 %v1785_v63 }
  0x34   :  { %466 = vmatpush.msrb.mxu0 %v1793_v2 }
  0x35   :  { %720 = vmatpush.msrb.mxu3 %v1793_v2 }
  0x36   :  { %467 = vmatpush.msrb.mxu0 %v1807_v8 }
  0x37   :  { %721 = vmatpush.msrb.mxu3 %v1807_v8 }
  0x38   :  { %468 = vmatpush.msrb.mxu0 %v1817_v12 }
  0x39   :  { %722 = vmatpush.msrb.mxu3 %v1817_v12 }
  0x3a   :  { %469 = vmatpush.msrb.mxu0 %v1830_v15 }
  0x3b   :  { %723 = vmatpush.msrb.mxu3 %v1830_v15 }
  0x3c   :  { %470 = vmatpush.msrb.mxu0 %v1843_v18 }
  0x3d   :  { %724 = vmatpush.msrb.mxu3 %v1843_v18 }
  0x3e   :  { %471 = vmatpush.msrb.mxu0 %v1850_v19 }
  0x3f   :  { %725 = vmatpush.msrb.mxu3 %v1850_v19 }
  0x8b   :  { %v67_v27 = vpop.permute.xlu0 %66 }
  0x8c   :  { %v72_v28 = vsub.f32 %v60_v14, %v67_v27  ;;  %v74_v30 = vadd.f32 %v67_v27, %v60_v14  ;;  %v1858_v27 = vld [vmem:[%s2407_s8] sm:$0xff] }
  0x8d   :  { %2454 = vst [vmem:[#allocation19_spill] sm:$0xff] %v1858_v27  ;;  %201 = vmatpush.msra.mxu1 %v1858_v27  ;;  %472 = vmatpush.msrb.mxu0 %v1858_v27 }
  0x8e   :  { %79 = vperm.xlu1 %1422, %v72_v28   ;;  %726 = vmatpush.msrb.mxu3 %v1858_v27  ;;  %v1867_v28 = vld [vmem:[%s2411_s10 + $0x78] sm:$0xff] }
  0x8f   :  { %231 = vmatpush.msra.mxu2 %v1867_v28  ;;  %482 = vmatpush.msrb.mxu1 %v1867_v28 }
  0x93   :  { %v69_v29 = vpop.permute.xlu0 %68 }
  0x94   :  { %v73_v31 = vsub.f32 %v61_v17, %v69_v29  ;;  %v75_v32 = vadd.f32 %v69_v29, %v61_v17  ;;  %v1872_v29 = vld [vmem:[%s2411_s10 + $0x70] sm:$0xff] }
  0x95   :  { %232 = vmatpush.msra.mxu2 %v1872_v29  ;;  %483 = vmatpush.msrb.mxu1 %v1872_v29 }
  0x96   :  { %93 = vperm.xlu1 %1422, %v74_v30   ;;  %84 = vperm.xlu2 %1423, %v73_v31   ;;  %v1879_v30 = vld [vmem:[%s2411_s10 + $0x68] sm:$0xff]  ;;  %v1887_v31 = vld [vmem:[%s2411_s10 + $0x60] sm:$0xff] }
  0x97   :  { %233 = vmatpush.msra.mxu2 %v1879_v30  ;;  %484 = vmatpush.msrb.mxu1 %v1879_v30 }
  0x99   :  { %234 = vmatpush.msra.mxu2 %v1887_v31  ;;  %485 = vmatpush.msrb.mxu1 %v1887_v31 }
  0x9e   :  { %98 = vperm.xlu2 %1423, %v75_v32   ;;  %v1895_v32 = vld [vmem:[%s2411_s10 + $0x58] sm:$0xff] }
  0x9f   :  { %235 = vmatpush.msra.mxu2 %v1895_v32  ;;  %486 = vmatpush.msrb.mxu1 %v1895_v32 }
  0xf0   :  { %v85_v42 = vpop.permute.xlu2 %84 }
  0xf1   :  { %v89_v55 = vmul.f32 %v1744_v51, %v85_v42  ;;  %v1903_v42 = vld [vmem:[%s2411_s10 + $0x50] sm:$0xff] }
  0xf2   :  { %236 = vmatpush.msra.mxu2 %v1903_v42  ;;  %487 = vmatpush.msrb.mxu1 %v1903_v42 }
  0xf8   :  { %v99_v50 = vpop.permute.xlu2 %98 }
  0xf9   :  { %v103_v56 = vmul.f32 %v1749_v52, %v99_v50  ;;  %v1919_v50 = vld [vmem:[%s2411_s10 + $0x40] sm:$0xff] }
  0xfb   :  { %v105_v1 = vadd.f32 %v103_v56, %v89_v55  ;;  %v1927_v55 = vld [vmem:[%s2411_s10 + $0x38] sm:$0xff]  ;;  %v1935_v56 = vld [vmem:[%s2406_s7] ss:$0 sm:$0xff] }
  0xfd   :  { %v111_v9 = vadd.f32 %v1778_v60, %v105_v1 }
  0xff   :  { %v113_v16 = vadd.f32 %v111_v9, %v1823_v13 }
 0x100   :  { %v80_v47 = vpop.permute.xlu1 %79 }
 0x101   :  { %v88_v59 = vmul.f32 %v1744_v51, %v80_v47  ;;  %v120_v17 = vadd.f32 %v117_v7, %v113_v16  ;;  %v1911_v47 = vld [vmem:[%s2411_s10 + $0x48] sm:$0xff] }
 0x102   :  { %237 = vmatpush.msra.mxu2 %v1911_v47  ;;  %488 = vmatpush.msrb.mxu1 %v1911_v47  ;;  %v1985_v16 = vld [vmem:[%s2411_s10 + $0x8] sm:$0xff] }
 0x104   :  { %238 = vmatpush.msra.mxu2 %v1919_v50  ;;  %489 = vmatpush.msrb.mxu1 %v1919_v50 }
 0x106   :  { %239 = vmatpush.msra.mxu2 %v1927_v55  ;;  %490 = vmatpush.msrb.mxu1 %v1927_v55 }
 0x108   :  { %v94_v58 = vpop.permute.xlu1 %93 }
 0x109   :  { %v102_v61 = vmul.f32 %v1749_v52, %v94_v58  ;;  %v1940_v58 = vld [vmem:[%s2411_s10 + $0x30] sm:$0xff] }
 0x10a   :  { %240 = vmatpush.msra.mxu2 %v1940_v58  ;;  %491 = vmatpush.msrb.mxu1 %v1940_v58 }
 0x10b   :  { %v104_v0 = vadd.f32 %v102_v61, %v88_v59  ;;  %v1948_v59 = vld [vmem:[%s2411_s10 + $0x28] sm:$0xff] }
 0x10c   :  { %241 = vmatpush.msra.mxu2 %v1948_v59  ;;  %492 = vmatpush.msrb.mxu1 %v1948_v59 }
 0x10d   :  { %v110_v6 = vadd.f32 %v1778_v60, %v104_v0  ;;  %v1957_v0 = vld [vmem:[%s2411_s10 + $0x20] sm:$0xff] }
 0x10e   :  { %242 = vmatpush.msra.mxu2 %v1957_v0  ;;  %493 = vmatpush.msrb.mxu1 %v1957_v0 }
 0x10f   :  { %v112_v11 = vadd.f32 %v110_v6, %v1799_v5  ;;  %v1965_v6 = vld [vmem:[%s2411_s10 + $0x18] sm:$0xff] }
 0x110   :  { %243 = vmatpush.msra.mxu2 %v1965_v6  ;;  %494 = vmatpush.msrb.mxu1 %v1965_v6 }
 0x111   :  { %v119_v14 = vadd.f32 %v117_v7, %v112_v11 }
 0x113   :  { %157 = vmatmul.f32.vlgmr.msra.gmra.mxu0 %v119_v14  ;;  %v1978_v14 = vld [vmem:[%s2411_s10 + $0x10] sm:$0xff] }
 0x114   :  { %736 = vmatpush.msra.mxu0 %v1867_v28  ;;  %244 = vmatpush.msra.mxu2 %v1978_v14 }
 0x115   :  { %495 = vmatpush.msrb.mxu1 %v1978_v14 }
 0x116   :  { %737 = vmatpush.msra.mxu0 %v1872_v29  ;;  %245 = vmatpush.msra.mxu2 %v1985_v16 }
 0x117   :  { %496 = vmatpush.msrb.mxu1 %v1985_v16 }
 0x118   :  { %738 = vmatpush.msra.mxu0 %v1879_v30 }
 0x11a   :  { %739 = vmatpush.msra.mxu0 %v1887_v31 }
 0x11b   :  { %160 = vmatmul.f32.gmra.mxu0 %v120_v17  ;;  %v1993_v17 = vld [vmem:[%s2411_s10] sm:$0xff] }
 0x11c   :  { %740 = vmatpush.msra.mxu0 %v1895_v32  ;;  %246 = vmatpush.msra.mxu2 %v1993_v17 }
 0x11d   :  { %497 = vmatpush.msrb.mxu1 %v1993_v17 }
 0x11e   :  { %741 = vmatpush.msra.mxu0 %v1903_v42  ;;  %686 = vmatpush.msrb.mxu2 %v1588_v20 }
 0x120   :  { %742 = vmatpush.msra.mxu0 %v1911_v47  ;;  %687 = vmatpush.msrb.mxu2 %v1593_v21 }
 0x122   :  { %743 = vmatpush.msra.mxu0 %v1919_v50  ;;  %688 = vmatpush.msrb.mxu2 %v1600_v22 }
 0x124   :  { %744 = vmatpush.msra.mxu0 %v1927_v55  ;;  %689 = vmatpush.msrb.mxu2 %v1607_v23 }
 0x126   :  { %745 = vmatpush.msra.mxu0 %v1940_v58  ;;  %690 = vmatpush.msrb.mxu2 %v1614_v24 }
 0x128   :  { %746 = vmatpush.msra.mxu0 %v1948_v59  ;;  %691 = vmatpush.msrb.mxu2 %v1621_v25 }
 0x12a   :  { %747 = vmatpush.msra.mxu0 %v1957_v0  ;;  %692 = vmatpush.msrb.mxu2 %v1628_v26 }
 0x12c   :  { %748 = vmatpush.msra.mxu0 %v1965_v6  ;;  %693 = vmatpush.msrb.mxu2 %v1637_v33 }
 0x12e   :  { %749 = vmatpush.msra.mxu0 %v1978_v14  ;;  %694 = vmatpush.msrb.mxu2 %v1642_v34 }
 0x130   :  { %750 = vmatpush.msra.mxu0 %v1985_v16  ;;  %695 = vmatpush.msrb.mxu2 %v1649_v35 }
 0x132   :  { %751 = vmatpush.msra.mxu0 %v1993_v17  ;;  %696 = vmatpush.msrb.mxu2 %v1656_v36 }
 0x134   :  { %697 = vmatpush.msrb.mxu2 %v1665_v37 }
 0x136   :  { %698 = vmatpush.msrb.mxu2 %v1672_v38 }
 0x138   :  { %699 = vmatpush.msrb.mxu2 %v1679_v39 }
 0x13a   :  { %700 = vmatpush.msrb.mxu2 %v1684_v40 }
 0x13c   :  { %701 = vmatpush.msrb.mxu2 %v1691_v41 }
 0x190   :  { %v158_v61 = vpop.f32.mrf.mxu0 }
 0x191   :  { %v159_v62 = vadd.f32 %v1935_v56, %v158_v61  ;;  %v2026_v61 = vld [vmem:[%s2410_s9] ss:$0 sm:$0xff] }
 0x192   :  { %2455 = vst [vmem:[#allocation20_spill] sm:$0xff] %v2026_v61 }
 0x193   :  { %v164_v1 = vmax.f32 %v159_v62, 0.0 }
 0x195   :  { %202 = vmatmul.f32.vlgmr.msra.gmra.mxu1 %v164_v1 }
 0x196   :  { %940 = vmatpush.msra.mxu1 %v1588_v20 }
 0x198   :  { %v161_v7 = vpop.f32.mrf.mxu0  ;;  %941 = vmatpush.msra.mxu1 %v1593_v21 }
 0x199   :  { %v162_v9 = vadd.f32 %v1935_v56, %v161_v7 }
 0x19a   :  { %942 = vmatpush.msra.mxu1 %v1600_v22 }
 0x19b   :  { %v165_v11 = vmax.f32 %v162_v9, 0.0 }
 0x19c   :  { %943 = vmatpush.msra.mxu1 %v1607_v23 }
 0x19d   :  { %205 = vmatmul.f32.gmra.mxu1 %v165_v11 }
 0x19e   :  { %944 = vmatpush.msra.mxu1 %v1614_v24 }
 0x1a0   :  { %945 = vmatpush.msra.mxu1 %v1621_v25 }
 0x1a2   :  { %946 = vmatpush.msra.mxu1 %v1628_v26 }
 0x1a4   :  { %947 = vmatpush.msra.mxu1 %v1637_v33 }
 0x1a6   :  { %948 = vmatpush.msra.mxu1 %v1642_v34 }
 0x1a8   :  { %949 = vmatpush.msra.mxu1 %v1649_v35 }
 0x1aa   :  { %950 = vmatpush.msra.mxu1 %v1656_v36 }
 0x1ac   :  { %951 = vmatpush.msra.mxu1 %v1665_v37 }
 0x1ae   :  { %952 = vmatpush.msra.mxu1 %v1672_v38 }
 0x1b0   :  { %953 = vmatpush.msra.mxu1 %v1679_v39 }
 0x1b2   :  { %954 = vmatpush.msra.mxu1 %v1684_v40 }
 0x1b4   :  { %955 = vmatpush.msra.mxu1 %v1691_v41 }
 0x212   :  { %v203_v62 = vpop.f32.mrf.mxu1 }
 0x213   :  { %v204_v1 = vadd.f32 %v2026_v61, %v203_v62 }
 0x215   :  { %v209_v7 = vmax.f32 %v204_v1, 0.0  ;;  %v2057_v1 = vld [vmem:[%s2412_s11] ss:$0 sm:$0xff] }
 0x216   :  { %2456 = vst [vmem:[#allocation21_spill] sm:$0xff] %v2057_v1 }
 0x217   :  { %247 = vmatmul.f32.vlgmr.msra.gmra.mxu2 %v209_v7 }
 0x218   :  { %965 = vmatpush.msra.mxu2 %v1700_v43 }
 0x21a   :  { %v206_v9 = vpop.f32.mrf.mxu1  ;;  %966 = vmatpush.msra.mxu2 %v1705_v44 }
 0x21b   :  { %v207_v11 = vadd.f32 %v2026_v61, %v206_v9 }
 0x21c   :  { %967 = vmatpush.msra.mxu2 %v1712_v45 }
 0x21d   :  { %v210_v62 = vmax.f32 %v207_v11, 0.0 }
 0x21e   :  { %968 = vmatpush.msra.mxu2 %v1720_v46 }
 0x21f   :  { %250 = vmatmul.f32.gmra.mxu2 %v210_v62 }
 0x220   :  { %969 = vmatpush.msra.mxu2 %v1728_v48 }
 0x222   :  { %970 = vmatpush.msra.mxu2 %v1736_v49 }
 0x224   :  { %971 = vmatpush.msra.mxu2 %v1754_v53 }
 0x226   :  { %972 = vmatpush.msra.mxu2 %v1769_v57 }
 0x228   :  { %973 = vmatpush.msra.mxu2 %v1785_v63 }
 0x22a   :  { %974 = vmatpush.msra.mxu2 %v1793_v2 }
 0x22c   :  { %975 = vmatpush.msra.mxu2 %v1807_v8 }
 0x22e   :  { %976 = vmatpush.msra.mxu2 %v1817_v12 }
 0x230   :  { %977 = vmatpush.msra.mxu2 %v1830_v15 }
 0x232   :  { %978 = vmatpush.msra.mxu2 %v1843_v18 }
 0x234   :  { %979 = vmatpush.msra.mxu2 %v1850_v19 }
 0x236   :  { %980 = vmatpush.msra.mxu2 %v1858_v27 }
 0x29a   :  { %v248_v7 = vpop.f32.mrf.mxu2 }
 0x29b   :  { %v249_v9 = vadd.f32 %v2057_v1, %v248_v7 }
 0x29d   :  { %v1338_v11 = vmul.f32 -1.442695, %v249_v9 }
 0x29f   :  { %1433 = vpow2.f32 %v1338_v11 }
 0x2a2   :  { %v251_v62 = vpop.f32.mrf.mxu2 }
 0x2a3   :  { %v252_v12 = vadd.f32 %v2057_v1, %v251_v62 }
 0x2a5   :  { %v1434_v15 = vpop.eup %1433  ;;  %v1339_v8 = vmul.f32 -1.442695, %v252_v12 }
 0x2a6   :  { %v260_v18 = vadd.f32 1.0, %v1434_v15 }
 0x2a7   :  { %1435 = vpow2.f32 %v1339_v8 }
 0x2a8   :  { %1437 = vrcp.f32 %v260_v18  ;;  %v273_v53 = vand.u32 2147483648, %v260_v18  ;;  %v271_v7 = vand.u32 2147483647, %v260_v18  ;;  %vm267_vm2 = vweird.f32 %v260_v18 }
 0x2aa   :  { %v274_v62 = vor.u32 1.1754944e-38, %v273_v53  ;;  %vm272_vm4 = vcmp.eq.f32.partialorder %v271_v7, 8.507059e+37 }
 0x2ad   :  { %v1436_v19 = vpop.eup %1435 }
 0x2ae   :  { %v1438_v27 = vpop.eup %1437  ;;  %v261_v2 = vadd.f32 1.0, %v1436_v19 }
 0x2af   :  { %v263_v63 = vmul.f32 %v1438_v27, %v260_v18  ;;  %vm268_vm1 = vweird.f32 %v1438_v27 }
 0x2b0   :  { %1439 = vrcp.f32 %v261_v2  ;;  %vm269_vm3 = vmor %vm267_vm2, %vm268_vm1  ;;  %v288_v15 = vand.u32 2147483648, %v261_v2  ;;  %vm282_vm5 = vweird.f32 %v261_v2 }
 0x2b1   :  { %v264_v57 = vsub.f32 1.0, %v263_v63 }
 0x2b3   :  { %v265_v49 = vmul.f32 %v1438_v27, %v264_v57  ;;  %v286_v57 = vand.u32 2147483647, %v261_v2 }
 0x2b5   :  { %v266_v9 = vadd.f32 %v1438_v27, %v265_v49  ;;  %v289_v49 = vor.u32 1.1754944e-38, %v288_v15  ;;  %vm287_vm8 = vcmp.eq.f32.partialorder %v286_v57, 8.507059e+37  ;;  %v342_v15 = vld [vmem:[%s2413_s2] sm:$0xff] }
 0x2b6   :  { %v1440_v11 = vpop.eup %1439 }
 0x2b7   :  { %v270_v1 = vsel %vm269_vm3, %v1438_v27, %v266_v9  ;;  %v278_v12 = vmul.f32 %v1440_v11, %v261_v2  ;;  %vm283_vm6 = vweird.f32 %v1440_v11 }
 0x2b8   :  { %v275_v8 = vsel %vm272_vm4, %v274_v62, %v270_v1  ;;  %vm284_vm7 = vmor %vm282_vm5, %vm283_vm6 }
 0x2b9   :  { %294 = vrot.lane.b32.xlu2 %v275_v8, %s1499_s1  ;;  %304 = vrot.lane.b32.xlu0 %v275_v8, %s1501_s28  ;;  %v279_v63 = vsub.f32 1.0, %v278_v12  ;;  %v332_v12 = vmul.f32 20291.17, %v1570_v3 }
 0x2bb   :  { %v280_v19 = vmul.f32 %v1440_v11, %v279_v63 }
 0x2bd   :  { %v281_v18 = vadd.f32 %v1440_v11, %v280_v19 }
 0x2bf   :  { %v285_v53 = vsel %vm284_vm7, %v1440_v11, %v281_v18 }
 0x2c0   :  { %v290_v27 = vsel %vm287_vm8, %v289_v49, %v285_v53  ;;  %v350_v49 = vmul.f32 0.9518164, %v342_v15  ;;  %v333_v15 = vmul.f32 20291.17, %v1575_v4 }
 0x2c1   :  { %306 = vrot.lane.b32.xlu1 %v290_v27, %s1501_s28  ;;  %296 = vrot.lane.b32.xlu0 %v290_v27, %s1499_s1 }
 0x313   :  { %v295_v1 = vpop.permute.xlu2 %294 }
 0x314   :  { %v300_v7 = vadd.f32 %v295_v1, %v275_v8 }
 0x316   :  { %v302_v9 = vmul.f32 0.5, %v300_v7 }
 0x318   :  { %v312_v62 = vmul.f32 2.0, %v302_v9 }
 0x31a   :  { %v1340_v48 = vadd.f32 -1.0, %v312_v62 }
 0x31c   :  { %v316_v46 = vmul.f32 2.0, %v1340_v48 }
 0x31e   :  { %v1342_v2 = vclamps-f32 %v316_v46, 2.0 }
 0x320   :  { %v334_v63 = vsub.f32 %v332_v12, %v1342_v2  ;;  %v344_v57 = vmul.f32 0.30666858, %v1342_v2 }
 0x322   :  { %v336_v11 = vmul.f32 4.928252e-05, %v334_v63 }
 0x324   :  { %v346_v19 = vmul.f32 0.00014558948, %v336_v11 }
 0x326   :  { %v348_v18 = vadd.f32 %v346_v19, %v344_v57 }
 0x328   :  { %v2069_v53 = vadd.f32 %v350_v49, %v348_v18 }
 0x32b   :  { %v305_v1 = vpop.permute.xlu0 %304 }
 0x32c   :  { %v310_v7 = vsub.f32 %v275_v8, %v305_v1 }
 0x32e   :  { %v322_v9 = vmul.f32 2.0, %v310_v7 }
 0x330   :  { %v1344_v62 = vadd.f32 -1.0, %v322_v9 }
 0x332   :  { %v326_v45 = vmul.f32 2.0, %v1344_v62 }
 0x333   :  { %v307_v3 = vpop.permute.xlu1 %306  ;;  %v297_v48 = vpop.permute.xlu0 %296 }
 0x334   :  { %v1346_v46 = vclamps-f32 %v326_v45, 2.0  ;;  %v311_v44 = vsub.f32 %v290_v27, %v307_v3  ;;  %v301_v43 = vadd.f32 %v297_v48, %v290_v27  ;;  %v343_v45 = vld [vmem:[%s2413_s2 + $0x8] sm:$0x3] }
 0x335   :  { %v351_v4 = vmul.f32 0.9518164, %v343_v45 }
 0x336   :  { %v338_v61 = vsub.f32 %v332_v12, %v1346_v46  ;;  %v323_v41 = vmul.f32 2.0, %v311_v44  ;;  %v303_v40 = vmul.f32 0.5, %v301_v43  ;;  %v354_v57 = vmul.f32 0.30666858, %v1346_v46 }
 0x338   :  { %v340_v63 = vmul.f32 4.928252e-05, %v338_v61  ;;  %v1345_v2 = vadd.f32 -1.0, %v323_v41  ;;  %v313_v11 = vmul.f32 2.0, %v303_v40 }
 0x33a   :  { %v356_v19 = vmul.f32 0.00014558948, %v340_v63  ;;  %v327_v18 = vmul.f32 2.0, %v1345_v2  ;;  %v1341_v8 = vadd.f32 -1.0, %v313_v11 }
 0x33c   :  { %v358_v1 = vadd.f32 %v356_v19, %v354_v57  ;;  %v1347_v7 = vclamps-f32 %v327_v18, 2.0  ;;  %v317_v9 = vmul.f32 2.0, %v1341_v8 }
 0x33e   :  { %v2072_v62 = vadd.f32 %v358_v1, %v350_v49  ;;  %v339_v44 = vsub.f32 %v333_v15, %v1347_v7  ;;  %v1343_v43 = vclamps-f32 %v317_v9, 2.0  ;;  %v355_v27 = vmul.f32 0.30666858, %v1347_v7 }
 0x340   :  { %v341_v61 = vmul.f32 4.928252e-05, %v339_v44  ;;  %v335_v41 = vsub.f32 %v333_v15, %v1343_v43  ;;  %v1350_v40 = vclamps-f32 %v2072_v62, 2.0  ;;  %v345_v63 = vmul.f32 0.30666858, %v1343_v43 }
 0x342   :  { %v357_v12 = vmul.f32 0.00014558948, %v341_v61  ;;  %v337_v3 = vmul.f32 4.928252e-05, %v335_v41  ;;  %v376_v48 = vmul.f32 %v1350_v40, %v1579_v10 }
 0x344   :  { %v359_v46 = vadd.f32 %v357_v12, %v355_v27  ;;  %v347_v49 = vmul.f32 0.00014558948, %v337_v3  ;;  %v378_v2 = vadd.f32 1.0, %v376_v48 }
 0x346   :  { %v2079_v11 = vadd.f32 %v359_v46, %v351_v4  ;;  %v349_v57 = vadd.f32 %v347_v49, %v345_v63  ;;  %v380_v19 = vmul.f32 0.5, %v378_v2 }
 0x348   :  { %v382_v18 = vmul.f32 0.5, %v380_v19  ;;  %v1351_v8 = vclamps-f32 %v2079_v11, 2.0  ;;  %v2082_v15 = vadd.f32 %v351_v4, %v349_v57  ;;  %v1348_v4 = vclamps-f32 %v2069_v53, 2.0 }
 0x34a   :  { %386 = vrot.lane.b32.xlu1 %v382_v18, %s1499_s1  ;;  %v377_v1 = vmul.f32 %v1351_v8, %v1579_v10  ;;  %v1349_v44 = vclamps-f32 %v2082_v15, 2.0  ;;  %v366_v12 = vmul.f32 %v1348_v4, %v1579_v10 }
 0x34c   :  { %v379_v7 = vadd.f32 1.0, %v377_v1  ;;  %v367_v43 = vmul.f32 %v1349_v44, %v1579_v10  ;;  %v368_v3 = vadd.f32 1.0, %v366_v12  ;;  %v426_v1 = vmul.f32 0.799, %v1760_v54 }
 0x34e   :  { %v381_v9 = vmul.f32 0.5, %v379_v7  ;;  %v369_v61 = vadd.f32 1.0, %v367_v43  ;;  %v370_v48 = vmul.f32 0.5, %v368_v3 }
 0x350   :  { %v383_v45 = vmul.f32 0.5, %v381_v9  ;;  %v371_v41 = vmul.f32 0.5, %v369_v61 }
 0x352   :  { %388 = vrot.lane.b32.xlu2 %v383_v45, %s1499_s1  ;;  %v428_v45 = vperm.slane %v426_v1, 0  ;;  %v2473_v1 = vld [vmem:[#allocation17_spill] sm:$0xff] }
 0x3ac   :  { %v389_v40 = vpop.permute.xlu2 %388 }
 0x3ad   :  { %v393_v27 = vsub.f32 %v371_v41, %v389_v40  ;;  %v395_v2 = vadd.f32 %v389_v40, %v371_v41 }
 0x3af   :  { %403 = vperm.xlu2 %1423, %v393_v27  }
 0x3bc   :  { %v387_v46 = vpop.permute.xlu1 %386 }
 0x3bd   :  { %v392_v63 = vsub.f32 %v370_v48, %v387_v46  ;;  %v394_v49 = vadd.f32 %v387_v46, %v370_v48  ;;  %v2465_v46 = vld [vmem:[#allocation9_spill] sm:$0xff] }
 0x3bf   :  { %410 = vperm.xlu1 %1422, %v394_v49   ;;  %398 = vperm.xlu0 %1424, %v392_v63   ;;  %v2466_v63 = vld [vmem:[#allocation10_spill] sm:$0xff]  ;;  %v2467_v49 = vld [vmem:[#allocation11_spill] sm:$0xff] }
 0x3c7   :  { %415 = vperm.xlu1 %1422, %v395_v2   ;;  %v2468_v2 = vld [vmem:[#allocation12_spill] sm:$0xff] }
 0x409   :  { %v404_v44 = vpop.permute.xlu2 %403 }
 0x40a   :  { %v407_v27 = vmul.f32 %v1744_v51, %v404_v44  ;;  %v2476_v44 = vld [vmem:[#allocation21_spill] sm:$0xff] }
 0x431   :  { %v411_v57 = vpop.permute.xlu1 %410  ;;  %v399_v19 = vpop.permute.xlu0 %398 }
 0x432   :  { %v418_v18 = vmul.f32 %v1749_v52, %v411_v57  ;;  %v406_v8 = vmul.f32 %v1744_v51, %v399_v19  ;;  %v2469_v57 = vld [vmem:[#allocation13_spill] sm:$0xff]  ;;  %v2470_v19 = vld [vmem:[#allocation14_spill] sm:$0xff] }
 0x434   :  { %v420_v7 = vadd.f32 %v418_v18, %v406_v8  ;;  %v2471_v18 = vld [vmem:[#allocation15_spill] sm:$0xff]  ;;  %v2472_v8 = vld [vmem:[#allocation16_spill] sm:$0xff] }
 0x436   :  { %v422_v9 = vadd.f32 %v1778_v60, %v420_v7  ;;  %v2474_v7 = vld [vmem:[#allocation18_spill] sm:$0xff] }
 0x438   :  { %v424_v43 = vadd.f32 %v422_v9, %v1799_v5  ;;  %v2475_v9 = vld [vmem:[#allocation19_spill] sm:$0xff] }
 0x439   :  { %v416_v61 = vpop.permute.xlu1 %415 }
 0x43a   :  { %v419_v41 = vmul.f32 %v1749_v52, %v416_v61  ;;  %v430_v40 = vadd.f32 %v428_v45, %v424_v43 }
 0x43c   :  { %v421_v4 = vadd.f32 %v419_v41, %v407_v27  ;;  %448 = vmatmul.f32.vlgmr.msra.gmra.mxu3 %v430_v40 }
 0x43d   :  { %990 = vmatpush.msra.mxu3 %v1867_v28 }
 0x43e   :  { %v423_v12 = vadd.f32 %v1778_v60, %v421_v4 }
 0x43f   :  { %991 = vmatpush.msra.mxu3 %v1872_v29 }
 0x440   :  { %v425_v54 = vadd.f32 %v423_v12, %v1823_v13 }
 0x441   :  { %992 = vmatpush.msra.mxu3 %v1879_v30 }
 0x442   :  { %v431_v3 = vadd.f32 %v428_v45, %v425_v54 }
 0x443   :  { %993 = vmatpush.msra.mxu3 %v1887_v31 }
 0x444   :  { %451 = vmatmul.f32.gmra.mxu3 %v431_v3 }
 0x445   :  { %994 = vmatpush.msra.mxu3 %v1895_v32 }
 0x447   :  { %995 = vmatpush.msra.mxu3 %v1903_v42 }
 0x449   :  { %996 = vmatpush.msra.mxu3 %v1911_v47 }
 0x44b   :  { %997 = vmatpush.msra.mxu3 %v1919_v50 }
 0x44d   :  { %998 = vmatpush.msra.mxu3 %v1927_v55 }
 0x44f   :  { %999 = vmatpush.msra.mxu3 %v1940_v58 }
 0x451   :  { %1000 = vmatpush.msra.mxu3 %v1948_v59 }
 0x453   :  { %1001 = vmatpush.msra.mxu3 %v1957_v0 }
 0x455   :  { %1002 = vmatpush.msra.mxu3 %v1965_v6 }
 0x457   :  { %1003 = vmatpush.msra.mxu3 %v1978_v14 }
 0x459   :  { %1004 = vmatpush.msra.mxu3 %v1985_v16 }
 0x45b   :  { %1005 = vmatpush.msra.mxu3 %v1993_v17 }
 0x4bf   :  { %v449_v51 = vpop.f32.mrf.mxu3 }
 0x4c0   :  { %v450_v52 = vadd.f32 %v1935_v56, %v449_v51 }
 0x4c2   :  { %v455_v60 = vmax.f32 %v450_v52, 0.0 }
 0x4c4   :  { %473 = vmatmul.f32.vlgmr.msrb.gmra.mxu0 %v455_v60 }
 0x4c5   :  { %1194 = vmatpush.msrb.mxu0 %v1588_v20  ;;  %v2457_v20 = vld [vmem:[#allocation2_spill] sm:$0xff] }
 0x4c7   :  { %v452_v5 = vpop.f32.mrf.mxu3  ;;  %1195 = vmatpush.msrb.mxu0 %v1593_v21  ;;  %v2458_v21 = vld [vmem:[#allocation3_spill] sm:$0xff] }
 0x4c8   :  { %v453_v13 = vadd.f32 %v1935_v56, %v452_v5 }
 0x4c9   :  { %1196 = vmatpush.msrb.mxu0 %v1600_v22 }
 0x4ca   :  { %v456_v48 = vmax.f32 %v453_v13, 0.0 }
 0x4cb   :  { %1197 = vmatpush.msrb.mxu0 %v1607_v23  ;;  %v2459_v23 = vld [vmem:[#allocation20_spill] sm:$0xff] }
 0x4cc   :  { %476 = vmatmul.f32.gmra.mxu0 %v456_v48 }
 0x4cd   :  { %1198 = vmatpush.msrb.mxu0 %v1614_v24 }
 0x4cf   :  { %1199 = vmatpush.msrb.mxu0 %v1621_v25 }
 0x4d1   :  { %1200 = vmatpush.msrb.mxu0 %v1628_v26  ;;  %v2460_v26 = vld [vmem:[#allocation4_spill] sm:$0xff] }
 0x4d3   :  { %1201 = vmatpush.msrb.mxu0 %v1637_v33 }
 0x4d5   :  { %1202 = vmatpush.msrb.mxu0 %v1642_v34  ;;  %v2461_v34 = vld [vmem:[#allocation5_spill] sm:$0xff] }
 0x4d7   :  { %1203 = vmatpush.msrb.mxu0 %v1649_v35 }
 0x4d9   :  { %1204 = vmatpush.msrb.mxu0 %v1656_v36  ;;  %v2462_v36 = vld [vmem:[#allocation6_spill] sm:$0xff] }
 0x4db   :  { %1205 = vmatpush.msrb.mxu0 %v1665_v37 }
 0x4dd   :  { %1206 = vmatpush.msrb.mxu0 %v1672_v38  ;;  %v2463_v38 = vld [vmem:[#allocation7_spill] sm:$0xff] }
 0x4df   :  { %1207 = vmatpush.msrb.mxu0 %v1679_v39  ;;  %v2464_v39 = vld [vmem:[#allocation8_spill] sm:$0xff] }
 0x4e1   :  { %1208 = vmatpush.msrb.mxu0 %v2457_v20 }
 0x4e3   :  { %1209 = vmatpush.msrb.mxu0 %v2458_v21 }
 0x541   :  { %v474_v22 = vpop.f32.mrf.mxu0 }
 0x542   :  { %v475_v24 = vadd.f32 %v2459_v23, %v474_v22 }
 0x544   :  { %v480_v25 = vmax.f32 %v475_v24, 0.0 }
 0x546   :  { %498 = vmatmul.f32.vlgmr.msrb.gmra.mxu1 %v480_v25 }
 0x547   :  { %1219 = vmatpush.msrb.mxu1 %v2460_v26 }
 0x549   :  { %v477_v33 = vpop.f32.mrf.mxu0  ;;  %1220 = vmatpush.msrb.mxu1 %v2461_v34 }
 0x54a   :  { %v478_v35 = vadd.f32 %v2459_v23, %v477_v33 }
 0x54b   :  { %1221 = vmatpush.msrb.mxu1 %v2462_v36 }
 0x54c   :  { %v481_v37 = vmax.f32 %v478_v35, 0.0 }
 0x54d   :  { %1222 = vmatpush.msrb.mxu1 %v2463_v38 }
 0x54e   :  { %501 = vmatmul.f32.gmra.mxu1 %v481_v37 }
 0x54f   :  { %1223 = vmatpush.msrb.mxu1 %v2464_v39 }
 0x551   :  { %1224 = vmatpush.msrb.mxu1 %v2465_v46 }
 0x553   :  { %1225 = vmatpush.msrb.mxu1 %v2466_v63 }
 0x555   :  { %1226 = vmatpush.msrb.mxu1 %v2467_v49 }
 0x557   :  { %1227 = vmatpush.msrb.mxu1 %v2468_v2 }
 0x559   :  { %1228 = vmatpush.msrb.mxu1 %v2469_v57 }
 0x55b   :  { %1229 = vmatpush.msrb.mxu1 %v2470_v19 }
 0x55d   :  { %1230 = vmatpush.msrb.mxu1 %v2471_v18 }
 0x55f   :  { %1231 = vmatpush.msrb.mxu1 %v2472_v8  ;;  %v589_v8 = vmul.f32 3.2608492, %v2072_v62  ;;  %v584_v62 = vmul.f32 3.2608492, %v2082_v15 }
 0x561   :  { %1232 = vmatpush.msrb.mxu1 %v2473_v1 }
 0x563   :  { %1233 = vmatpush.msrb.mxu1 %v2474_v7 }
 0x565   :  { %1234 = vmatpush.msrb.mxu1 %v2475_v9  ;;  %v1362_v9 = vld [vmem:[%s2413_s2 + $0x10] sm:$0xff] }
 0x5c3   :  { %v499_v45 = vpop.f32.mrf.mxu1 }
 0x5c4   :  { %v500_v43 = vadd.f32 %v2476_v44, %v499_v45 }
 0x5c6   :  { %v1352_v61 = vmul.f32 -1.442695, %v500_v43 }
 0x5c8   :  { %1441 = vpow2.f32 %v1352_v61 }
 0x5cb   :  { %v502_v27 = vpop.f32.mrf.mxu1 }
 0x5cc   :  { %v503_v41 = vadd.f32 %v2476_v44, %v502_v27 }
 0x5ce   :  { %v1442_v40 = vpop.eup %1441  ;;  %v1353_v4 = vmul.f32 -1.442695, %v503_v41  ;;  %v604_v41 = vmul.f32 0.7258339, %v1362_v9 }
 0x5cf   :  { %v511_v12 = vadd.f32 1.0, %v1442_v40 }
 0x5d0   :  { %1443 = vpow2.f32 %v1353_v4 }
 0x5d1   :  { %1445 = vrcp.f32 %v511_v12  ;;  %v524_v5 = vand.u32 2147483648, %v511_v12  ;;  %v522_v48 = vand.u32 2147483647, %v511_v12  ;;  %vm518_vm10 = vweird.f32 %v511_v12 }
 0x5d3   :  { %v525_v22 = vor.u32 1.1754944e-38, %v524_v5  ;;  %vm523_vm12 = vcmp.eq.f32.partialorder %v522_v48, 8.507059e+37 }
 0x5d6   :  { %v1444_v54 = vpop.eup %1443 }
 0x5d7   :  { %v1446_v3 = vpop.eup %1445  ;;  %v512_v51 = vadd.f32 1.0, %v1444_v54 }
 0x5d8   :  { %v514_v52 = vmul.f32 %v1446_v3, %v511_v12  ;;  %vm519_vm9 = vweird.f32 %v1446_v3 }
 0x5d9   :  { %1447 = vrcp.f32 %v512_v51  ;;  %vm520_vm11 = vmor %vm518_vm10, %vm519_vm9  ;;  %v539_v34 = vand.u32 2147483648, %v512_v51  ;;  %v537_v36 = vand.u32 2147483647, %v512_v51  ;;  %vm533_vm14 = vweird.f32 %v512_v51 }
 0x5da   :  { %v515_v60 = vsub.f32 1.0, %v514_v52 }
 0x5db   :  { %v540_v38 = vor.u32 1.1754944e-38, %v539_v34  ;;  %vm538_vm0 = vcmp.eq.f32.partialorder %v537_v36, 8.507059e+37 }
 0x5dc   :  { %v516_v13 = vmul.f32 %v1446_v3, %v515_v60 }
 0x5de   :  { %v517_v20 = vadd.f32 %v1446_v3, %v516_v13  ;;  %v1363_v13 = vld [vmem:[%s2413_s2 + $0x18] sm:$0x3] }
 0x5df   :  { %v1448_v21 = vpop.eup %1447 }
 0x5e0   :  { %v521_v24 = vsel %vm520_vm11, %v1446_v3, %v517_v20  ;;  %v529_v25 = vmul.f32 %v1448_v21, %v512_v51  ;;  %vm534_vm13 = vweird.f32 %v1448_v21 }
 0x5e1   :  { %v526_v26 = vsel %vm523_vm12, %v525_v22, %v521_v24  ;;  %vm535_vm15 = vmor %vm533_vm14, %vm534_vm13  ;;  %v605_v22 = vmul.f32 0.7258339, %v1363_v13 }
 0x5e2   :  { %545 = vrot.lane.b32.xlu1 %v526_v26, %s1499_s1  ;;  %555 = vrot.lane.b32.xlu2 %v526_v26, %s1501_s28  ;;  %v530_v33 = vsub.f32 1.0, %v529_v25 }
 0x5e4   :  { %v531_v35 = vmul.f32 %v1448_v21, %v530_v33 }
 0x5e6   :  { %v532_v37 = vadd.f32 %v1448_v21, %v531_v35 }
 0x5e8   :  { %v536_v39 = vsel %vm535_vm15, %v1448_v21, %v532_v37 }
 0x5e9   :  { %v541_v46 = vsel %vm538_vm0, %v540_v38, %v536_v39 }
 0x5ea   :  { %557 = vrot.lane.b32.xlu0 %v541_v46, %s1501_s28  ;;  %547 = vrot.lane.b32.xlu2 %v541_v46, %s1499_s1 }
 0x63c   :  { %v556_v63 = vpop.permute.xlu2 %555 }
 0x63d   :  { %v561_v49 = vsub.f32 %v526_v26, %v556_v63 }
 0x63f   :  { %v573_v2 = vmul.f32 2.0, %v561_v49 }
 0x641   :  { %v1358_v57 = vadd.f32 -1.0, %v573_v2 }
 0x643   :  { %v577_v19 = vmul.f32 2.0, %v1358_v57 }
 0x644   :  { %v548_v18 = vpop.permute.xlu2 %547 }
 0x645   :  { %v1360_v1 = vclamps-f32 %v577_v19, 2.0  ;;  %v552_v7 = vadd.f32 %v548_v18, %v541_v46  ;;  %v583_v19 = vmul.f32 3.2608492, %v2069_v53 }
 0x647   :  { %v591_v45 = vsub.f32 %v589_v8, %v1360_v1  ;;  %v554_v43 = vmul.f32 0.5, %v552_v7  ;;  %v608_v40 = vmul.f32 0.58378905, %v1360_v1 }
 0x649   :  { %v593_v61 = vmul.f32 0.322193, %v591_v45  ;;  %v564_v27 = vmul.f32 2.0, %v554_v43  ;;  %v590_v45 = vmul.f32 3.2608492, %v2079_v11 }
 0x64b   :  { %v610_v4 = vmul.f32 0.36380696, %v593_v61  ;;  %v1355_v12 = vadd.f32 -1.0, %v564_v27 }
 0x64d   :  { %v612_v54 = vadd.f32 %v610_v4, %v608_v40  ;;  %v568_v3 = vmul.f32 2.0, %v1355_v12 }
 0x64f   :  { %v2162_v51 = vadd.f32 %v612_v54, %v604_v41  ;;  %v1357_v52 = vclamps-f32 %v568_v3, 2.0 }
 0x651   :  { %v586_v60 = vsub.f32 %v584_v62, %v1357_v52  ;;  %v1366_v5 = vclamps-f32 %v2162_v51, 2.0  ;;  %v599_v24 = vmul.f32 0.58378905, %v1357_v52 }
 0x653   :  { %v588_v48 = vmul.f32 0.322193, %v586_v60  ;;  %v630_v20 = vmul.f32 %v1366_v5, %v1579_v10 }
 0x654   :  { %v546_v21 = vpop.permute.xlu1 %545 }
 0x655   :  { %v601_v25 = vmul.f32 0.36380696, %v588_v48  ;;  %v551_v33 = vadd.f32 %v546_v21, %v526_v26  ;;  %v632_v34 = vadd.f32 1.0, %v630_v20 }
 0x657   :  { %v603_v35 = vadd.f32 %v601_v25, %v599_v24  ;;  %v553_v36 = vmul.f32 0.5, %v551_v33  ;;  %v634_v15 = vmul.f32 0.5, %v632_v34 }
 0x659   :  { %v563_v37 = vmul.f32 2.0, %v553_v36  ;;  %v636_v38 = vmul.f32 0.5, %v634_v15  ;;  %v2170_v39 = vadd.f32 %v605_v22, %v603_v35 }
 0x65b   :  { %v1354_v63 = vadd.f32 -1.0, %v563_v37  ;;  %640 = vrot.lane.b32.xlu0 %v636_v38, %s1499_s1 }
 0x65c   :  { %v558_v49 = vpop.permute.xlu0 %557 }
 0x65d   :  { %v567_v2 = vmul.f32 2.0, %v1354_v63  ;;  %v562_v57 = vsub.f32 %v541_v46, %v558_v49 }
 0x65f   :  { %v1356_v18 = vclamps-f32 %v567_v2, 2.0  ;;  %v574_v8 = vmul.f32 2.0, %v562_v57  ;;  %v2189_v2 = vld [vmem:[%s2403_s3] ss:$0 sm:$0xff] }
 0x661   :  { %v585_v1 = vsub.f32 %v583_v19, %v1356_v18  ;;  %v1359_v26 = vadd.f32 -1.0, %v574_v8  ;;  %v598_v43 = vmul.f32 0.58378905, %v1356_v18  ;;  %v2195_v19 = vld [vmem:[%s2403_s3 + $0x1] ss:$0 sm:$0xff] }
 0x662   :  { %v2201_v8 = vld [vmem:[%s2408_s5] sm:$0x1] }
 0x663   :  { %v587_v7 = vmul.f32 0.322193, %v585_v1  ;;  %v578_v9 = vmul.f32 2.0, %v1359_v26  ;;  %v680_v1 = vmul.f32 0.599, %v2201_v8 }
 0x665   :  { %v600_v61 = vmul.f32 0.36380696, %v587_v7  ;;  %v1361_v27 = vclamps-f32 %v578_v9, 2.0  ;;  %v2207_v7 = vld [vmem:[%s2405_s4] ss:$0 sm:$0xff] }
 0x667   :  { %v602_v40 = vadd.f32 %v600_v61, %v598_v43  ;;  %v592_v4 = vsub.f32 %v590_v45, %v1361_v27  ;;  %v609_v3 = vmul.f32 0.58378905, %v1361_v27  ;;  %v682_v45 = vperm.slane %v680_v1, 0  ;;  %v2213_v43 = vld [vmem:[%s2409_s0] sm:$0xff] }
 0x669   :  { %v594_v12 = vmul.f32 0.322193, %v592_v4  ;;  %v2175_v54 = vadd.f32 %v604_v41, %v602_v40  ;;  %v1484_v4 = vld [vmem:[%s2404_s6 + $0x50] sm:$0xff] }
 0x66b   :  { %v611_v46 = vmul.f32 0.36380696, %v594_v12  ;;  %v1364_v48 = vclamps-f32 %v2175_v54, 2.0  ;;  %v1485_v12 = vld [vmem:[%s2404_s6 + $0x48] sm:$0xff] }
 0x66d   :  { %v613_v62 = vadd.f32 %v611_v46, %v609_v3  ;;  %v620_v20 = vmul.f32 %v1364_v48, %v1579_v10  ;;  %v1486_v3 = vld [vmem:[%s2404_s6 + $0x40] sm:$0xff]  ;;  %v1487_v46 = vld [vmem:[%s2404_s6 + $0x38] sm:$0xff] }
 0x66f   :  { %v2177_v53 = vadd.f32 %v613_v62, %v605_v22  ;;  %v622_v41 = vadd.f32 1.0, %v620_v20  ;;  %v1365_v22 = vclamps-f32 %v2170_v39, 2.0  ;;  %v1488_v62 = vld [vmem:[%s2404_s6 + $0x30] sm:$0xff]  ;;  %v1493_v20 = vld [vmem:[%s2404_s6 + $0x8] sm:$0xff] }
 0x671   :  { %v1367_v52 = vclamps-f32 %v2177_v53, 2.0  ;;  %v624_v21 = vmul.f32 0.5, %v622_v41  ;;  %v621_v34 = vmul.f32 %v1365_v22, %v1579_v10 }
 0x673   :  { %v631_v60 = vmul.f32 %v1367_v52, %v1579_v10  ;;  %v623_v35 = vadd.f32 1.0, %v621_v34  ;;  %v1489_v52 = vld [vmem:[%s2404_s6 + $0x28] sm:$0xff] }
 0x675   :  { %v633_v5 = vadd.f32 1.0, %v631_v60  ;;  %v625_v36 = vmul.f32 0.5, %v623_v35  ;;  %v1490_v60 = vld [vmem:[%s2404_s6 + $0x20] sm:$0xff] }
 0x677   :  { %v635_v13 = vmul.f32 0.5, %v633_v5  ;;  %v1491_v5 = vld [vmem:[%s2404_s6 + $0x18] sm:$0xff] }
 0x679   :  { %v637_v11 = vmul.f32 0.5, %v635_v13 }
 0x67b   :  { %642 = vrot.lane.b32.xlu1 %v637_v11, %s1499_s1  ;;  %v1492_v11 = vld [vmem:[%s2404_s6 + $0x10] sm:$0xff] }
 0x6cd   :  { %v641_v24 = vpop.permute.xlu0 %640 }
 0x6ce   :  { %v646_v25 = vsub.f32 %v624_v21, %v641_v24  ;;  %v648_v33 = vadd.f32 %v641_v24, %v624_v21  ;;  %v1494_v21 = vld [vmem:[%s2404_s6] sm:$0xff] }
 0x6d0   :  { %664 = vperm.xlu0 %1424, %v648_v33   ;;  %652 = vperm.xlu2 %1423, %v646_v25  }
 0x6ed   :  { %v643_v15 = vpop.permute.xlu1 %642 }
 0x6ee   :  { %v647_v37 = vsub.f32 %v625_v36, %v643_v15  ;;  %v649_v38 = vadd.f32 %v643_v15, %v625_v36 }
 0x6f0   :  { %669 = vperm.xlu2 %1423, %v649_v38   ;;  %657 = vperm.xlu1 %1422, %v647_v37  }
 0x72a   :  { %v653_v63 = vpop.permute.xlu2 %652 }
 0x72b   :  { %v660_v57 = vmul.f32 %v2189_v2, %v653_v63 }
 0x742   :  { %v665_v49 = vpop.permute.xlu0 %664 }
 0x743   :  { %v672_v18 = vmul.f32 %v2195_v19, %v665_v49 }
 0x745   :  { %v674_v26 = vadd.f32 %v672_v18, %v660_v57 }
 0x747   :  { %v676_v9 = vadd.f32 %v2207_v7, %v674_v26 }
 0x749   :  { %v678_v61 = vadd.f32 %v2213_v43, %v676_v9 }
 0x74a   :  { %v670_v40 = vpop.permute.xlu2 %669 }
 0x74b   :  { %v684_v27 = vadd.f32 %v682_v45, %v678_v61 }
 0x74d   :  { %702 = vmatmul.f32.vlgmr.msrb.gmra.mxu2 %v684_v27 }
 0x74e   :  { %1244 = vmatpush.msrb.mxu2 %v1867_v28 }
 0x750   :  { %1245 = vmatpush.msrb.mxu2 %v1872_v29  ;;  %v673_v29 = vmul.f32 %v2195_v19, %v670_v40 }
 0x752   :  { %1246 = vmatpush.msrb.mxu2 %v1879_v30 }
 0x754   :  { %1247 = vmatpush.msrb.mxu2 %v1887_v31 }
 0x756   :  { %1248 = vmatpush.msrb.mxu2 %v1895_v32 }
 0x758   :  { %1249 = vmatpush.msrb.mxu2 %v1903_v42  ;;  %v2236_v42 = vld [vmem:[%s2409_s0 + $0x8] sm:$0x3] }
 0x75a   :  { %1250 = vmatpush.msrb.mxu2 %v1911_v47 }
 0x75c   :  { %1251 = vmatpush.msrb.mxu2 %v1919_v50 }
 0x75e   :  { %1252 = vmatpush.msrb.mxu2 %v1927_v55 }
 0x760   :  { %1253 = vmatpush.msrb.mxu2 %v1940_v58 }
 0x762   :  { %v658_v28 = vpop.permute.xlu1 %657  ;;  %1254 = vmatpush.msrb.mxu2 %v1948_v59 }
 0x763   :  { %v661_v30 = vmul.f32 %v2189_v2, %v658_v28 }
 0x764   :  { %1255 = vmatpush.msrb.mxu2 %v1957_v0  ;;  %v1479_v0 = vld [vmem:[%s2404_s6 + $0x78] sm:$0xff] }
 0x765   :  { %v675_v31 = vadd.f32 %v673_v29, %v661_v30 }
 0x766   :  { %1256 = vmatpush.msrb.mxu2 %v1965_v6  ;;  %v1480_v6 = vld [vmem:[%s2404_s6 + $0x70] sm:$0xff] }
 0x767   :  { %v677_v32 = vadd.f32 %v2207_v7, %v675_v31 }
 0x768   :  { %1257 = vmatpush.msrb.mxu2 %v1978_v14  ;;  %v1481_v14 = vld [vmem:[%s2404_s6 + $0x68] sm:$0xff] }
 0x769   :  { %v679_v47 = vadd.f32 %v2236_v42, %v677_v32 }
 0x76a   :  { %1258 = vmatpush.msrb.mxu2 %v1985_v16  ;;  %v1482_v16 = vld [vmem:[%s2404_s6 + $0x60] sm:$0xff] }
 0x76b   :  { %v685_v50 = vadd.f32 %v682_v45, %v679_v47 }
 0x76c   :  { %1259 = vmatpush.msrb.mxu2 %v1993_v17  ;;  %v1483_v17 = vld [vmem:[%s2404_s6 + $0x58] sm:$0xff] }
 0x76d   :  { %705 = vmatmul.f32.gmra.mxu2 %v685_v50 }
 0x7d0   :  { %v703_v55 = vpop.f32.mrf.mxu2 }
 0x7d1   :  { %v704_v58 = vadd.f32 %v1935_v56, %v703_v55 }
 0x7d3   :  { %v709_v59 = vmax.f32 %v704_v58, 0.0 }
 0x7d5   :  { %727 = vmatmul.f32.vlgmr.msrb.gmra.mxu3 %v709_v59 }
 0x7d6   :  { %1402 = vmatpush.msrb.mxu3 %v1479_v0 }
 0x7d8   :  { %1403 = vmatpush.msrb.mxu3 %v1480_v6 }
 0x7da   :  { %1404 = vmatpush.msrb.mxu3 %v1481_v14 }
 0x7dc   :  { %1405 = vmatpush.msrb.mxu3 %v1482_v16 }
 0x7de   :  { %1406 = vmatpush.msrb.mxu3 %v1483_v17 }
 0x7e0   :  { %1407 = vmatpush.msrb.mxu3 %v1484_v4 }
 0x7e2   :  { %1408 = vmatpush.msrb.mxu3 %v1485_v12 }
 0x7e4   :  { %1409 = vmatpush.msrb.mxu3 %v1486_v3 }
 0x7e6   :  { %1410 = vmatpush.msrb.mxu3 %v1487_v46  ;;  %v837_v46 = vmul.f32 1.7129476, %v2175_v54  ;;  %v843_v54 = vmul.f32 1.7129476, %v2162_v51 }
 0x7e8   :  { %1411 = vmatpush.msrb.mxu3 %v1488_v62 }
 0x7ea   :  { %1412 = vmatpush.msrb.mxu3 %v1489_v52 }
 0x7ec   :  { %1413 = vmatpush.msrb.mxu3 %v1490_v60  ;;  %v1378_v60 = vld [vmem:[%s2413_s2 + $0x20] sm:$0xff] }
 0x7ee   :  { %1414 = vmatpush.msrb.mxu3 %v1491_v5 }
 0x7f0   :  { %v706_v13 = vpop.f32.mrf.mxu2  ;;  %1415 = vmatpush.msrb.mxu3 %v1492_v11 }
 0x7f1   :  { %v707_v48 = vadd.f32 %v1935_v56, %v706_v13 }
 0x7f2   :  { %1416 = vmatpush.msrb.mxu3 %v1493_v20 }
 0x7f3   :  { %v710_v41 = vmax.f32 %v707_v48, 0.0  ;;  %v858_v48 = vmul.f32 0.5032799, %v1378_v60 }
 0x7f4   :  { %1417 = vmatpush.msrb.mxu3 %v1494_v21 }
 0x7f5   :  { %730 = vmatmul.f32.gmra.mxu3 %v710_v41 }
 0x858   :  { %v728_v24 = vpop.f32.mrf.mxu3 }
 0x859   :  { %v729_v25 = vadd.f32 %v2459_v23, %v728_v24 }
 0x85b   :  { %v734_v33 = vmax.f32 %v729_v25, 0.0 }
 0x85d   :  { %752 = vmatmul.f32.vlgmr.msra.gmra.mxu0 %v734_v33 }
 0x878   :  { %v731_v22 = vpop.f32.mrf.mxu3 }
 0x879   :  { %v732_v56 = vadd.f32 %v2459_v23, %v731_v22 }
 0x87b   :  { %v735_v34 = vmax.f32 %v732_v56, 0.0 }
 0x87d   :  { %755 = vmatmul.f32.gmra.mxu0 %v735_v34 }
 0x8da   :  { %v753_v35 = vpop.f32.mrf.mxu0 }
 0x8db   :  { %v754_v36 = vadd.f32 %v2476_v44, %v753_v35 }
 0x8dd   :  { %v1368_v15 = vmul.f32 -1.442695, %v754_v36 }
 0x8df   :  { %1449 = vpow2.f32 %v1368_v15 }
 0x8e5   :  { %v1450_v37 = vpop.eup %1449 }
 0x8e6   :  { %v765_v38 = vadd.f32 1.0, %v1450_v37 }
 0x8e8   :  { %1451 = vrcp.f32 %v765_v38  ;;  %v778_v18 = vand.u32 2147483648, %v765_v38  ;;  %v776_v26 = vand.u32 2147483647, %v765_v38  ;;  %vm772_vm2 = vweird.f32 %v765_v38 }
 0x8ea   :  { %v779_v23 = vor.u32 1.1754944e-38, %v778_v18  ;;  %vm777_vm4 = vcmp.eq.f32.partialorder %v776_v26, 8.507059e+37 }
 0x8ee   :  { %v1452_v63 = vpop.eup %1451 }
 0x8ef   :  { %v768_v49 = vmul.f32 %v1452_v63, %v765_v38  ;;  %vm773_vm1 = vweird.f32 %v1452_v63 }
 0x8f0   :  { %vm774_vm3 = vmor %vm772_vm2, %vm773_vm1 }
 0x8f1   :  { %v769_v57 = vsub.f32 1.0, %v768_v49 }
 0x8f3   :  { %v770_v1 = vmul.f32 %v1452_v63, %v769_v57 }
 0x8f5   :  { %v771_v9 = vadd.f32 %v1452_v63, %v770_v1 }
 0x8f7   :  { %v775_v45 = vsel %vm774_vm3, %v1452_v63, %v771_v9 }
 0x8f8   :  { %v780_v61 = vsel %vm777_vm4, %v779_v23, %v775_v45 }
 0x8f9   :  { %799 = vrot.lane.b32.xlu2 %v780_v61, %s1499_s1  ;;  %809 = vrot.lane.b32.xlu0 %v780_v61, %s1501_s28 }
 0x8fa   :  { %v756_v27 = vpop.f32.mrf.mxu0 }
 0x8fb   :  { %v757_v40 = vadd.f32 %v2476_v44, %v756_v27 }
 0x8fd   :  { %v1369_v28 = vmul.f32 -1.442695, %v757_v40 }
 0x8ff   :  { %1453 = vpow2.f32 %v1369_v28 }
 0x905   :  { %v1454_v29 = vpop.eup %1453 }
 0x906   :  { %v766_v30 = vadd.f32 1.0, %v1454_v29 }
 0x908   :  { %1455 = vrcp.f32 %v766_v30  ;;  %v793_v50 = vand.u32 2147483648, %v766_v30  ;;  %v791_v58 = vand.u32 2147483647, %v766_v30  ;;  %vm787_vm6 = vweird.f32 %v766_v30 }
 0x90a   :  { %v794_v0 = vor.u32 1.1754944e-38, %v793_v50  ;;  %vm792_vm8 = vcmp.eq.f32.partialorder %v791_v58, 8.507059e+37 }
 0x90e   :  { %v1456_v31 = vpop.eup %1455 }
 0x90f   :  { %v783_v32 = vmul.f32 %v1456_v31, %v766_v30  ;;  %vm788_vm5 = vweird.f32 %v1456_v31 }
 0x910   :  { %vm789_vm7 = vmor %vm787_vm6, %vm788_vm5 }
 0x911   :  { %v784_v47 = vsub.f32 1.0, %v783_v32 }
 0x913   :  { %v785_v55 = vmul.f32 %v1456_v31, %v784_v47  ;;  %v838_v47 = vmul.f32 1.7129476, %v2170_v39 }
 0x915   :  { %v786_v59 = vadd.f32 %v1456_v31, %v785_v55  ;;  %v1379_v55 = vld [vmem:[%s2413_s2 + $0x28] sm:$0x3] }
 0x917   :  { %v790_v6 = vsel %vm789_vm7, %v1456_v31, %v786_v59  ;;  %v844_v31 = vmul.f32 1.7129476, %v2177_v53 }
 0x918   :  { %v795_v14 = vsel %vm792_vm8, %v794_v0, %v790_v6  ;;  %v859_v6 = vmul.f32 0.5032799, %v1379_v55 }
 0x919   :  { %801 = vrot.lane.b32.xlu0 %v795_v14, %s1499_s1  ;;  %811 = vrot.lane.b32.xlu1 %v795_v14, %s1501_s28 }
 0x953   :  { %v800_v44 = vpop.permute.xlu2 %799 }
 0x954   :  { %v805_v16 = vadd.f32 %v800_v44, %v780_v61 }
 0x956   :  { %v807_v17 = vmul.f32 0.5, %v805_v16 }
 0x958   :  { %v817_v4 = vmul.f32 2.0, %v807_v17 }
 0x95a   :  { %v1370_v12 = vadd.f32 -1.0, %v817_v4 }
 0x95c   :  { %v821_v3 = vmul.f32 2.0, %v1370_v12 }
 0x95e   :  { %v1372_v62 = vclamps-f32 %v821_v3, 2.0 }
 0x960   :  { %v839_v52 = vsub.f32 %v837_v46, %v1372_v62  ;;  %v852_v13 = vmul.f32 0.8046603, %v1372_v62 }
 0x962   :  { %v841_v5 = vmul.f32 0.7190358, %v839_v52 }
 0x964   :  { %v854_v11 = vmul.f32 0.31500968, %v841_v5 }
 0x966   :  { %v856_v20 = vadd.f32 %v854_v11, %v852_v13 }
 0x968   :  { %v2303_v41 = vadd.f32 %v858_v48, %v856_v20 }
 0x96a   :  { %v1380_v13 = vclamps-f32 %v2303_v41, 2.0 }
 0x96b   :  { %v810_v21 = vpop.permute.xlu0 %809 }
 0x96c   :  { %v815_v24 = vsub.f32 %v780_v61, %v810_v21  ;;  %v874_v11 = vmul.f32 %v1380_v13, %v1579_v10 }
 0x96e   :  { %v827_v25 = vmul.f32 2.0, %v815_v24 }
 0x970   :  { %v1374_v33 = vadd.f32 -1.0, %v827_v25 }
 0x972   :  { %v831_v22 = vmul.f32 2.0, %v1374_v33 }
 0x974   :  { %v1376_v56 = vclamps-f32 %v831_v22, 2.0 }
 0x976   :  { %v845_v34 = vsub.f32 %v843_v54, %v1376_v56  ;;  %v862_v36 = vmul.f32 0.8046603, %v1376_v56 }
 0x978   :  { %v847_v35 = vmul.f32 0.7190358, %v845_v34 }
 0x97a   :  { %v864_v15 = vmul.f32 0.31500968, %v847_v35 }
 0x97c   :  { %v866_v37 = vadd.f32 %v864_v15, %v862_v36 }
 0x97e   :  { %v2306_v38 = vadd.f32 %v866_v37, %v858_v48  ;;  %v876_v48 = vadd.f32 1.0, %v874_v11 }
 0x980   :  { %v1382_v63 = vclamps-f32 %v2306_v38, 2.0  ;;  %v878_v21 = vmul.f32 0.5, %v876_v48 }
 0x982   :  { %v884_v49 = vmul.f32 %v1382_v63, %v1579_v10 }
 0x984   :  { %v886_v57 = vadd.f32 1.0, %v884_v49 }
 0x986   :  { %v888_v18 = vmul.f32 0.5, %v886_v57  ;;  %v934_v57 = vmul.f32 0.399, %v2201_v8 }
 0x988   :  { %v890_v1 = vmul.f32 0.5, %v888_v18 }
 0x98a   :  { %894 = vrot.lane.b32.xlu1 %v890_v1, %s1499_s1 }
 0x98b   :  { %v802_v26 = vpop.permute.xlu0 %801  ;;  %v812_v9 = vpop.permute.xlu1 %811 }
 0x98c   :  { %v806_v51 = vadd.f32 %v802_v26, %v795_v14  ;;  %v816_v23 = vsub.f32 %v795_v14, %v812_v9  ;;  %v936_v26 = vperm.slane %v934_v57, 0 }
 0x98e   :  { %v808_v45 = vmul.f32 0.5, %v806_v51  ;;  %v828_v61 = vmul.f32 2.0, %v816_v23 }
 0x990   :  { %v818_v27 = vmul.f32 2.0, %v808_v45  ;;  %v1375_v40 = vadd.f32 -1.0, %v828_v61 }
 0x992   :  { %v1371_v28 = vadd.f32 -1.0, %v818_v27  ;;  %v832_v29 = vmul.f32 2.0, %v1375_v40 }
 0x994   :  { %v822_v30 = vmul.f32 2.0, %v1371_v28  ;;  %v1377_v32 = vclamps-f32 %v832_v29, 2.0 }
 0x996   :  { %v1373_v50 = vclamps-f32 %v822_v30, 2.0  ;;  %v846_v58 = vsub.f32 %v844_v31, %v1377_v32  ;;  %v863_v44 = vmul.f32 0.8046603, %v1377_v32  ;;  %v2339_v32 = vld [vmem:[%s2406_s7] ss:$0 sm:$0xff] }
 0x998   :  { %v840_v59 = vsub.f32 %v838_v47, %v1373_v50  ;;  %v848_v0 = vmul.f32 0.7190358, %v846_v58  ;;  %v853_v17 = vmul.f32 0.8046603, %v1373_v50 }
 0x99a   :  { %v842_v14 = vmul.f32 0.7190358, %v840_v59  ;;  %v865_v16 = vmul.f32 0.31500968, %v848_v0 }
 0x99c   :  { %v855_v4 = vmul.f32 0.31500968, %v842_v14  ;;  %v867_v12 = vadd.f32 %v865_v16, %v863_v44 }
 0x99e   :  { %v857_v3 = vadd.f32 %v855_v4, %v853_v17  ;;  %v2316_v53 = vadd.f32 %v867_v12, %v859_v6 }
 0x9a0   :  { %v1383_v39 = vclamps-f32 %v2316_v53, 2.0  ;;  %v2319_v46 = vadd.f32 %v859_v6, %v857_v3  ;;  %v2346_v6 = vld [vmem:[%s2410_s9] ss:$0 sm:$0xff] }
 0x9a1   :  { %v2353_v3 = vld [vmem:[%s2412_s11] ss:$0 sm:$0xff] }
 0x9a2   :  { %v885_v62 = vmul.f32 %v1383_v39, %v1579_v10  ;;  %v1381_v20 = vclamps-f32 %v2319_v46, 2.0 }
 0x9a4   :  { %v887_v52 = vadd.f32 1.0, %v885_v62  ;;  %v875_v24 = vmul.f32 %v1381_v20, %v1579_v10 }
 0x9a6   :  { %v889_v60 = vmul.f32 0.5, %v887_v52  ;;  %v877_v54 = vadd.f32 1.0, %v875_v24 }
 0x9a8   :  { %v891_v5 = vmul.f32 0.5, %v889_v60  ;;  %v879_v56 = vmul.f32 0.5, %v877_v54 }
 0x9aa   :  { %896 = vrot.lane.b32.xlu2 %v891_v5, %s1499_s1 }
 0x9fc   :  { %v895_v25 = vpop.permute.xlu1 %894 }
 0x9fd   :  { %v900_v33 = vsub.f32 %v878_v21, %v895_v25  ;;  %v902_v22 = vadd.f32 %v895_v25, %v878_v21 }
 0x9ff   :  { %918 = vperm.xlu1 %1422, %v902_v22   ;;  %906 = vperm.xlu0 %1424, %v900_v33  }
 0xa04   :  { %v897_v34 = vpop.permute.xlu2 %896 }
 0xa05   :  { %v901_v35 = vsub.f32 %v879_v56, %v897_v34  ;;  %v903_v36 = vadd.f32 %v897_v34, %v879_v56 }
 0xa07   :  { %923 = vperm.xlu0 %1424, %v903_v36   ;;  %911 = vperm.xlu2 %1423, %v901_v35  }
 0xa61   :  { %v912_v9 = vpop.permute.xlu2 %911 }
 0xa62   :  { %v915_v45 = vmul.f32 %v2189_v2, %v912_v9 }
 0xa71   :  { %v919_v15 = vpop.permute.xlu1 %918  ;;  %v907_v37 = vpop.permute.xlu0 %906 }
 0xa72   :  { %v926_v63 = vmul.f32 %v2195_v19, %v919_v15  ;;  %v914_v49 = vmul.f32 %v2189_v2, %v907_v37 }
 0xa74   :  { %v928_v18 = vadd.f32 %v926_v63, %v914_v49 }
 0xa76   :  { %v930_v1 = vadd.f32 %v2207_v7, %v928_v18 }
 0xa78   :  { %v932_v51 = vadd.f32 %v2213_v43, %v930_v1 }
 0xa79   :  { %v924_v23 = vpop.permute.xlu0 %923 }
 0xa7a   :  { %v927_v61 = vmul.f32 %v2195_v19, %v924_v23  ;;  %v938_v27 = vadd.f32 %v936_v26, %v932_v51 }
 0xa7c   :  { %v929_v40 = vadd.f32 %v927_v61, %v915_v45  ;;  %956 = vmatmul.f32.vlgmr.msra.gmra.mxu1 %v938_v27 }
 0xa7e   :  { %v931_v28 = vadd.f32 %v2207_v7, %v929_v40 }
 0xa80   :  { %v933_v29 = vadd.f32 %v2236_v42, %v931_v28  ;;  %v1098_v28 = vmul.f32 1.2427604, %v2316_v53 }
 0xa82   :  { %v939_v30 = vadd.f32 %v936_v26, %v933_v29 }
 0xa84   :  { %959 = vmatmul.f32.gmra.mxu1 %v939_v30 }
 0xaf9   :  { %v957_v31 = vpop.f32.mrf.mxu1 }
 0xafa   :  { %v958_v47 = vadd.f32 %v2339_v32, %v957_v31  ;;  %v1395_v31 = vld [vmem:[%s2413_s2 + $0x38] sm:$0x3] }
 0xafc   :  { %v963_v50 = vmax.f32 %v958_v47, 0.0 }
 0xafe   :  { %981 = vmatmul.f32.vlgmr.msra.gmra.mxu2 %v963_v50 }
 0xb01   :  { %v960_v55 = vpop.f32.mrf.mxu1 }
 0xb02   :  { %v961_v58 = vadd.f32 %v2339_v32, %v960_v55 }
 0xb04   :  { %v964_v59 = vmax.f32 %v961_v58, 0.0  ;;  %v1113_v58 = vmul.f32 0.28341576, %v1395_v31 }
 0xb06   :  { %984 = vmatmul.f32.gmra.mxu2 %v964_v59 }
 0xb81   :  { %v982_v0 = vpop.f32.mrf.mxu2 }
 0xb82   :  { %v983_v14 = vadd.f32 %v2346_v6, %v982_v0 }
 0xb84   :  { %v988_v44 = vmax.f32 %v983_v14, 0.0 }
 0xb86   :  { %1006 = vmatmul.f32.vlgmr.msra.gmra.mxu3 %v988_v44 }
 0xb89   :  { %v985_v16 = vpop.f32.mrf.mxu2 }
 0xb8a   :  { %v986_v17 = vadd.f32 %v2346_v6, %v985_v16 }
 0xb8c   :  { %v989_v4 = vmax.f32 %v986_v17, 0.0 }
 0xb8e   :  { %1009 = vmatmul.f32.gmra.mxu3 %v989_v4 }
 0xc09   :  { %v1007_v12 = vpop.f32.mrf.mxu3 }
 0xc0a   :  { %v1008_v39 = vadd.f32 %v2353_v3, %v1007_v12 }
 0xc0c   :  { %v1384_v62 = vmul.f32 -1.442695, %v1008_v39 }
 0xc0e   :  { %1457 = vpow2.f32 %v1384_v62 }
 0xc11   :  { %v1010_v52 = vpop.f32.mrf.mxu3 }
 0xc12   :  { %v1011_v60 = vadd.f32 %v2353_v3, %v1010_v52 }
 0xc14   :  { %v1458_v5 = vpop.eup %1457  ;;  %v1385_v13 = vmul.f32 -1.442695, %v1011_v60 }
 0xc15   :  { %v1019_v11 = vadd.f32 1.0, %v1458_v5 }
 0xc16   :  { %1459 = vpow2.f32 %v1385_v13  ;;  %v1097_v13 = vmul.f32 1.2427604, %v2306_v38 }
 0xc17   :  { %1461 = vrcp.f32 %v1019_v11  ;;  %v1032_v33 = vand.u32 2147483648, %v1019_v11  ;;  %v1030_v54 = vand.u32 2147483647, %v1019_v11  ;;  %vm1026_vm10 = vweird.f32 %v1019_v11 }
 0xc19   :  { %v1033_v35 = vor.u32 1.1754944e-38, %v1032_v33  ;;  %vm1031_vm12 = vcmp.eq.f32.partialorder %v1030_v54, 8.507059e+37  ;;  %v1091_v33 = vmul.f32 1.2427604, %v2303_v41 }
 0xc1c   :  { %v1460_v48 = vpop.eup %1459 }
 0xc1d   :  { %v1462_v20 = vpop.eup %1461  ;;  %v1020_v21 = vadd.f32 1.0, %v1460_v48 }
 0xc1e   :  { %v1022_v24 = vmul.f32 %v1462_v20, %v1019_v11  ;;  %vm1027_vm9 = vweird.f32 %v1462_v20 }
 0xc1f   :  { %1463 = vrcp.f32 %v1020_v21  ;;  %vm1028_vm11 = vmor %vm1026_vm10, %vm1027_vm9  ;;  %v1047_v49 = vand.u32 2147483648, %v1020_v21  ;;  %v1045_v18 = vand.u32 2147483647, %v1020_v21  ;;  %vm1041_vm14 = vweird.f32 %v1020_v21 }
 0xc20   :  { %v1023_v25 = vsub.f32 1.0, %v1022_v24  ;;  %vm1325_vm9 = vcmask 7168   ;;  %vm1328_vm10 = vcmask 15360  }
 0xc21   :  { %v1048_v26 = vor.u32 1.1754944e-38, %v1047_v49  ;;  %vm1046_vm0 = vcmp.eq.f32.partialorder %v1045_v18, 8.507059e+37 }
 0xc22   :  { %v1024_v22 = vmul.f32 %v1462_v20, %v1023_v25 }
 0xc24   :  { %v1025_v56 = vadd.f32 %v1462_v20, %v1024_v22 }
 0xc25   :  { %v1464_v34 = vpop.eup %1463 }
 0xc26   :  { %v1029_v36 = vsel %vm1028_vm11, %v1462_v20, %v1025_v56  ;;  %v1037_v15 = vmul.f32 %v1464_v34, %v1020_v21  ;;  %vm1042_vm13 = vweird.f32 %v1464_v34  ;;  %v1394_v56 = vld [vmem:[%s2413_s2 + $0x30] sm:$0xff]  ;;  %vm1330_vm11 = vcmask 9216  }
 0xc27   :  { %v1034_v37 = vsel %vm1031_vm12, %v1033_v35, %v1029_v36  ;;  %vm1043_vm15 = vmor %vm1041_vm14, %vm1042_vm13 }
 0xc28   :  { %1063 = vrot.lane.b32.xlu1 %v1034_v37, %s1501_s28  ;;  %1053 = vrot.lane.b32.xlu0 %v1034_v37, %s1499_s1  ;;  %v1038_v63 = vsub.f32 1.0, %v1037_v15 }
 0xc2a   :  { %v1039_v57 = vmul.f32 %v1464_v34, %v1038_v63  ;;  %v1112_v63 = vmul.f32 0.28341576, %v1394_v56 }
 0xc2c   :  { %v1040_v1 = vadd.f32 %v1464_v34, %v1039_v57 }
 0xc2e   :  { %v1044_v9 = vsel %vm1043_vm15, %v1464_v34, %v1040_v1 }
 0xc2f   :  { %v1049_v51 = vsel %vm1046_vm0, %v1048_v26, %v1044_v9 }
 0xc30   :  { %1055 = vrot.lane.b32.xlu1 %v1049_v51, %s1499_s1  ;;  %1065 = vrot.lane.b32.xlu2 %v1049_v51, %s1501_s28 }
 0xc8a   :  { %v1066_v23 = vpop.permute.xlu2 %1065 }
 0xc8b   :  { %v1070_v45 = vsub.f32 %v1049_v51, %v1066_v23  ;;  %v1092_v23 = vmul.f32 1.2427604, %v2319_v46 }
 0xc8d   :  { %v1082_v61 = vmul.f32 2.0, %v1070_v45 }
 0xc8f   :  { %v1391_v27 = vadd.f32 -1.0, %v1082_v61 }
 0xc91   :  { %v1086_v40 = vmul.f32 2.0, %v1391_v27 }
 0xc93   :  { %v1393_v29 = vclamps-f32 %v1086_v40, 2.0 }
 0xc95   :  { %v1100_v30 = vsub.f32 %v1098_v28, %v1393_v29  ;;  %v1117_v50 = vmul.f32 0.948001, %v1393_v29 }
 0xc97   :  { %v1102_v47 = vmul.f32 1.3552506, %v1100_v30 }
 0xc99   :  { %v1119_v55 = vmul.f32 0.14480877, %v1102_v47 }
 0xc9a   :  { %v1064_v59 = vpop.permute.xlu1 %1063  ;;  %v1054_v0 = vpop.permute.xlu0 %1053 }
 0xc9b   :  { %v1121_v14 = vadd.f32 %v1119_v55, %v1117_v50  ;;  %v1069_v44 = vsub.f32 %v1034_v37, %v1064_v59  ;;  %v1059_v16 = vadd.f32 %v1054_v0, %v1034_v37 }
 0xc9d   :  { %v1081_v17 = vmul.f32 2.0, %v1069_v44  ;;  %v1061_v4 = vmul.f32 0.5, %v1059_v16  ;;  %v1123_v12 = vadd.f32 %v1121_v14, %v1113_v58 }
 0xc9f   :  { %v1390_v39 = vadd.f32 -1.0, %v1081_v17  ;;  %v1071_v53 = vmul.f32 2.0, %v1061_v4  ;;  %v1399_v62 = vclamps-f32 %v1123_v12, 2.0 }
 0xca1   :  { %v1085_v52 = vmul.f32 2.0, %v1390_v39  ;;  %v1386_v60 = vadd.f32 -1.0, %v1071_v53  ;;  %v1139_v5 = vmul.f32 %v1399_v62, %v1579_v10 }
 0xca2   :  { %v1056_v11 = vpop.permute.xlu1 %1055 }
 0xca3   :  { %v1392_v48 = vclamps-f32 %v1085_v52, 2.0  ;;  %v1075_v20 = vmul.f32 2.0, %v1386_v60  ;;  %v1060_v21 = vadd.f32 %v1056_v11, %v1049_v51  ;;  %v1141_v24 = vadd.f32 1.0, %v1139_v5 }
 0xca5   :  { %v1099_v25 = vsub.f32 %v1097_v13, %v1392_v48  ;;  %v1388_v22 = vclamps-f32 %v1075_v20, 2.0  ;;  %v1062_v54 = vmul.f32 0.5, %v1060_v21  ;;  %v1143_v34 = vmul.f32 0.5, %v1141_v24 }
 0xca6   :  { %v1116_v37 = vmul.f32 0.948001, %v1392_v48  ;;  %v1188_v24 = vmul.f32 0.199, %v2201_v8 }
 0xca7   :  { %v1101_v35 = vmul.f32 1.3552506, %v1099_v25  ;;  %v1093_v36 = vsub.f32 %v1091_v33, %v1388_v22  ;;  %v1072_v15 = vmul.f32 2.0, %v1062_v54  ;;  %v1145_v38 = vmul.f32 0.5, %v1143_v34 }
 0xca8   :  { %v1106_v41 = vmul.f32 0.948001, %v1388_v22  ;;  %v1190_v33 = vperm.slane %v1188_v24, 0 }
 0xca9   :  { %v1118_v49 = vmul.f32 0.14480877, %v1101_v35  ;;  %v1095_v57 = vmul.f32 1.3552506, %v1093_v36  ;;  %v1387_v18 = vadd.f32 -1.0, %v1072_v15  ;;  %1150 = vrot.lane.b32.xlu0 %v1145_v38, %s1499_s1 }
 0xcab   :  { %v1120_v1 = vadd.f32 %v1118_v49, %v1116_v37  ;;  %v1108_v26 = vmul.f32 0.14480877, %v1095_v57  ;;  %v1076_v9 = vmul.f32 2.0, %v1387_v18 }
 0xcad   :  { %v1110_v51 = vadd.f32 %v1108_v26, %v1106_v41  ;;  %v1389_v45 = vclamps-f32 %v1076_v9, 2.0  ;;  %v1122_v61 = vadd.f32 %v1120_v1, %v1112_v63 }
 0xcaf   :  { %v1094_v27 = vsub.f32 %v1092_v23, %v1389_v45  ;;  %v1398_v40 = vclamps-f32 %v1122_v61, 2.0  ;;  %v1114_v28 = vadd.f32 %v1112_v63, %v1110_v51  ;;  %v1107_v31 = vmul.f32 0.948001, %v1389_v45 }
 0xcb1   :  { %v1096_v29 = vmul.f32 1.3552506, %v1094_v27  ;;  %v1138_v30 = vmul.f32 %v1398_v40, %v1579_v10  ;;  %v1396_v44 = vclamps-f32 %v1114_v28, 2.0 }
 0xcb3   :  { %v1109_v47 = vmul.f32 0.14480877, %v1096_v29  ;;  %v1140_v50 = vadd.f32 1.0, %v1138_v30  ;;  %v1128_v46 = vmul.f32 %v1396_v44, %v1579_v10 }
 0xcb5   :  { %v1111_v55 = vadd.f32 %v1109_v47, %v1107_v31  ;;  %v1142_v59 = vmul.f32 0.5, %v1140_v50  ;;  %v1130_v16 = vadd.f32 1.0, %v1128_v46 }
 0xcb7   :  { %v1144_v0 = vmul.f32 0.5, %v1142_v59  ;;  %v1115_v14 = vadd.f32 %v1113_v58, %v1111_v55  ;;  %v1132_v4 = vmul.f32 0.5, %v1130_v16 }
 0xcb9   :  { %1148 = vrot.lane.b32.xlu2 %v1144_v0, %s1499_s1  ;;  %v1397_v17 = vclamps-f32 %v1115_v14, 2.0 }
 0xcbb   :  { %v1129_v39 = vmul.f32 %v1397_v17, %v1579_v10 }
 0xcbd   :  { %v1131_v52 = vadd.f32 1.0, %v1129_v39 }
 0xcbf   :  { %v1133_v60 = vmul.f32 0.5, %v1131_v52 }
 0xd13   :  { %v1149_v12 = vpop.permute.xlu2 %1148 }
 0xd14   :  { %v1154_v53 = vsub.f32 %v1132_v4, %v1149_v12  ;;  %v1156_v62 = vadd.f32 %v1149_v12, %v1132_v4 }
 0xd16   :  { %1172 = vperm.xlu2 %1423, %v1156_v62   ;;  %1160 = vperm.xlu1 %1422, %v1154_v53  }
 0xd1b   :  { %v1151_v5 = vpop.permute.xlu0 %1150 }
 0xd1c   :  { %v1155_v13 = vsub.f32 %v1133_v60, %v1151_v5  ;;  %v1157_v58 = vadd.f32 %v1151_v5, %v1133_v60 }
 0xd1e   :  { %1165 = vperm.xlu0 %1424, %v1155_v13   ;;  %1177 = vperm.xlu1 %1422, %v1157_v58  }
 0xd70   :  { %v1173_v11 = vpop.permute.xlu2 %1172 }
 0xd71   :  { %v1180_v20 = vmul.f32 %v2195_v19, %v1173_v11 }
 0xd88   :  { %v1161_v48 = vpop.permute.xlu1 %1160 }
 0xd89   :  { %v1168_v21 = vmul.f32 %v2189_v2, %v1161_v48 }
 0xd8b   :  { %v1182_v10 = vadd.f32 %v1180_v20, %v1168_v21 }
 0xd8d   :  { %v1184_v25 = vadd.f32 %v2207_v7, %v1182_v10 }
 0xd8f   :  { %v1186_v22 = vadd.f32 %v2213_v43, %v1184_v25 }
 0xd90   :  { %v1166_v54 = vpop.permute.xlu0 %1165  ;;  %v1178_v56 = vpop.permute.xlu1 %1177 }
 0xd91   :  { %v1192_v34 = vadd.f32 %v1190_v33, %v1186_v22  ;;  %v1169_v35 = vmul.f32 %v2189_v2, %v1166_v54  ;;  %v1181_v36 = vmul.f32 %v2195_v19, %v1178_v56 }
 0xd93   :  { %1210 = vmatmul.f32.vlgmr.msrb.gmra.mxu0 %v1192_v34  ;;  %v1183_v15 = vadd.f32 %v1181_v36, %v1169_v35 }
 0xd95   :  { %v1185_v37 = vadd.f32 %v2207_v7, %v1183_v15 }
 0xd97   :  { %v1187_v38 = vadd.f32 %v2236_v42, %v1185_v37 }
 0xd99   :  { %v1193_v8 = vadd.f32 %v1190_v33, %v1187_v38 }
 0xd9b   :  { %1213 = vmatmul.f32.vlgmr.msrb.gmra.mxu3 %v1193_v8 }
 0xe10   :  { %v1211_v63 = vpop.f32.mrf.mxu0 }
 0xe11   :  { %v1212_v49 = vadd.f32 %v2339_v32, %v1211_v63 }
 0xe13   :  { %v1217_v57 = vmax.f32 %v1212_v49, 0.0 }
 0xe15   :  { %1235 = vmatmul.f32.vlgmr.msrb.gmra.mxu1 %v1217_v57 }
 0xe1e   :  { %v1214_v43 = vpop.f32.mrf.mxu3 }
 0xe1f   :  { %v1215_v18 = vadd.f32 %v2339_v32, %v1214_v43 }
 0xe21   :  { %v1218_v1 = vmax.f32 %v1215_v18, 0.0 }
 0xe23   :  { %1238 = vmatmul.f32.gmra.mxu1 %v1218_v1 }
 0xe92   :  { %v1236_v2 = vpop.f32.mrf.mxu1 }
 0xe93   :  { %v1237_v19 = vadd.f32 %v2346_v6, %v1236_v2 }
 0xe95   :  { %v1242_v41 = vmax.f32 %v1237_v19, 0.0 }
 0xe97   :  { %1260 = vmatmul.f32.vlgmr.msrb.gmra.mxu2 %v1242_v41 }
 0xea0   :  { %v1239_v7 = vpop.f32.mrf.mxu1 }
 0xea1   :  { %v1240_v42 = vadd.f32 %v2346_v6, %v1239_v7 }
 0xea3   :  { %v1243_v26 = vmax.f32 %v1240_v42, 0.0 }
 0xea5   :  { %1263 = vmatmul.f32.gmra.mxu2 %v1243_v26 }
 0xf1a   :  { %v1261_v9 = vpop.f32.mrf.mxu2 }
 0xf1b   :  { %v1262_v51 = vadd.f32 %v2353_v3, %v1261_v9 }
 0xf1d   :  { %v1400_v23 = vmul.f32 -1.442695, %v1262_v51 }
 0xf1f   :  { %1465 = vpow2.f32 %v1400_v23 }
 0xf25   :  { %v1466_v45 = vpop.eup %1465 }
 0xf26   :  { %v1273_v61 = vadd.f32 1.0, %v1466_v45 }
 0xf28   :  { %1467 = vrcp.f32 %v1273_v61  ;;  %v1264_v32 = vpop.f32.mrf.mxu2  ;;  %v1286_v31 = vand.u32 2147483648, %v1273_v61  ;;  %v1284_v47 = vand.u32 2147483647, %v1273_v61  ;;  %vm1280_vm2 = vweird.f32 %v1273_v61 }
 0xf29   :  { %v1265_v27 = vadd.f32 %v2353_v3, %v1264_v32 }
 0xf2a   :  { %v1287_v0 = vor.u32 1.1754944e-38, %v1286_v31  ;;  %vm1285_vm4 = vcmp.eq.f32.partialorder %v1284_v47, 8.507059e+37 }
 0xf2b   :  { %v1401_v40 = vmul.f32 -1.442695, %v1265_v27 }
 0xf2d   :  { %1469 = vpow2.f32 %v1401_v40 }
 0xf2e   :  { %v1468_v28 = vpop.eup %1467 }
 0xf2f   :  { %v1276_v29 = vmul.f32 %v1468_v28, %v1273_v61  ;;  %vm1281_vm1 = vweird.f32 %v1468_v28 }
 0xf30   :  { %vm1282_vm3 = vmor %vm1280_vm2, %vm1281_vm1 }
 0xf31   :  { %v1277_v30 = vsub.f32 1.0, %v1276_v29 }
 0xf33   :  { %v1278_v6 = vmul.f32 %v1468_v28, %v1277_v30  ;;  %v1470_v50 = vpop.eup %1469 }
 0xf34   :  { %v1274_v55 = vadd.f32 1.0, %v1470_v50 }
 0xf35   :  { %v1279_v59 = vadd.f32 %v1468_v28, %v1278_v6 }
 0xf36   :  { %1471 = vrcp.f32 %v1274_v55  ;;  %v1301_v17 = vand.u32 2147483648, %v1274_v55  ;;  %v1299_v12 = vand.u32 2147483647, %v1274_v55  ;;  %vm1295_vm6 = vweird.f32 %v1274_v55 }
 0xf37   :  { %v1283_v14 = vsel %vm1282_vm3, %v1468_v28, %v1279_v59 }
 0xf38   :  { %v1288_v44 = vsel %vm1285_vm4, %v1287_v0, %v1283_v14  ;;  %v1302_v53 = vor.u32 1.1754944e-38, %v1301_v17  ;;  %vm1300_vm8 = vcmp.eq.f32.partialorder %v1299_v12, 8.507059e+37 }
 0xf39   :  { %1317 = vrot.lane.b32.xlu1 %v1288_v44, %s1501_s28  ;;  %1307 = vrot.lane.b32.xlu2 %v1288_v44, %s1499_s1 }
 0xf3c   :  { %v1472_v3 = vpop.eup %1471 }
 0xf3d   :  { %v1291_v46 = vmul.f32 %v1472_v3, %v1274_v55  ;;  %vm1296_vm5 = vweird.f32 %v1472_v3 }
 0xf3e   :  { %vm1297_vm7 = vmor %vm1295_vm6, %vm1296_vm5 }
 0xf3f   :  { %v1292_v16 = vsub.f32 1.0, %v1291_v46 }
 0xf41   :  { %v1293_v4 = vmul.f32 %v1472_v3, %v1292_v16 }
 0xf43   :  { %v1294_v39 = vadd.f32 %v1472_v3, %v1293_v4 }
 0xf45   :  { %v1298_v62 = vsel %vm1297_vm7, %v1472_v3, %v1294_v39 }
 0xf46   :  { %v1303_v52 = vsel %vm1300_vm8, %v1302_v53, %v1298_v62 }
 0xf47   :  { %1319 = vrot.lane.b32.xlu2 %v1303_v52, %s1501_s28  ;;  %1309 = vrot.lane.b32.xlu0 %v1303_v52, %s1499_s1 }
 0xf93   :  { %v1308_v60 = vpop.permute.xlu2 %1307 }
 0xf94   :  { %v1313_v5 = vadd.f32 %v1308_v60, %v1288_v44 }
 0xf96   :  { %v1315_v58 = vmul.f32 0.5, %v1313_v5 }
 0xfa1   :  { %v1320_v20 = vpop.permute.xlu2 %1319 }
 0xfa2   :  { %v1324_v10 = vsub.f32 %v1303_v52, %v1320_v20 }
 0xfab   :  { %v1318_v13 = vpop.permute.xlu1 %1317 }
 0xfac   :  { %v1323_v11 = vsub.f32 %v1288_v44, %v1318_v13 }
 0xfae   :  { %v1326_v48 = vsel %vm1325_vm9, %v1315_v58, %v1323_v11 }
 0xfaf   :  { %1329 = vst.msk [vmem:[%s2414_s12] sm:$0xff] %vm1328_vm10, %v1326_v48 }
 0xfb9   :  { %v1310_v21 = vpop.permute.xlu0 %1309 }
 0xfba   :  { %v1314_v24 = vadd.f32 %v1310_v21, %v1303_v52 }
 0xfbc   :  { %v1316_v25 = vmul.f32 0.5, %v1314_v24 }
 0xfbe   :  { %v1327_v33 = vsel %vm1325_vm9, %v1316_v25, %v1324_v10 }
 0xfbf   :  { %1331 = vst.msk [vmem:[%s2414_s12 + $0x8] sm:$0x3] %vm1330_vm11, %v1327_v33 }

// kernel: diffusionvg_forward.5
= control target key start
LH: loop header
LB: loop body
LE: loop exit
PB: predicated region body
PF: predicated region fallthrough
CT: control target
= control target key end

     0   :  { %13 = vsyncpa [#allocation3], 0  ;;  %s2203_s0 = inlined_call_operand.hbm [shape: f32[32,1024], index: 0, kind: input, shape index: {}]   ;;  %s2204_s1 = inlined_call_operand.vmem [shape: f32[32,128], index: 1, kind: input, shape index: {}]   ;;  %s2205_s2 = inlined_call_operand.vmem [shape: f32[1,1024], index: 2, kind: input, shape index: {}]   ;;  %s2206_s3 = inlined_call_operand.vmem [shape: f32[1,1024], index: 3, kind: input, shape index: {}]   ;;  %s2207_s4 = inlined_call_operand.hbm [shape: bf16[1024,128], index: 4, kind: input, shape index: {}]   ;;  %s2208_s5 = inlined_call_operand.vmem [shape: f32[1,128], index: 5, kind: input, shape index: {}]   ;;  %s2209_s6 = inlined_call_operand.vmem [shape: f32[128,128], index: 6, kind: input, shape index: {}]   ;;  %s2210_s7 = inlined_call_operand.vmem [shape: f32[1,128], index: 7, kind: input, shape index: {}]   ;;  %s2211_s8 = inlined_call_operand.vmem [shape: f32[32,128], index: 8, kind: output, shape index: {}]  }
   0x1   :  { %s19_s29 = sshll.u32 %s2203_s0, 4  ;;  %s20_s29 = int_to_ptr.hbm [resolvable:$true] %s19_s29 }
   0x2   :  { %14 = vsyncpa [#allocation5], 0  ;;  %s1617_s30 = smov [#allocation2]   ;;  %s38_s12 = sshll.u32 %s2207_s4, 4  ;;  %s39_s12 = int_to_ptr.hbm [resolvable:$true] %s38_s12 }
   0x3   :  { %s21_s9 = sshll.u32 %s1617_s30, 4  ;;  %s1618_s13 = smov 1024   ;;  %s22_s9 = int_to_ptr.vmem [resolvable:$true] %s21_s9 }
   0x4   :  { %s1619_s14 = smov 64   ;;  %s1620_s15 = smov [#allocation4]  }
   0x5   :  { %27 = dma.hbm_to_vmem [thread:$0]  %s20_s29, 4096, %s22_s9, [#allocation3], %s1618_s13, %s1618_s13, %s1619_s14  }
   0x6   :  { %s40_s16 = sshll.u32 %s1620_s15, 4  ;;  %s1621_s17 = smov 4   ;;  %s41_s16 = int_to_ptr.vmem [resolvable:$true] %s40_s16 }
   0x7   :  { %46 = dma.hbm_to_vmem [thread:$0]  %s39_s12, 8192, %s41_s16, [#allocation5], %s1619_s14, %s1619_s14, %s1621_s17  }
   0x8   :  { %1613 = dma.done.wait [#allocation3], 4096  }
   0x9   :  { %1614 = vsyncadd [#allocation3], 4294963200 }
   0xa   :  { %1615 = dma.done.wait [#allocation5], 8192  }
   0xb   :  { %1616 = vsyncadd [#allocation5], 4294959104  ;;  %v1674_v0 = vld [vmem:[#allocation2 + $0x80] sm:$0xff]  ;;  %v1676_v1 = vld [vmem:[#allocation2 + $0x88] sm:$0xff]  ;;  %v1622_v60 = vmov 1024.0  }
   0xc   :  { %v1678_v2 = vld [vmem:[#allocation2 + $0x90] sm:$0xff]  ;;  %v111_v3 = vadd.f32 %v1676_v1, %v1674_v0  ;;  %v1682_v4 = vld [vmem:[#allocation2 + $0x98] sm:$0xff]  ;;  %v1684_v5 = vld [vmem:[#allocation2] sm:$0xff]  ;;  %1555 = vrcp.f32 %v1622_v60 }
   0xd   :  { %v1687_v7 = vld [vmem:[#allocation2 + $0x8] sm:$0xff]  ;;  %v1689_v8 = vld [vmem:[#allocation2 + $0x10] sm:$0xff]  ;;  %v1691_v9 = vld [vmem:[#allocation2 + $0xa0] sm:$0xff] }
   0xe   :  { %v112_v6 = vadd.f32 %v111_v3, %v1678_v2  ;;  %v93_v10 = vadd.f32 %v1687_v7, %v1684_v5  ;;  %v1696_v12 = vld [vmem:[#allocation2 + $0x18] sm:$0xff]  ;;  %v1698_v13 = vld [vmem:[#allocation2 + $0xc0] sm:$0xff]  ;;  %v1700_v14 = vld [vmem:[#allocation2 + $0xc8] sm:$0xff] }
   0xf   :  { %v1702_v15 = vld [vmem:[#allocation2 + $0xa8] sm:$0xff]  ;;  %v1705_v17 = vld [vmem:[#allocation2 + $0xd0] sm:$0xff]  ;;  %v120_v18 = vadd.f32 %v1700_v14, %v1698_v13  ;;  %v1712_v21 = vld [vmem:[#allocation2 + $0x20] sm:$0xff] }
  0x10   :  { %v113_v11 = vadd.f32 %v112_v6, %v1682_v4  ;;  %v94_v16 = vadd.f32 %v93_v10, %v1689_v8  ;;  %v1709_v19 = vld [vmem:[#allocation2 + $0xb0] sm:$0xff]  ;;  %v1714_v22 = vld [vmem:[#allocation2 + $0xd8] sm:$0xff]  ;;  %v1718_v25 = vld [vmem:[#allocation2 + $0x40] sm:$0xff] }
  0x11   :  { %v121_v24 = vadd.f32 %v120_v18, %v1705_v17  ;;  %v1720_v26 = vld [vmem:[#allocation2 + $0x48] sm:$0xff]  ;;  %v1722_v27 = vld [vmem:[#allocation2 + $0x50] sm:$0xff]  ;;  %v1727_v30 = vld [vmem:[#allocation2 + $0xe0] sm:$0xff] }
  0x12   :  { %v114_v20 = vadd.f32 %v113_v11, %v1691_v9  ;;  %v95_v23 = vadd.f32 %v94_v16, %v1696_v12  ;;  %v1725_v29 = vld [vmem:[#allocation2 + $0x28] sm:$0xff]  ;;  %v102_v31 = vadd.f32 %v1720_v26, %v1718_v25  ;;  %v84_v32 = vld [vmem:[#allocation2 + $0xb8] sm:$0xff]  ;;  %v1736_v37 = vld [vmem:[#allocation2 + $0x30] sm:$0xff]  ;;  %v1556_v61 = vpop.eup %1555 }
  0x13   :  { %v122_v34 = vadd.f32 %v121_v24, %v1714_v22  ;;  %v1733_v35 = vld [vmem:[#allocation2 + $0x58] sm:$0xff]  ;;  %v1738_v38 = vld [vmem:[#allocation2 + $0xe8] sm:$0xff]  ;;  %v1743_v42 = vld [vmem:[#allocation2 + $0x60] sm:$0xff]  ;;  %v130_v62 = vmul.f32 1024.0, %v1556_v61  ;;  %vm134_vm0 = vweird.f32 %v1556_v61 }
  0x14   :  { %v115_v28 = vadd.f32 %v114_v20, %v1702_v15  ;;  %v96_v33 = vadd.f32 %v95_v23, %v1712_v21  ;;  %v103_v39 = vadd.f32 %v102_v31, %v1722_v27  ;;  %v1745_v44 = vld [vmem:[#allocation2 + $0x38] sm:$0xff]  ;;  %v1747_v45 = vld [vmem:[#allocation2 + $0xf0] sm:$0xff]  ;;  %v1752_v49 = vld [vmem:[#allocation2 + $0x68] sm:$0xff] }
  0x15   :  { %v123_v41 = vadd.f32 %v122_v34, %v1727_v30  ;;  %v1756_v52 = vld [vmem:[#allocation2 + $0xf8] sm:$0xff]  ;;  %v1759_v54 = vld [vmem:[#allocation2 + $0x70] sm:$0xff]  ;;  %v131_v63 = vsub.f32 1.0, %v130_v62 }
  0x16   :  { %v116_v36 = vadd.f32 %v115_v28, %v1709_v19  ;;  %v97_v40 = vadd.f32 %v96_v33, %v1725_v29  ;;  %v104_v46 = vadd.f32 %v103_v39, %v1733_v35  ;;  %v1763_v57 = vld [vmem:[#allocation2 + $0x78] sm:$0xff] }
  0x17   :  { %v124_v48 = vadd.f32 %v123_v41, %v1738_v38  ;;  %v132_v3 = vmul.f32 %v1556_v61, %v131_v63 }
  0x18   :  { %v117_v43 = vadd.f32 %v116_v36, %v84_v32  ;;  %v98_v47 = vadd.f32 %v97_v40, %v1736_v37  ;;  %v105_v50 = vadd.f32 %v104_v46, %v1743_v42 }
  0x19   :  { %v125_v53 = vadd.f32 %v124_v48, %v1747_v45  ;;  %v133_v6 = vadd.f32 %v1556_v61, %v132_v3 }
  0x1a   :  { %118 = vadd.xlane.f32.xlu1 %v117_v43  ;;  %v99_v51 = vadd.f32 %v98_v47, %v1745_v44  ;;  %v106_v55 = vadd.f32 %v105_v50, %v1752_v49 }
  0x1b   :  { %v126_v56 = vadd.f32 %v125_v53, %v1756_v52  ;;  %v1767_v10 = vsel %vm134_vm0, %v1556_v61, %v133_v6 }
  0x1c   :  { %100 = vadd.xlane.f32.xlu0 %v99_v51  ;;  %v107_v58 = vadd.f32 %v106_v55, %v1759_v54 }
  0x1e   :  { %v108_v59 = vadd.f32 %v107_v58, %v1763_v57 }
  0x22   :  { %127 = vadd.xlane.f32.xlu1 %v126_v56 }
  0x24   :  { %109 = vadd.xlane.f32.xlu0 %v108_v59 }
  0x8d   :  { %v119_v11 = vpop.xlane.xlu1 %118 }
  0x8e   :  { %v138_v16 = vmul.f32 %v1767_v10, %v119_v11 }
  0x8f   :  { %v101_v18 = vpop.xlane.xlu0 %100 }
  0x90   :  { %v1771_v20 = vsub.f32 %v1674_v0, %v138_v16  ;;  %v1774_v23 = vsub.f32 %v1676_v1, %v138_v16  ;;  %v1777_v24 = vsub.f32 %v1678_v2, %v138_v16  ;;  %v1780_v28 = vsub.f32 %v1682_v4, %v138_v16 }
  0x91   :  { %v136_v31 = vmul.f32 %v1767_v10, %v101_v18  ;;  %v1784_v33 = vsub.f32 %v1691_v9, %v138_v16  ;;  %v1793_v2 = vsub.f32 %v1702_v15, %v138_v16  ;;  %v1796_v4 = vsub.f32 %v1709_v19, %v138_v16 }
  0x92   :  { %v188_v34 = vmul.f32 %v1771_v20, %v1771_v20  ;;  %v189_v0 = vmul.f32 %v1774_v23, %v1774_v23  ;;  %v190_v1 = vmul.f32 %v1777_v24, %v1777_v24  ;;  %v1798_v36 = vsub.f32 %v84_v32, %v138_v16 }
  0x93   :  { %v191_v9 = vmul.f32 %v1780_v28, %v1780_v28  ;;  %v1803_v40 = vsub.f32 %v1684_v5, %v136_v31  ;;  %v1806_v41 = vsub.f32 %v1687_v7, %v136_v31  ;;  %v1809_v46 = vsub.f32 %v1689_v8, %v136_v31 }
  0x94   :  { %v222_v39 = vadd.f32 %v189_v0, %v188_v34  ;;  %v192_v19 = vmul.f32 %v1784_v33, %v1784_v33  ;;  %v193_v47 = vmul.f32 %v1793_v2, %v1793_v2  ;;  %v1817_v48 = vsub.f32 %v1696_v12, %v136_v31 }
  0x95   :  { %v128_v43 = vpop.xlane.xlu1 %127  ;;  %v172_v5 = vmul.f32 %v1803_v40, %v1803_v40  ;;  %v173_v7 = vmul.f32 %v1806_v41, %v1806_v41  ;;  %v194_v50 = vmul.f32 %v1796_v4, %v1796_v4  ;;  %v195_v51 = vmul.f32 %v1798_v36, %v1798_v36 }
  0x96   :  { %v139_v15 = vmul.f32 %v1767_v10, %v128_v43  ;;  %v223_v32 = vadd.f32 %v222_v39, %v190_v1  ;;  %v1828_v55 = vsub.f32 %v1712_v21, %v136_v31  ;;  %v1831_v12 = vsub.f32 %v1725_v29, %v136_v31 }
  0x97   :  { %v110_v8 = vpop.xlane.xlu0 %109  ;;  %v174_v56 = vmul.f32 %v1809_v46, %v1809_v46  ;;  %v204_v58 = vadd.f32 %v173_v7, %v172_v5  ;;  %v1849_v63 = vsub.f32 %v1736_v37, %v136_v31  ;;  %v175_v3 = vmul.f32 %v1817_v48, %v1817_v48 }
  0x98   :  { %v224_v53 = vadd.f32 %v223_v32, %v191_v9  ;;  %v1836_v59 = vsub.f32 %v1698_v13, %v139_v15  ;;  %v1839_v61 = vsub.f32 %v1700_v14, %v139_v15  ;;  %v1842_v62 = vsub.f32 %v1705_v17, %v139_v15 }
  0x99   :  { %v1845_v21 = vsub.f32 %v1714_v22, %v139_v15  ;;  %v137_v29 = vmul.f32 %v1767_v10, %v110_v8  ;;  %v205_v13 = vadd.f32 %v204_v58, %v174_v56  ;;  %v1854_v11 = vsub.f32 %v1745_v44, %v136_v31 }
  0x9a   :  { %v225_v60 = vadd.f32 %v224_v53, %v192_v19  ;;  %v196_v14 = vmul.f32 %v1836_v59, %v1836_v59  ;;  %v197_v17 = vmul.f32 %v1839_v61, %v1839_v61  ;;  %v176_v22 = vmul.f32 %v1828_v55, %v1828_v55 }
  0x9b   :  { %v206_v16 = vadd.f32 %v205_v13, %v175_v3  ;;  %v1863_v37 = vsub.f32 %v1727_v30, %v139_v15  ;;  %v198_v18 = vmul.f32 %v1842_v62, %v1842_v62  ;;  %v177_v44 = vmul.f32 %v1831_v12, %v1831_v12 }
  0x9c   :  { %v226_v6 = vadd.f32 %v225_v60, %v193_v47  ;;  %v1870_v31 = vsub.f32 %v1738_v38, %v139_v15  ;;  %v199_v0 = vmul.f32 %v1845_v21, %v1845_v21  ;;  %v231_v9 = vadd.f32 %v197_v17, %v196_v14 }
  0x9d   :  { %v207_v1 = vadd.f32 %v206_v16, %v176_v22  ;;  %v1875_v39 = vsub.f32 %v1718_v25, %v137_v29  ;;  %v1878_v30 = vsub.f32 %v1720_v26, %v137_v29  ;;  %v178_v19 = vmul.f32 %v1849_v63, %v1849_v63 }
  0x9e   :  { %v227_v34 = vadd.f32 %v226_v6, %v194_v50  ;;  %v1883_v32 = vsub.f32 %v1722_v27, %v137_v29  ;;  %v1886_v47 = vsub.f32 %v1747_v45, %v139_v15  ;;  %v200_v5 = vmul.f32 %v1863_v37, %v1863_v37 }
  0x9f   :  { %v208_v38 = vadd.f32 %v207_v1, %v177_v44  ;;  %v232_v7 = vadd.f32 %v231_v9, %v198_v18  ;;  %v179_v25 = vmul.f32 %v1854_v11, %v1854_v11  ;;  %v1893_v26 = vsub.f32 %v1733_v35, %v137_v29 }
  0xa0   :  { %v228_v43 = vadd.f32 %v227_v34, %v195_v51  ;;  %v180_v8 = vmul.f32 %v1875_v39, %v1875_v39  ;;  %v181_v27 = vmul.f32 %v1878_v30, %v1878_v30  ;;  %v1900_v45 = vsub.f32 %v1756_v52, %v139_v15 }
  0xa1   :  { %v209_v50 = vadd.f32 %v208_v38, %v178_v19  ;;  %v201_v51 = vmul.f32 %v1870_v31, %v1870_v31  ;;  %v233_v53 = vadd.f32 %v232_v7, %v199_v0  ;;  %v1905_v56 = vsub.f32 %v1743_v42, %v137_v29  ;;  %v1442_v38 = vld [vmem:[#allocation4 + $0x38] sm:$0xff]  ;;  %v1441_v7 = vld [vmem:[#allocation4 + $0x30] sm:$0xff] }
  0xa2   :  { %229 = vadd.xlane.f32.xlu0 %v228_v43  ;;  %v182_v35 = vmul.f32 %v1883_v32, %v1883_v32  ;;  %v213_v58 = vadd.f32 %v181_v27, %v180_v8  ;;  %v202_v3 = vmul.f32 %v1886_v47, %v1886_v47  ;;  %v1912_v6 = vsub.f32 %v1752_v49, %v137_v29  ;;  %v1457_v8 = vld [vmem:[#allocation4 + $0xb0] sm:$0xff] }
  0xa3   :  { %v210_v60 = vadd.f32 %v209_v50, %v179_v25  ;;  %v234_v13 = vadd.f32 %v233_v53, %v200_v5  ;;  %v183_v52 = vmul.f32 %v1893_v26, %v1893_v26  ;;  %v203_v42 = vmul.f32 %v1900_v45, %v1900_v45  ;;  %v1450_v5 = vld [vmem:[#allocation4 + $0x78] sm:$0xff]  ;;  %952 = vmatpush.bf16.msra.mxu0 %v1442_v38  ;;  %v1449_v25 = vld [vmem:[#allocation4 + $0x70] sm:$0xff]  ;;  %v1440_v50 = vld [vmem:[#allocation4 + $0x28] sm:$0xff] }
  0xa4   :  { %v214_v15 = vadd.f32 %v213_v58, %v182_v35  ;;  %v1919_v17 = vsub.f32 %v1759_v54, %v137_v29  ;;  %v184_v22 = vmul.f32 %v1905_v56, %v1905_v56  ;;  %v1924_v49 = vsub.f32 %v1763_v57, %v137_v29  ;;  %v1458_v57 = vld [vmem:[#allocation4 + $0xb8] sm:$0xff]  ;;  %971 = vmatpush.bf16.msra.mxu1 %v1450_v5  ;;  %v1465_v27 = vld [vmem:[#allocation4 + $0xf0] sm:$0xff]  ;;  %v1456_v53 = vld [vmem:[#allocation4 + $0xa8] sm:$0xff] }
  0xa5   :  { %211 = vadd.xlane.f32.xlu2 %v210_v60  ;;  %v235_v14 = vadd.f32 %v234_v13, %v201_v51  ;;  %v185_v34 = vmul.f32 %v1912_v6, %v1912_v6  ;;  %v1466_v29 = vld [vmem:[#allocation4 + $0xf8] sm:$0xff]  ;;  %990 = vmatpush.bf16.msra.mxu2 %v1458_v57  ;;  %v1448_v51 = vld [vmem:[#allocation4 + $0x68] sm:$0xff]  ;;  %v1439_v58 = vld [vmem:[#allocation4 + $0x20] sm:$0xff] }
  0xa6   :  { %v215_v16 = vadd.f32 %v214_v15, %v183_v52  ;;  %v186_v1 = vmul.f32 %v1919_v17, %v1919_v17  ;;  %v187_v54 = vmul.f32 %v1924_v49, %v1924_v49  ;;  %1009 = vmatpush.bf16.msra.mxu3 %v1466_v29  ;;  %v1464_v35 = vld [vmem:[#allocation4 + $0xe8] sm:$0xff]  ;;  %v1447_v60 = vld [vmem:[#allocation4 + $0x60] sm:$0xff]  ;;  %v1438_v52 = vld [vmem:[#allocation4 + $0x18] sm:$0xff] }
  0xa7   :  { %v236_v18 = vadd.f32 %v235_v14, %v202_v3  ;;  %953 = vmatpush.bf16.msra.mxu0 %v1441_v7  ;;  %v1455_v3 = vld [vmem:[#allocation4 + $0xa0] sm:$0xff]  ;;  %v1446_v15 = vld [vmem:[#allocation4 + $0x58] sm:$0xff] }
  0xa8   :  { %v216_v44 = vadd.f32 %v215_v16, %v184_v22  ;;  %972 = vmatpush.bf16.msra.mxu1 %v1449_v25  ;;  %v1463_v13 = vld [vmem:[#allocation4 + $0xe0] sm:$0xff]  ;;  %v1462_v14 = vld [vmem:[#allocation4 + $0xd8] sm:$0xff]  ;;  %v1437_v22 = vld [vmem:[#allocation4 + $0x10] sm:$0xff] }
  0xa9   :  { %v237_v0 = vadd.f32 %v236_v18, %v203_v42  ;;  %991 = vmatpush.bf16.msra.mxu2 %v1457_v8  ;;  %v1454_v42 = vld [vmem:[#allocation4 + $0x98] sm:$0xff]  ;;  %v1445_v16 = vld [vmem:[#allocation4 + $0x50] sm:$0xff]  ;;  %v1435_v5 = vld [vmem:[#allocation4] sm:$0xff] }
  0xaa   :  { %v217_v9 = vadd.f32 %v216_v44, %v185_v34  ;;  %1010 = vmatpush.bf16.msra.mxu3 %v1465_v27  ;;  %v1453_v18 = vld [vmem:[#allocation4 + $0x90] sm:$0xff]  ;;  %v1443_v57 = vld [vmem:[#allocation4 + $0x40] sm:$0xff] }
  0xab   :  { %238 = vadd.xlane.f32.xlu1 %v237_v0  ;;  %954 = vmatpush.bf16.msra.mxu0 %v1440_v50  ;;  %v1461_v44 = vld [vmem:[#allocation4 + $0xd0] sm:$0xff]  ;;  %v1451_v25 = vld [vmem:[#allocation4 + $0x80] sm:$0xff] }
  0xac   :  { %v218_v43 = vadd.f32 %v217_v9, %v186_v1  ;;  %973 = vmatpush.bf16.msra.mxu1 %v1448_v51  ;;  %v1436_v1 = vld [vmem:[#allocation4 + $0x8] sm:$0xff]  ;;  %v1459_v8 = vld [vmem:[#allocation4 + $0xc0] sm:$0xff] }
  0xad   :  { %992 = vmatpush.bf16.msra.mxu2 %v1456_v53  ;;  %v1444_v9 = vld [vmem:[#allocation4 + $0x48] sm:$0xff] }
  0xae   :  { %v219_v19 = vadd.f32 %v218_v43, %v187_v54  ;;  %1011 = vmatpush.bf16.msra.mxu3 %v1464_v35  ;;  %v1452_v54 = vld [vmem:[#allocation4 + $0x88] sm:$0xff] }
  0xaf   :  { %955 = vmatpush.bf16.msra.mxu0 %v1439_v58  ;;  %v1460_v43 = vld [vmem:[#allocation4 + $0xc8] sm:$0xff]  ;;  %v1490_v58 = vld [vmem:[#allocation4 + $0x1b8] sm:$0xff] }
  0xb0   :  { %220 = vadd.xlane.f32.xlu2 %v219_v19  ;;  %974 = vmatpush.bf16.msra.mxu1 %v1447_v60  ;;  %v1474_v60 = vld [vmem:[#allocation4 + $0x138] sm:$0xff] }
  0xb1   :  { %993 = vmatpush.bf16.msra.mxu2 %v1455_v3  ;;  %v1482_v3 = vld [vmem:[#allocation4 + $0x178] sm:$0xff] }
  0xb2   :  { %1012 = vmatpush.bf16.msra.mxu3 %v1463_v13 }
  0xb3   :  { %956 = vmatpush.bf16.msra.mxu0 %v1438_v52 }
  0xb4   :  { %975 = vmatpush.bf16.msra.mxu1 %v1446_v15  ;;  %v1498_v15 = vld [vmem:[#allocation4 + $0x1f8] sm:$0xff] }
  0xb5   :  { %994 = vmatpush.bf16.msra.mxu2 %v1454_v42  ;;  %v1489_v42 = vld [vmem:[#allocation4 + $0x1b0] sm:$0xff] }
  0xb6   :  { %1013 = vmatpush.bf16.msra.mxu3 %v1462_v14  ;;  %v1473_v14 = vld [vmem:[#allocation4 + $0x130] sm:$0xff] }
  0xb7   :  { %957 = vmatpush.bf16.msra.mxu0 %v1437_v22 }
  0xb8   :  { %976 = vmatpush.bf16.msra.mxu1 %v1445_v16 }
  0xb9   :  { %995 = vmatpush.bf16.msra.mxu2 %v1453_v18  ;;  %v1481_v18 = vld [vmem:[#allocation4 + $0x170] sm:$0xff] }
  0xba   :  { %1014 = vmatpush.bf16.msra.mxu3 %v1461_v44 }
  0xbb   :  { %958 = vmatpush.bf16.msra.mxu0 %v1436_v1  ;;  %v1472_v1 = vld [vmem:[#allocation4 + $0x128] sm:$0xff] }
  0xbc   :  { %977 = vmatpush.bf16.msra.mxu1 %v1444_v9 }
  0xbd   :  { %996 = vmatpush.bf16.msra.mxu2 %v1452_v54  ;;  %v1480_v54 = vld [vmem:[#allocation4 + $0x168] sm:$0xff] }
  0xbe   :  { %1015 = vmatpush.bf16.msra.mxu3 %v1460_v43  ;;  %v1496_v43 = vld [vmem:[#allocation4 + $0x1e8] sm:$0xff] }
  0xbf   :  { %959 = vmatpush.bf16.msra.mxu0 %v1435_v5 }
  0xc0   :  { %978 = vmatpush.bf16.msra.mxu1 %v1443_v57 }
  0xc1   :  { %997 = vmatpush.bf16.msra.mxu2 %v1451_v25 }
  0xc2   :  { %1016 = vmatpush.bf16.msra.mxu3 %v1459_v8  ;;  %v1479_v8 = vld [vmem:[#allocation4 + $0x160] sm:$0xff] }
  0xc3   :  { %1028 = vmatpush.bf16.msrb.mxu0 %v1474_v60 }
  0xc4   :  { %1047 = vmatpush.bf16.msrb.mxu1 %v1482_v3  ;;  %v1963_v3 = vld [vmem:[%s2205_s2] sm:$0xff] }
  0xc5   :  { %1066 = vmatpush.bf16.msrb.mxu2 %v1490_v58 }
  0xc6   :  { %1085 = vmatpush.bf16.msrb.mxu3 %v1498_v15  ;;  %v1974_v15 = vld [vmem:[%s2206_s3] sm:$0xff] }
  0xc7   :  { %1029 = vmatpush.bf16.msrb.mxu0 %v1473_v14 }
  0xc8   :  { %1048 = vmatpush.bf16.msrb.mxu1 %v1481_v18  ;;  %v1486_v18 = vld [vmem:[#allocation4 + $0x198] sm:$0xff] }
  0xc9   :  { %1067 = vmatpush.bf16.msrb.mxu2 %v1489_v42 }
  0xcb   :  { %1030 = vmatpush.bf16.msrb.mxu0 %v1472_v1  ;;  %v1983_v1 = vperm.slane %v1963_v3, 2 }
  0xcc   :  { %1049 = vmatpush.bf16.msrb.mxu1 %v1480_v54  ;;  %v1494_v54 = vld [vmem:[#allocation4 + $0x1d8] sm:$0xff] }
  0xd0   :  { %1050 = vmatpush.bf16.msrb.mxu1 %v1479_v8  ;;  %v1469_v8 = vld [vmem:[#allocation4 + $0x110] sm:$0xff] }
 0x115   :  { %v230_v38 = vpop.xlane.xlu0 %229 }
 0x116   :  { %v242_v29 = vmul.f32 %v230_v38, %v1767_v10 }
 0x118   :  { %v212_v34 = vpop.xlane.xlu2 %211  ;;  %v1940_v51 = vadd.f32 1e-05, %v242_v29  ;;  %v1487_v29 = vld [vmem:[#allocation4 + $0x1a0] sm:$0xff] }
 0x119   :  { %v240_v0 = vmul.f32 %v212_v34, %v1767_v10  ;;  %v1497_v34 = vld [vmem:[#allocation4 + $0x1f0] sm:$0xff] }
 0x11a   :  { %1086 = vmatpush.bf16.msrb.mxu3 %v1497_v34  ;;  %v1470_v34 = vld [vmem:[#allocation4 + $0x118] sm:$0xff]  ;;  %vm274_vm11 = vweird.f32 %v1940_v51 }
 0x11b   :  { %v1933_v19 = vadd.f32 1e-05, %v240_v0 }
 0x11d   :  { %1557 = vrsqrt.f32 %v1933_v19  ;;  %vm254_vm2 = vweird.f32 %v1933_v19 }
 0x11e   :  { %v239_v7 = vpop.xlane.xlu1 %238  ;;  %1087 = vmatpush.bf16.msrb.mxu3 %v1496_v43 }
 0x11f   :  { %v243_v27 = vmul.f32 %v239_v7, %v1767_v10  ;;  %v1471_v7 = vld [vmem:[#allocation4 + $0x120] sm:$0xff] }
 0x120   :  { %1031 = vmatpush.bf16.msrb.mxu0 %v1471_v7  ;;  %v1995_v7 = vperm.slane %v1974_v15, 0 }
 0x121   :  { %v1938_v50 = vadd.f32 1e-05, %v243_v27  ;;  %v1495_v27 = vld [vmem:[#allocation4 + $0x1e0] sm:$0xff] }
 0x122   :  { %1088 = vmatpush.bf16.msrb.mxu3 %v1495_v27 }
 0x123   :  { %v1558_v53 = vpop.eup %1557  ;;  %1559 = vrsqrt.f32 %v1938_v50  ;;  %v221_v35 = vpop.xlane.xlu2 %220  ;;  %vm284_vm9 = vweird.f32 %v1938_v50 }
 0x124   :  { %v249_v13 = vmul.f32 %v1558_v53, %v1933_v19  ;;  %v241_v52 = vmul.f32 %v221_v35, %v1767_v10  ;;  %1561 = vrsqrt.f32 %v1940_v51  ;;  %v1488_v10 = vld [vmem:[#allocation4 + $0x1a8] sm:$0xff]  ;;  %vm255_vm1 = vweird.f32 %v1558_v53  ;;  %1032 = vmatpush.bf16.msrb.mxu0 %v1470_v34 }
 0x125   :  { %1068 = vmatpush.bf16.msrb.mxu2 %v1488_v10  ;;  %vm256_vm3 = vmor %vm254_vm2, %vm255_vm1  ;;  %v1969_v19 = vperm.slane %v1963_v3, 0  ;;  %v1484_v34 = vld [vmem:[#allocation4 + $0x188] sm:$0xff] }
 0x126   :  { %v250_v22 = vmul.f32 %v1558_v53, %v249_v13  ;;  %v1946_v16 = vadd.f32 1e-05, %v241_v52  ;;  %1089 = vmatpush.bf16.msrb.mxu3 %v1494_v54 }
 0x128   :  { %v251_v44 = vmul.f32 0.5, %v250_v22  ;;  %1563 = vrsqrt.f32 %v1946_v16  ;;  %vm264_vm5 = vweird.f32 %v1946_v16  ;;  %1033 = vmatpush.bf16.msrb.mxu0 %v1469_v8 }
 0x129   :  { %v1949_v0 = vpop.eup %1559  ;;  %1069 = vmatpush.bf16.msrb.mxu2 %v1487_v29 }
 0x12a   :  { %v252_v9 = vsub.f32 1.5, %v251_v44  ;;  %v279_v38 = vmul.f32 %v1949_v0, %v1938_v50  ;;  %v1953_v5 = vpop.eup %1561  ;;  %v1478_v44 = vld [vmem:[#allocation4 + $0x158] sm:$0xff]  ;;  %vm285_vm7 = vweird.f32 %v1949_v0 }
 0x12b   :  { %v269_v35 = vmul.f32 %v1953_v5, %v1940_v51  ;;  %1051 = vmatpush.bf16.msrb.mxu1 %v1478_v44  ;;  %vm275_vm8 = vweird.f32 %v1953_v5  ;;  %vm286_vm10 = vmor %vm284_vm9, %vm285_vm7 }
 0x12c   :  { %v253_v57 = vmul.f32 %v1558_v53, %v252_v9  ;;  %v280_v58 = vmul.f32 %v1949_v0, %v279_v38  ;;  %v1986_v9 = vperm.slane %v1963_v3, 3  ;;  %vm276_vm12 = vmor %vm274_vm11, %vm275_vm8 }
 0x12d   :  { %v270_v42 = vmul.f32 %v1953_v5, %v269_v35  ;;  %1070 = vmatpush.bf16.msrb.mxu2 %v1486_v18 }
 0x12e   :  { %v1564_v25 = vpop.eup %1563  ;;  %v1966_v13 = vsel %vm256_vm3, %v1558_v53, %v253_v57  ;;  %v281_v14 = vmul.f32 0.5, %v280_v58  ;;  %v1978_v53 = vperm.slane %v1963_v3, 1 }
 0x12f   :  { %v259_v60 = vmul.f32 %v1564_v25, %v1946_v16  ;;  %vm265_vm4 = vweird.f32 %v1564_v25  ;;  %v288_v10 = vmul.f32 %v1966_v13, %v1803_v40  ;;  %v289_v38 = vmul.f32 %v1966_v13, %v1806_v41  ;;  %v1485_v40 = vld [vmem:[#allocation4 + $0x190] sm:$0xff] }
 0x130   :  { %v290_v57 = vmul.f32 %v1966_v13, %v1809_v46  ;;  %v291_v29 = vmul.f32 %v1966_v13, %v1817_v48  ;;  %v271_v27 = vmul.f32 0.5, %v270_v42  ;;  %v282_v35 = vsub.f32 1.5, %v281_v14  ;;  %v1477_v41 = vld [vmem:[#allocation4 + $0x150] sm:$0xff]  ;;  %vm266_vm6 = vmor %vm264_vm5, %vm265_vm4 }
 0x131   :  { %v260_v52 = vmul.f32 %v1564_v25, %v259_v60  ;;  %v338_v46 = vmul.f32 %v1969_v19, %v288_v10  ;;  %v2001_v48 = vperm.slane %v1974_v15, 1  ;;  %v2004_v60 = vperm.slane %v1974_v15, 2  ;;  %1071 = vmatpush.bf16.msrb.mxu2 %v1485_v40  ;;  %1052 = vmatpush.bf16.msrb.mxu1 %v1477_v41  ;;  %v1483_v41 = vld [vmem:[#allocation4 + $0x180] sm:$0xff] }
 0x132   :  { %v339_v14 = vmul.f32 %v1978_v53, %v289_v38  ;;  %v340_v16 = vmul.f32 %v1983_v1, %v290_v57  ;;  %v341_v18 = vmul.f32 %v1986_v9, %v291_v29  ;;  %v272_v38 = vsub.f32 1.5, %v271_v27  ;;  %v1476_v29 = vld [vmem:[#allocation4 + $0x148] sm:$0xff] }
 0x133   :  { %v261_v22 = vmul.f32 0.5, %v260_v52  ;;  %v2007_v52 = vperm.slane %v1974_v15, 3  ;;  %v283_v57 = vmul.f32 %v1949_v0, %v282_v35 }
 0x134   :  { %v389_v8 = vadd.f32 %v2001_v48, %v339_v14  ;;  %v390_v27 = vadd.f32 %v2004_v60, %v340_v16 }
 0x135   :  { %v262_v43 = vsub.f32 1.5, %v261_v22  ;;  %v1493_v22 = vld [vmem:[#allocation4 + $0x1d0] sm:$0xff]  ;;  %v391_v35 = vadd.f32 %v2007_v52, %v341_v18  ;;  %1072 = vmatpush.bf16.msrb.mxu2 %v1484_v34  ;;  %1053 = vmatpush.bf16.msrb.mxu1 %v1476_v29  ;;  %v1467_v34 = vld [vmem:[#allocation4 + $0x100] sm:$0xff] }
 0x136   :  { %1090 = vmatpush.bf16.msrb.mxu3 %v1493_v22  ;;  %v273_v22 = vmul.f32 %v1953_v5, %v272_v38  ;;  %v1491_v38 = vld [vmem:[#allocation4 + $0x1c0] sm:$0xff] }
 0x137   :  { %v263_v58 = vmul.f32 %v1564_v25, %v262_v43  ;;  %v1468_v43 = vld [vmem:[#allocation4 + $0x108] sm:$0xff] }
 0x138   :  { %1034 = vmatpush.bf16.msrb.mxu0 %v1468_v43  ;;  %v2043_v43 = vsel %vm286_vm10, %v1949_v0, %v283_v57  ;;  %v2048_v50 = vsel %vm276_vm12, %v1953_v5, %v273_v22  ;;  %v293_v22 = vmul.f32 %v1966_v13, %v1831_v12 }
 0x139   :  { %v2009_v42 = vsel %vm266_vm6, %v1564_v25, %v263_v58  ;;  %v1492_v58 = vld [vmem:[#allocation4 + $0x1c8] sm:$0xff]  ;;  %1073 = vmatpush.bf16.msrb.mxu2 %v1483_v41  ;;  %v312_v29 = vmul.f32 %v2043_v43, %v1836_v59  ;;  %v313_v51 = vmul.f32 %v2043_v43, %v1839_v61  ;;  %v314_v0 = vmul.f32 %v2043_v43, %v1842_v62 }
 0x13a   :  { %v296_v44 = vmul.f32 %v2009_v42, %v1875_v39  ;;  %v297_v10 = vmul.f32 %v2009_v42, %v1878_v30  ;;  %v298_v54 = vmul.f32 %v2009_v42, %v1883_v32  ;;  %v299_v25 = vmul.f32 %v2009_v42, %v1893_v26  ;;  %1091 = vmatpush.bf16.msrb.mxu3 %v1492_v58 }
 0x13b   :  { %v388_v26 = vadd.f32 %v1995_v7, %v338_v46  ;;  %v315_v57 = vmul.f32 %v2043_v43, %v1845_v21  ;;  %v304_v5 = vmul.f32 %v2048_v50, %v1771_v20  ;;  %v306_v59 = vmul.f32 %v2048_v50, %v1777_v24 }
 0x13c   :  { %v346_v39 = vmul.f32 %v1969_v19, %v296_v44  ;;  %v347_v40 = vmul.f32 %v1978_v53, %v297_v10  ;;  %v348_v30 = vmul.f32 %v1983_v1, %v298_v54  ;;  %v349_v32 = vmul.f32 %v1986_v9, %v299_v25  ;;  %1035 = vmatpush.bf16.msrb.mxu0 %v1467_v34 }
 0x13d   :  { %v307_v61 = vmul.f32 %v2048_v50, %v1780_v28  ;;  %v363_v62 = vmul.f32 %v1978_v53, %v313_v51  ;;  %v365_v21 = vmul.f32 %v1986_v9, %v315_v57  ;;  %v354_v58 = vmul.f32 %v1969_v19, %v304_v5 }
 0x13e   :  { %v396_v44 = vadd.f32 %v1995_v7, %v346_v39  ;;  %v397_v10 = vadd.f32 %v2001_v48, %v347_v40  ;;  %v398_v54 = vadd.f32 %v2004_v60, %v348_v30  ;;  %v399_v25 = vadd.f32 %v2007_v52, %v349_v32  ;;  %v1475_v39 = vld [vmem:[#allocation4 + $0x140] sm:$0xff]  ;;  %1092 = vmatpush.bf16.msrb.mxu3 %v1491_v38 }
 0x13f   :  { %1054 = vmatpush.bf16.msrb.mxu1 %v1475_v39  ;;  %v305_v40 = vmul.f32 %v2048_v50, %v1774_v23  ;;  %v362_v30 = vmul.f32 %v1969_v19, %v312_v29  ;;  %v364_v32 = vmul.f32 %v1983_v1, %v314_v0  ;;  %v356_v23 = vmul.f32 %v1983_v1, %v306_v59 }
 0x140   :  { %v420_v46 = vpack.c.bf16 %v396_v44, %v388_v26  ;;  %v421_v14 = vpack.c.bf16 %v397_v10, %v389_v8  ;;  %v422_v16 = vpack.c.bf16 %v398_v54, %v390_v27  ;;  %v423_v18 = vpack.c.bf16 %v399_v25, %v391_v35 }
 0x141   :  { %v355_v20 = vmul.f32 %v1978_v53, %v305_v40  ;;  %v357_v26 = vmul.f32 %v1986_v9, %v307_v61  ;;  %v412_v24 = vadd.f32 %v1995_v7, %v362_v30  ;;  %v413_v28 = vadd.f32 %v2001_v48, %v363_v62 }
 0x142   :  { %960 = vmatmul.bf16.vlgmr.msra.gmra.mxu0 %v420_v46  ;;  %979 = vmatmul.bf16.vlgmr.msra.gmra.mxu1 %v421_v14  ;;  %v414_v8 = vadd.f32 %v2004_v60, %v364_v32  ;;  %v415_v27 = vadd.f32 %v2007_v52, %v365_v21  ;;  %v404_v35 = vadd.f32 %v1995_v7, %v354_v58  ;;  %v326_v25 = vperm.slane %v1963_v3, 4 }
 0x143   :  { %998 = vmatmul.bf16.vlgmr.msra.gmra.mxu2 %v422_v16  ;;  %1017 = vmatmul.bf16.vlgmr.msra.gmra.mxu3 %v423_v18  ;;  %v405_v41 = vadd.f32 %v2001_v48, %v355_v20  ;;  %v406_v19 = vadd.f32 %v2004_v60, %v356_v23  ;;  %v407_v53 = vadd.f32 %v2007_v52, %v357_v26  ;;  %v327_v46 = vperm.slane %v1963_v3, 5 }
 0x144   :  { %v428_v44 = vpack.c.bf16 %v412_v24, %v404_v35  ;;  %v300_v54 = vmul.f32 %v2009_v42, %v1905_v56  ;;  %v301_v7 = vmul.f32 %v2009_v42, %v1912_v6  ;;  %v302_v48 = vmul.f32 %v2009_v42, %v1919_v17 }
 0x145   :  { %v429_v1 = vpack.c.bf16 %v413_v28, %v405_v41  ;;  %v430_v10 = vpack.c.bf16 %v414_v8, %v406_v19  ;;  %v431_v9 = vpack.c.bf16 %v415_v27, %v407_v53  ;;  %v303_v60 = vmul.f32 %v2009_v42, %v1924_v49 }
 0x146   :  { %v292_v52 = vmul.f32 %v1966_v13, %v1828_v55  ;;  %v294_v56 = vmul.f32 %v1966_v13, %v1849_v63  ;;  %v328_v6 = vperm.slane %v1963_v3, 6  ;;  %v295_v17 = vmul.f32 %v1966_v13, %v1854_v11 }
 0x147   :  { %v329_v49 = vperm.slane %v1963_v3, 7  ;;  %v350_v42 = vmul.f32 %v326_v25, %v300_v54  ;;  %v351_v14 = vmul.f32 %v327_v46, %v301_v7  ;;  %v376_v34 = vperm.slane %v1974_v15, 4  ;;  %v1130_v7 = vld [vmem:[%s2209_s6 + $0x70] sm:$0xff] }
 0x148   :  { %v352_v55 = vmul.f32 %v328_v6, %v302_v48  ;;  %v342_v18 = vmul.f32 %v326_v25, %v292_v52  ;;  %v343_v12 = vmul.f32 %v327_v46, %v293_v22  ;;  %v377_v39 = vperm.slane %v1974_v15, 5  ;;  %v1129_v48 = vld [vmem:[%s2209_s6 + $0x68] sm:$0xff]  ;;  %v1127_v52 = vld [vmem:[%s2209_s6 + $0x58] sm:$0xff] }
 0x149   :  { %v353_v16 = vmul.f32 %v329_v49, %v303_v60  ;;  %v344_v38 = vmul.f32 %v328_v6, %v294_v56  ;;  %v378_v63 = vperm.slane %v1974_v15, 6  ;;  %v345_v29 = vmul.f32 %v329_v49, %v295_v17  ;;  %v1128_v60 = vld [vmem:[%s2209_s6 + $0x60] sm:$0xff]  ;;  %v1125_v22 = vld [vmem:[%s2209_s6 + $0x48] sm:$0xff]  ;;  %v1123_v17 = vld [vmem:[%s2209_s6 + $0x38] sm:$0xff] }
 0x14a   :  { %v379_v51 = vperm.slane %v1974_v15, 7  ;;  %v400_v0 = vadd.f32 %v376_v34, %v350_v42  ;;  %v401_v11 = vadd.f32 %v377_v39, %v351_v14  ;;  %v392_v57 = vadd.f32 %v376_v34, %v342_v18  ;;  %v1121_v42 = vld [vmem:[%s2209_s6 + $0x28] sm:$0xff] }
 0x14b   :  { %v402_v13 = vadd.f32 %v378_v63, %v352_v55  ;;  %v393_v5 = vadd.f32 %v377_v39, %v343_v12  ;;  %v394_v40 = vadd.f32 %v378_v63, %v344_v38  ;;  %v316_v21 = vmul.f32 %v2043_v43, %v1863_v37  ;;  %v1119_v12 = vld [vmem:[%s2209_s6 + $0x18] sm:$0xff] }
 0x14c   :  { %v403_v3 = vadd.f32 %v379_v51, %v353_v16  ;;  %v395_v59 = vadd.f32 %v379_v51, %v345_v29  ;;  %v424_v61 = vpack.c.bf16 %v400_v0, %v392_v57  ;;  %v317_v15 = vmul.f32 %v2043_v43, %v1870_v31  ;;  %v1553_v0 = vld [vmem:[%s2208_s5] ss:$0 sm:$0xff] }
 0x14d   :  { %v425_v30 = vpack.c.bf16 %v401_v11, %v393_v5  ;;  %v426_v62 = vpack.c.bf16 %v402_v13, %v394_v40  ;;  %v318_v58 = vmul.f32 %v2043_v43, %v1886_v47  ;;  %v319_v20 = vmul.f32 %v2043_v43, %v1900_v45  ;;  %v1117_v11 = vld [vmem:[%s2209_s6 + $0x8] sm:$0xff] }
 0x14e   :  { %v427_v32 = vpack.c.bf16 %v403_v3, %v395_v59  ;;  %v308_v23 = vmul.f32 %v2048_v50, %v1784_v33  ;;  %v309_v26 = vmul.f32 %v2048_v50, %v1793_v2  ;;  %v310_v24 = vmul.f32 %v2048_v50, %v1796_v4  ;;  %v1116_v3 = vld [vmem:[%s2209_s6] sm:$0xff] }
 0x14f   :  { %v311_v37 = vmul.f32 %v2048_v50, %v1798_v36  ;;  %v366_v28 = vmul.f32 %v326_v25, %v316_v21  ;;  %v367_v31 = vmul.f32 %v327_v46, %v317_v15  ;;  %v368_v8 = vmul.f32 %v328_v6, %v318_v58  ;;  %v1131_v50 = vld [vmem:[%s2209_s6 + $0x78] sm:$0xff] }
 0x150   :  { %v369_v27 = vmul.f32 %v329_v49, %v319_v20  ;;  %v358_v47 = vmul.f32 %v326_v25, %v308_v23  ;;  %v359_v35 = vmul.f32 %v327_v46, %v309_v26  ;;  %v360_v41 = vmul.f32 %v328_v6, %v310_v24  ;;  %1136 = vmatpush.msra.mxu0 %v1131_v50  ;;  %v1126_v25 = vld [vmem:[%s2209_s6 + $0x50] sm:$0xff]  ;;  %v1124_v6 = vld [vmem:[%s2209_s6 + $0x40] sm:$0xff] }
 0x151   :  { %v361_v45 = vmul.f32 %v329_v49, %v311_v37  ;;  %v416_v43 = vadd.f32 %v376_v34, %v366_v28  ;;  %v417_v19 = vadd.f32 %v377_v39, %v367_v31  ;;  %v418_v33 = vadd.f32 %v378_v63, %v368_v8  ;;  %1499 = vmatpush.msra.mxu1 %v1131_v50  ;;  %v1122_v49 = vld [vmem:[%s2209_s6 + $0x30] sm:$0xff] }
 0x152   :  { %965 = vmatmul.bf16.gmra.mxu0 %v428_v44  ;;  %984 = vmatmul.bf16.gmra.mxu1 %v429_v1  ;;  %v419_v53 = vadd.f32 %v379_v51, %v369_v27  ;;  %v408_v44 = vadd.f32 %v376_v34, %v358_v47  ;;  %v409_v2 = vadd.f32 %v377_v39, %v359_v35  ;;  %v1120_v34 = vld [vmem:[%s2209_s6 + $0x20] sm:$0xff] }
 0x153   :  { %1003 = vmatmul.bf16.gmra.mxu2 %v430_v10  ;;  %1022 = vmatmul.bf16.gmra.mxu3 %v431_v9  ;;  %v410_v1 = vadd.f32 %v378_v63, %v360_v41  ;;  %v411_v10 = vadd.f32 %v379_v51, %v361_v45  ;;  %v1118_v51 = vld [vmem:[%s2209_s6 + $0x10] sm:$0xff] }
 0x154   :  { %v432_v4 = vpack.c.bf16 %v416_v43, %v408_v44  ;;  %v433_v9 = vpack.c.bf16 %v417_v19, %v409_v2  ;;  %1500 = vmatpush.msra.mxu2 %v1131_v50  ;;  %1501 = vmatpush.msra.mxu3 %v1131_v50 }
 0x155   :  { %v434_v54 = vpack.c.bf16 %v418_v33, %v410_v1  ;;  %v435_v36 = vpack.c.bf16 %v419_v53, %v411_v10  ;;  %1137 = vmatpush.msra.mxu0 %v1130_v7  ;;  %1502 = vmatpush.msra.mxu1 %v1130_v7  ;;  %v1108_v33 = vld [vmem:[%s2204_s1] sm:$0xff] }
 0x156   :  { %1503 = vmatpush.msra.mxu2 %v1130_v7  ;;  %1504 = vmatpush.msra.mxu3 %v1130_v7 }
 0x157   :  { %1138 = vmatpush.msra.mxu0 %v1129_v48  ;;  %1505 = vmatpush.msra.mxu1 %v1129_v48 }
 0x158   :  { %1506 = vmatpush.msra.mxu2 %v1129_v48  ;;  %1507 = vmatpush.msra.mxu3 %v1129_v48 }
 0x159   :  { %1139 = vmatpush.msra.mxu0 %v1128_v60  ;;  %1508 = vmatpush.msra.mxu1 %v1128_v60 }
 0x15a   :  { %1509 = vmatpush.msra.mxu2 %v1128_v60  ;;  %1510 = vmatpush.msra.mxu3 %v1128_v60 }
 0x15b   :  { %1140 = vmatpush.msra.mxu0 %v1127_v52  ;;  %1511 = vmatpush.msra.mxu1 %v1127_v52 }
 0x15c   :  { %1512 = vmatpush.msra.mxu2 %v1127_v52  ;;  %1513 = vmatpush.msra.mxu3 %v1127_v52  ;;  %v1109_v52 = vld [vmem:[%s2204_s1 + $0x8] sm:$0xff] }
 0x15d   :  { %1141 = vmatpush.msra.mxu0 %v1126_v25  ;;  %1514 = vmatpush.msra.mxu1 %v1126_v25 }
 0x15e   :  { %1515 = vmatpush.msra.mxu2 %v1126_v25  ;;  %1516 = vmatpush.msra.mxu3 %v1126_v25 }
 0x15f   :  { %1142 = vmatpush.msra.mxu0 %v1125_v22  ;;  %1517 = vmatpush.msra.mxu1 %v1125_v22 }
 0x160   :  { %1518 = vmatpush.msra.mxu2 %v1125_v22  ;;  %1519 = vmatpush.msra.mxu3 %v1125_v22 }
 0x161   :  { %1143 = vmatpush.msra.mxu0 %v1124_v6  ;;  %1520 = vmatpush.msra.mxu1 %v1124_v6 }
 0x162   :  { %1036 = vmatmul.bf16.vlgmr.msrb.gmra.mxu0 %v424_v61  ;;  %1055 = vmatmul.bf16.vlgmr.msrb.gmra.mxu1 %v425_v30 }
 0x163   :  { %1074 = vmatmul.bf16.vlgmr.msrb.gmra.mxu2 %v426_v62  ;;  %1093 = vmatmul.bf16.vlgmr.msrb.gmra.mxu3 %v427_v32 }
 0x164   :  { %1521 = vmatpush.msra.mxu2 %v1124_v6  ;;  %1522 = vmatpush.msra.mxu3 %v1124_v6 }
 0x165   :  { %1144 = vmatpush.msra.mxu0 %v1123_v17  ;;  %1523 = vmatpush.msra.mxu1 %v1123_v17 }
 0x166   :  { %1524 = vmatpush.msra.mxu2 %v1123_v17  ;;  %1525 = vmatpush.msra.mxu3 %v1123_v17 }
 0x167   :  { %1145 = vmatpush.msra.mxu0 %v1122_v49  ;;  %1526 = vmatpush.msra.mxu1 %v1122_v49 }
 0x168   :  { %1527 = vmatpush.msra.mxu2 %v1122_v49  ;;  %1528 = vmatpush.msra.mxu3 %v1122_v49 }
 0x169   :  { %1146 = vmatpush.msra.mxu0 %v1121_v42  ;;  %1529 = vmatpush.msra.mxu1 %v1121_v42 }
 0x16a   :  { %1530 = vmatpush.msra.mxu2 %v1121_v42  ;;  %1531 = vmatpush.msra.mxu3 %v1121_v42 }
 0x16b   :  { %1147 = vmatpush.msra.mxu0 %v1120_v34  ;;  %1532 = vmatpush.msra.mxu1 %v1120_v34 }
 0x16c   :  { %1533 = vmatpush.msra.mxu2 %v1120_v34  ;;  %1534 = vmatpush.msra.mxu3 %v1120_v34  ;;  %v1110_v34 = vld [vmem:[%s2204_s1 + $0x10] sm:$0xff] }
 0x16d   :  { %1148 = vmatpush.msra.mxu0 %v1119_v12  ;;  %1535 = vmatpush.msra.mxu1 %v1119_v12 }
 0x16e   :  { %1536 = vmatpush.msra.mxu2 %v1119_v12  ;;  %1537 = vmatpush.msra.mxu3 %v1119_v12 }
 0x16f   :  { %1149 = vmatpush.msra.mxu0 %v1118_v51  ;;  %1538 = vmatpush.msra.mxu1 %v1118_v51 }
 0x170   :  { %1539 = vmatpush.msra.mxu2 %v1118_v51  ;;  %1540 = vmatpush.msra.mxu3 %v1118_v51 }
 0x171   :  { %1150 = vmatpush.msra.mxu0 %v1117_v11  ;;  %1541 = vmatpush.msra.mxu1 %v1117_v11 }
 0x172   :  { %1041 = vmatmul.bf16.gmra.mxu0 %v432_v4  ;;  %1060 = vmatmul.bf16.gmra.mxu1 %v433_v9 }
 0x173   :  { %1079 = vmatmul.bf16.gmra.mxu2 %v434_v54  ;;  %1098 = vmatmul.bf16.gmra.mxu3 %v435_v36 }
 0x174   :  { %1542 = vmatpush.msra.mxu2 %v1117_v11  ;;  %1543 = vmatpush.msra.mxu3 %v1117_v11 }
 0x175   :  { %1151 = vmatpush.msra.mxu0 %v1116_v3  ;;  %1544 = vmatpush.msra.mxu1 %v1116_v3 }
 0x176   :  { %1545 = vmatpush.msra.mxu2 %v1116_v3  ;;  %1546 = vmatpush.msra.mxu3 %v1116_v3 }
 0x1bf   :  { %v961_v46 = vpop.f32.mrf.mxu0  ;;  %v2143_v56 = vpop.f32.mrf.mxu1 }
 0x1c0   :  { %v962_v13 = vadd.f32 %v1553_v0, %v961_v46 }
 0x1c2   :  { %v981_v61 = vadd.f32 %v2143_v56, %v962_v13  ;;  %v1111_v13 = vld [vmem:[%s2204_s1 + $0x18] sm:$0xff] }
 0x1c6   :  { %v999_v14 = vpop.f32.mrf.mxu2  ;;  %v1018_v55 = vpop.f32.mrf.mxu3 }
 0x1c7   :  { %v963_v16 = vpop.f32.mrf.mxu0  ;;  %v982_v18 = vpop.f32.mrf.mxu1  ;;  %v1000_v30 = vadd.f32 %v999_v14, %v981_v61 }
 0x1c8   :  { %v964_v62 = vadd.f32 %v1553_v0, %v963_v16 }
 0x1c9   :  { %v1019_v15 = vadd.f32 %v1018_v55, %v1000_v30 }
 0x1ca   :  { %v983_v23 = vadd.f32 %v982_v18, %v964_v62 }
 0x1ce   :  { %v1001_v39 = vpop.f32.mrf.mxu2  ;;  %v1020_v38 = vpop.f32.mrf.mxu3 }
 0x1cf   :  { %v966_v63 = vpop.f32.mrf.mxu0  ;;  %v985_v29 = vpop.f32.mrf.mxu1  ;;  %v1002_v24 = vadd.f32 %v1001_v39, %v983_v23 }
 0x1d0   :  { %v967_v37 = vadd.f32 %v1553_v0, %v966_v63 }
 0x1d1   :  { %v1021_v27 = vadd.f32 %v1020_v38, %v1002_v24 }
 0x1d2   :  { %v986_v45 = vadd.f32 %v985_v29, %v967_v37 }
 0x1d6   :  { %v1004_v57 = vpop.f32.mrf.mxu2  ;;  %v1023_v5 = vpop.f32.mrf.mxu3 }
 0x1d7   :  { %v968_v40 = vpop.f32.mrf.mxu0  ;;  %v987_v59 = vpop.f32.mrf.mxu1  ;;  %v1005_v53 = vadd.f32 %v1004_v57, %v986_v45 }
 0x1d8   :  { %v969_v2 = vadd.f32 %v1553_v0, %v968_v40 }
 0x1d9   :  { %v1024_v54 = vadd.f32 %v1023_v5, %v1005_v53  ;;  %v1554_v5 = vld [vmem:[%s2210_s7] ss:$0 sm:$0xff] }
 0x1da   :  { %v988_v7 = vadd.f32 %v987_v59, %v969_v2 }
 0x1de   :  { %v1006_v32 = vpop.f32.mrf.mxu2  ;;  %v1025_v21 = vpop.f32.mrf.mxu3 }
 0x1df   :  { %v1037_v58 = vpop.f32.mrf.mxu0  ;;  %v1056_v20 = vpop.f32.mrf.mxu1  ;;  %v1007_v22 = vadd.f32 %v1006_v32, %v988_v7 }
 0x1e0   :  { %v1038_v26 = vadd.f32 %v1037_v58, %v1019_v15 }
 0x1e1   :  { %v1026_v42 = vadd.f32 %v1025_v21, %v1007_v22 }
 0x1e2   :  { %v1057_v28 = vadd.f32 %v1056_v20, %v1038_v26 }
 0x1e6   :  { %v1075_v31 = vpop.f32.mrf.mxu2  ;;  %v1094_v8 = vpop.f32.mrf.mxu3 }
 0x1e7   :  { %v1076_v47 = vadd.f32 %v1075_v31, %v1057_v28  ;;  %v1039_v35 = vpop.f32.mrf.mxu0  ;;  %v1058_v41 = vpop.f32.mrf.mxu1 }
 0x1e8   :  { %v1040_v19 = vadd.f32 %v1039_v35, %v1021_v27 }
 0x1e9   :  { %v1095_v43 = vadd.f32 %v1094_v8, %v1076_v47 }
 0x1ea   :  { %v1059_v10 = vadd.f32 %v1058_v41, %v1040_v19 }
 0x1eb   :  { %v1104_v44 = vmax.f32 %v1095_v43, 0.0 }
 0x1ed   :  { %v1112_v1 = vadd.f32 %v1108_v33, %v1104_v44 }
 0x1ee   :  { %v1077_v4 = vpop.f32.mrf.mxu2  ;;  %v1096_v9 = vpop.f32.mrf.mxu3 }
 0x1ef   :  { %v1078_v36 = vadd.f32 %v1077_v4, %v1059_v10  ;;  %1152 = vmatmul.f32.vlgmr.msra.gmra.mxu0 %v1112_v1  ;;  %v1042_v50 = vpop.f32.mrf.mxu0  ;;  %v1061_v25 = vpop.f32.mrf.mxu1 }
 0x1f0   :  { %v1043_v60 = vadd.f32 %v1042_v50, %v1024_v54 }
 0x1f1   :  { %v1097_v48 = vadd.f32 %v1096_v9, %v1078_v36 }
 0x1f2   :  { %v1062_v6 = vadd.f32 %v1061_v25, %v1043_v60 }
 0x1f3   :  { %v1105_v46 = vmax.f32 %v1097_v48, 0.0 }
 0x1f5   :  { %v1113_v56 = vadd.f32 %v1109_v52, %v1105_v46 }
 0x1f6   :  { %v1080_v17 = vpop.f32.mrf.mxu2  ;;  %v1099_v49 = vpop.f32.mrf.mxu3 }
 0x1f7   :  { %v1081_v14 = vadd.f32 %v1080_v17, %v1062_v6  ;;  %1155 = vmatmul.f32.vlgmr.msra.gmra.mxu1 %v1113_v56  ;;  %v1044_v55 = vpop.f32.mrf.mxu0  ;;  %v1063_v39 = vpop.f32.mrf.mxu1 }
 0x1f8   :  { %v1045_v18 = vadd.f32 %v1044_v55, %v1026_v42 }
 0x1f9   :  { %v1100_v16 = vadd.f32 %v1099_v49, %v1081_v14 }
 0x1fa   :  { %v1064_v63 = vadd.f32 %v1063_v39, %v1045_v18 }
 0x1fb   :  { %v1106_v12 = vmax.f32 %v1100_v16, 0.0 }
 0x1fd   :  { %v1114_v38 = vadd.f32 %v1110_v34, %v1106_v12 }
 0x1fe   :  { %v1082_v29 = vpop.f32.mrf.mxu2  ;;  %v1101_v0 = vpop.f32.mrf.mxu3 }
 0x1ff   :  { %v1083_v51 = vadd.f32 %v1082_v29, %v1064_v63  ;;  %1158 = vmatmul.f32.vlgmr.msra.gmra.mxu2 %v1114_v38 }
 0x201   :  { %v1102_v11 = vadd.f32 %v1101_v0, %v1083_v51 }
 0x203   :  { %v1107_v3 = vmax.f32 %v1102_v11, 0.0 }
 0x205   :  { %v1115_v57 = vadd.f32 %v1111_v13, %v1107_v3 }
 0x207   :  { %1161 = vmatmul.f32.vlgmr.msra.gmra.mxu3 %v1115_v57 }
 0x26c   :  { %v1153_v40 = vpop.f32.mrf.mxu0 }
 0x26d   :  { %v1154_v59 = vadd.f32 %v1554_v5, %v1153_v40 }
 0x26f   :  { %v1165_v61 = vmax.f32 %v1154_v59, 0.0 }
 0x271   :  { %1169 = vst [vmem:[%s2211_s8] sm:$0xff] %v1165_v61 }
 0x274   :  { %v1156_v30 = vpop.f32.mrf.mxu1 }
 0x275   :  { %v1157_v62 = vadd.f32 %v1554_v5, %v1156_v30 }
 0x277   :  { %v1166_v32 = vmax.f32 %v1157_v62, 0.0 }
 0x279   :  { %1170 = vst [vmem:[%s2211_s8 + $0x8] sm:$0xff] %v1166_v32 }
 0x282   :  { %v1159_v21 = vpop.f32.mrf.mxu2 }
 0x283   :  { %v1160_v15 = vadd.f32 %v1554_v5, %v1159_v21 }
 0x285   :  { %v1167_v58 = vmax.f32 %v1160_v15, 0.0 }
 0x287   :  { %1171 = vst [vmem:[%s2211_s8 + $0x10] sm:$0xff] %v1167_v58 }
 0x28a   :  { %v1162_v20 = vpop.f32.mrf.mxu3 }
 0x28b   :  { %v1163_v23 = vadd.f32 %v1554_v5, %v1162_v20 }
 0x28d   :  { %v1168_v26 = vmax.f32 %v1163_v23, 0.0 }
 0x28f   :  { %1172 = vst [vmem:[%s2211_s8 + $0x18] sm:$0xff] %v1168_v26 }
 0x290   :  { %1177 = vsyncpa [#allocation3], 1 }
 0x291   :  { %1178 = vsyncpa [#allocation5], 1 }

</bundles_post_ra>
